<compile_context>
chip_gen: v7x
topology: tpu7x:2x2x1
jax: 0.10.0
libtpu: 0.0.40
codegen_flags: <defaults>
</compile_context>

<pallas_src>
import functools
import math

import jax
import jax.numpy as jnp
from jax.experimental import pallas as pl
from jax.experimental.pallas import tpu as pltpu

LEAKY_SLOPE = 0.2
IN_EPS = 1e-5
MXU_DTYPE = jnp.bfloat16                 # MXU-native operand dtype on v5e/v6e/v7x
_CONCAT_K_MAX = 1024                     # materialize K=9*Cin im2col only below this
_VMEM_LIMIT_BYTES = 48 * 1024 * 1024     # explicit scoped-VMEM limit (< v7x 64 MiB)


def _round16(c):
    """bf16 packs 16 rows per sublane tile; x16 keeps im2col concats aligned."""
    return ((c + 15) // 16) * 16


# --------------------------------------------------------------------------
# in-kernel helpers: halo taps (XLU lane roll + precomputed mask) and 3x3 conv
# --------------------------------------------------------------------------
def _tap(a, t, masks, H, W):
    """Tap t = 3*dy+dx of a (C, H*W) map: value at (r+dy-1, s+dx-1), 0 if OOB.

    pltpu.roll follows jnp.roll semantics (roll(x, k)[p] == x[p-k]), so
    shift = (-off) % HW realizes x[p+off]; the boundary mask is precomputed.
    """
    HW = H * W
    dy, dx = t // 3, t % 3
    off = (dy - 1) * W + (dx - 1)
    y = pltpu.roll(a, (-off) % HW, 1) if off else a
    if t != 4:                             # center tap needs no boundary mask
        y = y * masks[t:t + 1, :]
    return y


def _conv3x3_s1(a, w_ref, b_col, masks, H, W):
    """3x3 / stride-1 / pad-1 conv of a (Cin, H*W) f32 map against the
    pre-flattened (Cout, 9*Cin) tap-major weight matrix (bf16 operands,
    f32 accumulation)."""
    f32 = jnp.float32
    cin = a.shape[0]
    if 9 * cin <= _CONCAT_K_MAX:
        # small Cin: one K=9*Cin matmul against a materialized bf16 patch
        patch = jnp.concatenate(
            [_tap(a, t, masks, H, W).astype(MXU_DTYPE) for t in range(9)],
            axis=0)
        out = jnp.dot(w_ref[...], patch, preferred_element_type=f32)
    else:
        # large Cin: per-tap accumulation -- no (9*Cin, HW) VMEM high-water mark
        out = jnp.zeros((w_ref.shape[0], a.shape[1]), f32)
        for t in range(9):
            out = out + jnp.dot(w_ref[:, t * cin:(t + 1) * cin],
                                _tap(a, t, masks, H, W).astype(MXU_DTYPE),
                                preferred_element_type=f32)
    if b_col is not None:
        out = out + b_col
    return out


# --------------------------------------------------------------------------
# fused stage kernel
# --------------------------------------------------------------------------
def _fused_stage_kernel(*refs, H, W, cin_p, shortcut, use_res):
    it = iter(refs)
    x_ref = next(it)                          # (1, cin_p, HW)        f32
    segp_ref = next(it)                       # (1, 9*ncs_p, HW)      bf16
    mask_ref = next(it)                       # (9, HW)               f32
    ws_ref, bs_ref = next(it), next(it)       # main SPADE mlp_shared
    wgb_ref, bgb_ref = next(it), next(it)     # main SPADE stacked gamma|beta
    wp_ref, bp_ref = next(it), next(it)       # main 3x3 conv (conv0 / conv1)
    if shortcut:
        wss_ref, bss_ref = next(it), next(it)    # shortcut SPADE mlp_shared
        wgbs_ref, bgbs_ref = next(it), next(it)  # shortcut stacked gamma|beta
        wsc_ref = next(it)                       # 1x1 shortcut conv (no bias)
    res_ref = next(it) if use_res else None
    o_ref = next(it)
    xs_ref = next(it) if shortcut else None

    f32 = jnp.float32
    x = x_ref[0].astype(f32)
    segp = segp_ref[0]                        # bf16; shared by all SPADE uses
    masks = mask_ref[...]                     # precomputed halo boundary masks

    # InstanceNorm2d(affine=False): two-pass stats (avoids E[x^2]-E[x]^2
    # cancellation) -- computed ONCE and shared by main + shortcut paths.
    mean = jnp.mean(x, axis=1, keepdims=True)
    xc = x - mean
    var = jnp.mean(xc * xc, axis=1, keepdims=True)
    x_hat = xc * jax.lax.rsqrt(var + IN_EPS)

    def spade(ws, bs, wgb, bgb):
        # mlp_shared: 3x3/s2 conv == one K=9*ncs matmul against the hoisted
        # stride-2 seg im2col, with fused ReLU
        actv = jnp.maximum(
            jnp.dot(ws[...], segp, preferred_element_type=f32) + bs[...], 0.0)
        # gamma & beta convs fused into one stacked matmul on one actv patch
        gb = _conv3x3_s1(actv, wgb, bgb[...], masks, H, W)
        gamma, beta = gb[:cin_p], gb[cin_p:]
        return x_hat * (1.0 + gamma) + beta

    # main path: conv{0,1}(leaky_relu(SPADE(x, seg)))
    h = spade(ws_ref, bs_ref, wgb_ref, bgb_ref)
    h = jnp.where(h > 0, h, LEAKY_SLOPE * h)          # F.leaky_relu(., 0.2)
    out = _conv3x3_s1(h, wp_ref, bp_ref[...], masks, H, W)
    if use_res:
        out = out + res_ref[0].astype(f32)
    o_ref[0] = out.astype(o_ref.dtype)                # lane-dense full store

    if shortcut:
        # learned shortcut: convs(norms(x, seg)); no activation, 1x1, no bias
        hs = spade(wss_ref, bss_ref, wgbs_ref, bgbs_ref)
        xs = jnp.dot(wsc_ref[...], hs.astype(MXU_DTYPE),
                     preferred_element_type=f32)
        xs_ref[0] = xs.astype(xs_ref.dtype)


# --------------------------------------------------------------------------
# wrapper for one fused stage
# --------------------------------------------------------------------------
def _fused_stage(x_flat, seg_patch, masks, spade_main, w_post, b_post, *,
                 out_ch, H, W, spade_sc=None, w_sc=None, sc_out_ch=None,
                 residual=None):
    """One fused block stage; returns dx, or (dx, xs) when the learned
    shortcut is fused in."""
    N, cin_p, HW = x_flat.shape
    shortcut = spade_sc is not None
    use_res = residual is not None

    def call(buffer_weights):
        def inv(a):   # grid-invariant operand (weights/masks): same block/step
            zeros = (0,) * a.ndim
            if buffer_weights:
                return pl.BlockSpec(a.shape, lambda n: zeros,
                                    pipeline_mode=pl.Buffered(1))
            return pl.BlockSpec(a.shape, lambda n: zeros)

        arrays = [x_flat, seg_patch, masks,
                  spade_main["ws"], spade_main["bs"],
                  spade_main["wgb"], spade_main["bgb"],
                  w_post, b_post]
        specs = [pl.BlockSpec((1, cin_p, HW), lambda n: (n, 0, 0)),
                 pl.BlockSpec((1, seg_patch.shape[1], HW), lambda n: (n, 0, 0)),
                 inv(masks),
                 inv(spade_main["ws"]), inv(spade_main["bs"]),
                 inv(spade_main["wgb"]), inv(spade_main["bgb"]),
                 inv(w_post), inv(b_post)]
        if shortcut:
            arrays += [spade_sc["ws"], spade_sc["bs"],
                       spade_sc["wgb"], spade_sc["bgb"], w_sc]
            specs += [inv(spade_sc["ws"]), inv(spade_sc["bs"]),
                      inv(spade_sc["wgb"]), inv(spade_sc["bgb"]), inv(w_sc)]
        if use_res:
            arrays.append(residual)
            specs.append(pl.BlockSpec((1, residual.shape[1], HW),
                                      lambda n: (n, 0, 0)))

        if shortcut:
            out_shape = (jax.ShapeDtypeStruct((N, out_ch, HW), x_flat.dtype),
                         jax.ShapeDtypeStruct((N, sc_out_ch, HW), x_flat.dtype))
            out_specs = (pl.BlockSpec((1, out_ch, HW), lambda n: (n, 0, 0)),
                         pl.BlockSpec((1, sc_out_ch, HW), lambda n: (n, 0, 0)))
        else:
            out_shape = jax.ShapeDtypeStruct((N, out_ch, HW), x_flat.dtype)
            out_specs = pl.BlockSpec((1, out_ch, HW), lambda n: (n, 0, 0))

        kernel = functools.partial(_fused_stage_kernel, H=H, W=W, cin_p=cin_p,
                                   shortcut=shortcut, use_res=use_res)
        return pl.pallas_call(
            kernel,
            out_shape=out_shape,
            grid=(N,),
            in_specs=specs,
            out_specs=out_specs,
            compiler_params=pltpu.CompilerParams(
                dimension_semantics=("parallel",),
                vmem_limit_bytes=_VMEM_LIMIT_BYTES),
        )(*arrays)

    try:
        return call(buffer_weights=True)
    except Exception:
        # pl.Buffered(1) single-buffering of grid-invariant operands is not
        # supported on every jax version/backend; fall back to the default
        # double-buffered pipeline (correctness-identical).
        return call(buffer_weights=False)


# --------------------------------------------------------------------------
# host-side preprocessing shared by every stage
# --------------------------------------------------------------------------
def _tap_masks(H, W):
    """(9, H*W) f32 boundary masks for the 3x3/stride-1/pad-1 halo taps."""
    idx = jnp.arange(H * W, dtype=jnp.int32)
    py, px = idx // W, idx % W
    rows = []
    for dy in range(3):
        for dx in range(3):
            ok = ((py + dy - 1 >= 0) & (py + dy - 1 < H)
                  & (px + dx - 1 >= 0) & (px + dx - 1 < W))
            rows.append(ok)
    return jnp.stack(rows, axis=0).astype(jnp.float32)


def _seg_im2col_s2(seg_nchw, ncs_p, H, W):
    """3x3 / stride-2 / pad-1 im2col of seg (N, ncs, 2H, 2W) -> (N, 9*ncs_p, H*W),
    tap-major, pre-cast to the MXU operand dtype."""
    N, ncs = seg_nchw.shape[:2]
    segp = jnp.pad(seg_nchw, ((0, 0), (0, ncs_p - ncs), (1, 1), (1, 1)))
    taps = [segp[:, :, dy:dy + 2 * H:2, dx:dx + 2 * W:2]
            for dy in range(3) for dx in range(3)]
    return (jnp.concatenate(taps, axis=1)
            .reshape(N, 9 * ncs_p, H * W).astype(MXU_DTYPE))


# --------------------------------------------------------------------------
# SPADEResnetBlock forward
# --------------------------------------------------------------------------
def spade_resnet_block_forward(params, x_nchw, seg_nchw):
    N, fin, H, W = x_nchw.shape
    assert seg_nchw.shape[2] == 2 * H and seg_nchw.shape[3] == 2 * W
    HW = H * W
    fin_p, fmid_p, fout_p = params["fin_p"], params["fmid_p"], params["fout_p"]
    fout, ncs_p = params["fout"], params["ncs_p"]

    # channel-major flat layout; channels zero-padded to a bf16 sublane tile
    x = jnp.pad(x_nchw.reshape(N, fin, HW), ((0, 0), (0, fin_p - fin), (0, 0)))

    # hoisted once and reused by every SPADE stage
    seg_patch = _seg_im2col_s2(seg_nchw, ncs_p, H, W)       # (N, 9*ncs_p, HW)
    masks = _tap_masks(H, W)                                # (9, HW)

    if params["learned_shortcut"]:
        # stage A fused with the learned shortcut: shares x, x_hat, seg patch
        dx, xs = _fused_stage(
            x, seg_patch, masks, params["norm0"], params["w0"], params["b0"],
            out_ch=fmid_p, H=H, W=W,
            spade_sc=params["norms"], w_sc=params["ws"], sc_out_ch=fout_p)
    else:
        dx = _fused_stage(x, seg_patch, masks, params["norm0"],
                          params["w0"], params["b0"],
                          out_ch=fmid_p, H=H, W=W)
        xs = x                                # fin == fout  ->  fin_p == fout_p

    out = _fused_stage(dx, seg_patch, masks, params["norm1"],
                       params["w1"], params["b1"],
                       out_ch=fout_p, H=H, W=W, residual=xs)
    return out[:, :fout].reshape(N, fout, H, W)


# --------------------------------------------------------------------------
# Deterministic parameter init (PyTorch Conv2d-style uniform bounds),
# spectral norm, and host-side weight preprocessing (pad + flatten + bf16)
# --------------------------------------------------------------------------
def _init_conv(key, kh, kw, cin, cout, bias=True):
    fan_in = cin * kh * kw
    bound = 1.0 / math.sqrt(fan_in)
    kw_, kb_ = jax.random.split(key)
    w = jax.random.uniform(kw_, (kh, kw, cin, cout), jnp.float32, -bound, bound)
    b = (jax.random.uniform(kb_, (cout,), jnp.float32, -bound, bound)
         if bias else None)
    return w, b


def _spectral_normalize(w, iters=30):
    # TODO(synk): torch.nn.utils.spectral_norm keeps persistent u/v buffers and
    # does one power iteration per forward; here we divide by a converged
    # power-iteration estimate of sigma(W.view(Cout, -1)) instead.
    kh, kw, cin, cout = w.shape
    mat = jnp.transpose(w, (3, 2, 0, 1)).reshape(cout, cin * kh * kw)
    u = jnp.ones((mat.shape[0],), jnp.float32)
    v = jnp.ones((mat.shape[1],), jnp.float32)
    for _ in range(iters):
        u = mat @ v
        u = u / (jnp.linalg.norm(u) + 1e-12)
        v = mat.T @ u
        v = v / (jnp.linalg.norm(v) + 1e-12)
    sigma = u @ (mat @ v)
    return w / sigma


def _conv_mat(w, cin_p, cout_p):
    """HWIO conv weight -> (cout_p, kh*kw*cin_p) tap-major bf16 matmul matrix."""
    kh, kw, cin, cout = w.shape
    wp = jnp.pad(w, ((0, 0), (0, 0), (0, cin_p - cin), (0, cout_p - cout)))
    return (jnp.transpose(wp, (3, 0, 1, 2))
            .reshape(cout_p, kh * kw * cin_p).astype(MXU_DTYPE))


def _bias_col(b, cout_p):
    return jnp.pad(b, (0, cout_p - b.shape[0])).reshape(cout_p, 1).astype(jnp.float32)


def init_params(key, fin, fout, fhidden, nc_style=3):
    fmiddle = min(fin, fout)
    learned_shortcut = fin != fout
    fin_p, fmid_p, fout_p = _round16(fin), _round16(fmiddle), _round16(fout)
    fh_p, ncs_p = _round16(fhidden), _round16(nc_style)
    keys = jax.random.split(key, 6)

    def make_spade(k, nc_in, nc_in_p):
        k1, k2, k3 = jax.random.split(k, 3)
        ws, bs = _init_conv(k1, 3, 3, nc_style, fhidden)
        wg, bg = _init_conv(k2, 3, 3, fhidden, nc_in)
        wb, bb = _init_conv(k3, 3, 3, fhidden, nc_in)
        # gamma & beta convs fused into one stacked weight/bias
        wgb = jnp.concatenate([_conv_mat(wg, fh_p, nc_in_p),
                               _conv_mat(wb, fh_p, nc_in_p)], axis=0)
        bgb = jnp.concatenate([_bias_col(bg, nc_in_p),
                               _bias_col(bb, nc_in_p)], axis=0)
        return {"ws": _conv_mat(ws, ncs_p, fh_p), "bs": _bias_col(bs, fh_p),
                "wgb": wgb, "bgb": bgb}

    w0, b0 = _init_conv(keys[0], 3, 3, fin, fmiddle)
    w1, b1 = _init_conv(keys[1], 3, 3, fmiddle, fout)
    params = {
        "learned_shortcut": learned_shortcut,
        "fout": fout, "fin_p": fin_p, "fmid_p": fmid_p, "fout_p": fout_p,
        "ncs_p": ncs_p,
        "w0": _conv_mat(_spectral_normalize(w0), fin_p, fmid_p),
        "b0": _bias_col(b0, fmid_p),
        "w1": _conv_mat(_spectral_normalize(w1), fmid_p, fout_p),
        "b1": _bias_col(b1, fout_p),
        "norm0": make_spade(keys[2], fin, fin_p),
        "norm1": make_spade(keys[3], fmiddle, fmid_p),
    }
    if learned_shortcut:
        ws_, _ = _init_conv(keys[4], 1, 1, fin, fout, bias=False)
        params["ws"] = _conv_mat(_spectral_normalize(ws_), fin_p, fout_p)
        params["norms"] = make_spade(keys[5], fin, fin_p)
    return params


if __name__ == "__main__":
    key = jax.random.PRNGKey(0)
    kx, kseg, kp = jax.random.split(key, 3)

    N, fin, fout, fhidden, H, W = 2, 4, 8, 8, 16, 16
    x = jax.random.normal(kx, (N, fin, H, W), jnp.float32)            # NCHW
    seg = jax.random.normal(kseg, (N, 3, 2 * H, 2 * W), jnp.float32)  # 2x spatial

    params = init_params(kp, fin, fout, fhidden)
    out = spade_resnet_block_forward(params, x, seg)
    out = jax.block_until_ready(out)
    assert out.shape == (N, fout, H, W), out.shape
    assert bool(jnp.all(jnp.isfinite(out)))
    print("KERNEL_OK")
</pallas_src>

<mosaic_0001>
module attributes {stable_mosaic.version = 11 : i64} {
  func.func @_fused_stage_kernel(%arg0: i32, %arg1: memref<1x16x256xf32, #tpu.memory_space<vmem>>, %arg2: memref<1x144x256xbf16, #tpu.memory_space<vmem>>, %arg3: memref<9x256xf32, #tpu.memory_space<vmem>>, %arg4: memref<16x144xbf16, #tpu.memory_space<vmem>>, %arg5: memref<16x1xf32, #tpu.memory_space<vmem>>, %arg6: memref<32x144xbf16, #tpu.memory_space<vmem>>, %arg7: memref<32x1xf32, #tpu.memory_space<vmem>>, %arg8: memref<16x144xbf16, #tpu.memory_space<vmem>>, %arg9: memref<16x1xf32, #tpu.memory_space<vmem>>, %arg10: memref<16x144xbf16, #tpu.memory_space<vmem>>, %arg11: memref<16x1xf32, #tpu.memory_space<vmem>>, %arg12: memref<32x144xbf16, #tpu.memory_space<vmem>>, %arg13: memref<32x1xf32, #tpu.memory_space<vmem>>, %arg14: memref<16x16xbf16, #tpu.memory_space<vmem>>, %arg15: memref<1x16x256xf32, #tpu.memory_space<vmem>>, %arg16: memref<1x16x256xf32, #tpu.memory_space<vmem>>) attributes {dimension_semantics = [#tpu.dimension_semantics<parallel>], iteration_bounds = array<i64: 2>, scalar_prefetch = 0 : i64, scratch_operands = 0 : i64, tpu.core_type = #tpu.core_type<tc>, window_params = [{transform_indices = @transform_0, window_bounds = array<i64: 1, 16, 256>}, {transform_indices = @transform_1, window_bounds = array<i64: 1, 144, 256>}, {pipeline_mode = #tpu.pipeline_mode<synchronous>, transform_indices = @transform_2, window_bounds = array<i64: 9, 256>}, {pipeline_mode = #tpu.pipeline_mode<synchronous>, transform_indices = @transform_3, window_bounds = array<i64: 16, 144>}, {pipeline_mode = #tpu.pipeline_mode<synchronous>, transform_indices = @transform_4, window_bounds = array<i64: 16, 1>}, {pipeline_mode = #tpu.pipeline_mode<synchronous>, transform_indices = @transform_5, window_bounds = array<i64: 32, 144>}, {pipeline_mode = #tpu.pipeline_mode<synchronous>, transform_indices = @transform_6, window_bounds = array<i64: 32, 1>}, {pipeline_mode = #tpu.pipeline_mode<synchronous>, transform_indices = @transform_7, window_bounds = array<i64: 16, 144>}, {pipeline_mode = #tpu.pipeline_mode<synchronous>, transform_indices = @transform_8, window_bounds = array<i64: 16, 1>}, {pipeline_mode = #tpu.pipeline_mode<synchronous>, transform_indices = @transform_9, window_bounds = array<i64: 16, 144>}, {pipeline_mode = #tpu.pipeline_mode<synchronous>, transform_indices = @transform_10, window_bounds = array<i64: 16, 1>}, {pipeline_mode = #tpu.pipeline_mode<synchronous>, transform_indices = @transform_11, window_bounds = array<i64: 32, 144>}, {pipeline_mode = #tpu.pipeline_mode<synchronous>, transform_indices = @transform_12, window_bounds = array<i64: 32, 1>}, {pipeline_mode = #tpu.pipeline_mode<synchronous>, transform_indices = @transform_13, window_bounds = array<i64: 16, 16>}, {transform_indices = @transform_14, window_bounds = array<i64: 1, 16, 256>}, {transform_indices = @transform_15, window_bounds = array<i64: 1, 16, 256>}]} {
    %c0 = arith.constant 0 : index
    %c0_0 = arith.constant 0 : index
    %c0_1 = arith.constant 0 : index
    %0 = vector.load %arg1[%c0, %c0_0, %c0_1] : memref<1x16x256xf32, #tpu.memory_space<vmem>>, vector<1x16x256xf32>
    %1 = vector.shape_cast %0 : vector<1x16x256xf32> to vector<16x256xf32>
    %c0_2 = arith.constant 0 : index
    %c0_3 = arith.constant 0 : index
    %c0_4 = arith.constant 0 : index
    %2 = vector.load %arg2[%c0_2, %c0_3, %c0_4] : memref<1x144x256xbf16, #tpu.memory_space<vmem>>, vector<1x144x256xbf16>
    %3 = vector.shape_cast %2 : vector<1x144x256xbf16> to vector<144x256xbf16>
    %c0_5 = arith.constant 0 : index
    %c0_6 = arith.constant 0 : index
    %4 = vector.load %arg3[%c0_5, %c0_6] : memref<9x256xf32, #tpu.memory_space<vmem>>, vector<9x256xf32>
    %cst = arith.constant dense<0.000000e+00> : vector<16xf32>
    %5 = vector.multi_reduction <add>, %1, %cst [1] : vector<16x256xf32> to vector<16xf32>
    %6 = vector.shape_cast %5 : vector<16xf32> to vector<16x1xf32>
    %cst_7 = arith.constant 2.560000e+02 : f32
    %7 = vector.broadcast %cst_7 : f32 to vector<16x1xf32>
    %8 = arith.divf %6, %7 : vector<16x1xf32>
    %9 = vector.broadcast %8 : vector<16x1xf32> to vector<16x256xf32>
    %10 = arith.subf %1, %9 : vector<16x256xf32>
    %11 = arith.mulf %10, %10 : vector<16x256xf32>
    %cst_8 = arith.constant dense<0.000000e+00> : vector<16xf32>
    %12 = vector.multi_reduction <add>, %11, %cst_8 [1] : vector<16x256xf32> to vector<16xf32>
    %13 = vector.shape_cast %12 : vector<16xf32> to vector<16x1xf32>
    %cst_9 = arith.constant 2.560000e+02 : f32
    %14 = vector.broadcast %cst_9 : f32 to vector<16x1xf32>
    %15 = arith.divf %13, %14 : vector<16x1xf32>
    %cst_10 = arith.constant 9.99999974E-6 : f32
    %16 = vector.broadcast %cst_10 : f32 to vector<16x1xf32>
    %17 = arith.addf %15, %16 : vector<16x1xf32>
    %18 = math.rsqrt %17 : vector<16x1xf32>
    %19 = vector.broadcast %18 : vector<16x1xf32> to vector<16x256xf32>
    %20 = arith.mulf %10, %19 : vector<16x256xf32>
    %c0_11 = arith.constant 0 : index
    %c0_12 = arith.constant 0 : index
    %21 = vector.load %arg4[%c0_11, %c0_12] : memref<16x144xbf16, #tpu.memory_space<vmem>>, vector<16x144xbf16>
    %cst_13 = arith.constant dense<0.000000e+00> : vector<16x256xf32>
    %22 = tpu.matmul %21, %3, %cst_13 {dimension_numbers = #tpu.dot_dimension_numbers<[1], [0], [0], [1], [0, 0, 1, 1], [], []>} : vector<16x144xbf16>, vector<144x256xbf16>, vector<16x256xf32> -> vector<16x256xf32>
    %c0_14 = arith.constant 0 : index
    %c0_15 = arith.constant 0 : index
    %23 = vector.load %arg5[%c0_14, %c0_15] : memref<16x1xf32, #tpu.memory_space<vmem>>, vector<16x1xf32>
    %24 = vector.broadcast %23 : vector<16x1xf32> to vector<16x256xf32>
    %25 = arith.addf %22, %24 : vector<16x256xf32>
    %cst_16 = arith.constant 0.000000e+00 : f32
    %26 = vector.broadcast %cst_16 : f32 to vector<16x256xf32>
    %27 = arith.maximumf %25, %26 : vector<16x256xf32>
    %c0_17 = arith.constant 0 : index
    %c0_18 = arith.constant 0 : index
    %28 = vector.load %arg7[%c0_17, %c0_18] : memref<32x1xf32, #tpu.memory_space<vmem>>, vector<32x1xf32>
    %c17_i32 = arith.constant 17 : i32
    %29 = tpu.dynamic_rotate %27 by %c17_i32 dim 1 : vector<16x256xf32>, i32 -> vector<16x256xf32>
    %30 = vector.extract_strided_slice %4 {offsets = [0, 0], sizes = [1, 256], strides = [1, 1]} : vector<9x256xf32> to vector<1x256xf32>
    %31 = vector.broadcast %30 : vector<1x256xf32> to vector<16x256xf32>
    %32 = arith.mulf %29, %31 : vector<16x256xf32>
    %33 = arith.truncf %32 : vector<16x256xf32> to vector<16x256xbf16>
    %c16_i32 = arith.constant 16 : i32
    %34 = tpu.dynamic_rotate %27 by %c16_i32 dim 1 : vector<16x256xf32>, i32 -> vector<16x256xf32>
    %35 = vector.extract_strided_slice %4 {offsets = [1, 0], sizes = [1, 256], strides = [1, 1]} : vector<9x256xf32> to vector<1x256xf32>
    %36 = vector.broadcast %35 : vector<1x256xf32> to vector<16x256xf32>
    %37 = arith.mulf %34, %36 : vector<16x256xf32>
    %38 = arith.truncf %37 : vector<16x256xf32> to vector<16x256xbf16>
    %c15_i32 = arith.constant 15 : i32
    %39 = tpu.dynamic_rotate %27 by %c15_i32 dim 1 : vector<16x256xf32>, i32 -> vector<16x256xf32>
    %40 = vector.extract_strided_slice %4 {offsets = [2, 0], sizes = [1, 256], strides = [1, 1]} : vector<9x256xf32> to vector<1x256xf32>
    %41 = vector.broadcast %40 : vector<1x256xf32> to vector<16x256xf32>
    %42 = arith.mulf %39, %41 : vector<16x256xf32>
    %43 = arith.truncf %42 : vector<16x256xf32> to vector<16x256xbf16>
    %c1_i32 = arith.constant 1 : i32
    %44 = tpu.dynamic_rotate %27 by %c1_i32 dim 1 : vector<16x256xf32>, i32 -> vector<16x256xf32>
    %45 = vector.extract_strided_slice %4 {offsets = [3, 0], sizes = [1, 256], strides = [1, 1]} : vector<9x256xf32> to vector<1x256xf32>
    %46 = vector.broadcast %45 : vector<1x256xf32> to vector<16x256xf32>
    %47 = arith.mulf %44, %46 : vector<16x256xf32>
    %48 = arith.truncf %47 : vector<16x256xf32> to vector<16x256xbf16>
    %49 = arith.truncf %27 : vector<16x256xf32> to vector<16x256xbf16>
    %c255_i32 = arith.constant 255 : i32
    %50 = tpu.dynamic_rotate %27 by %c255_i32 dim 1 : vector<16x256xf32>, i32 -> vector<16x256xf32>
    %51 = vector.extract_strided_slice %4 {offsets = [5, 0], sizes = [1, 256], strides = [1, 1]} : vector<9x256xf32> to vector<1x256xf32>
    %52 = vector.broadcast %51 : vector<1x256xf32> to vector<16x256xf32>
    %53 = arith.mulf %50, %52 : vector<16x256xf32>
    %54 = arith.truncf %53 : vector<16x256xf32> to vector<16x256xbf16>
    %c241_i32 = arith.constant 241 : i32
    %55 = tpu.dynamic_rotate %27 by %c241_i32 dim 1 : vector<16x256xf32>, i32 -> vector<16x256xf32>
    %56 = vector.extract_strided_slice %4 {offsets = [6, 0], sizes = [1, 256], strides = [1, 1]} : vector<9x256xf32> to vector<1x256xf32>
    %57 = vector.broadcast %56 : vector<1x256xf32> to vector<16x256xf32>
    %58 = arith.mulf %55, %57 : vector<16x256xf32>
    %59 = arith.truncf %58 : vector<16x256xf32> to vector<16x256xbf16>
    %c240_i32 = arith.constant 240 : i32
    %60 = tpu.dynamic_rotate %27 by %c240_i32 dim 1 : vector<16x256xf32>, i32 -> vector<16x256xf32>
    %61 = vector.extract_strided_slice %4 {offsets = [7, 0], sizes = [1, 256], strides = [1, 1]} : vector<9x256xf32> to vector<1x256xf32>
    %62 = vector.broadcast %61 : vector<1x256xf32> to vector<16x256xf32>
    %63 = arith.mulf %60, %62 : vector<16x256xf32>
    %64 = arith.truncf %63 : vector<16x256xf32> to vector<16x256xbf16>
    %c239_i32 = arith.constant 239 : i32
    %65 = tpu.dynamic_rotate %27 by %c239_i32 dim 1 : vector<16x256xf32>, i32 -> vector<16x256xf32>
    %66 = vector.extract_strided_slice %4 {offsets = [8, 0], sizes = [1, 256], strides = [1, 1]} : vector<9x256xf32> to vector<1x256xf32>
    %67 = vector.broadcast %66 : vector<1x256xf32> to vector<16x256xf32>
    %68 = arith.mulf %65, %67 : vector<16x256xf32>
    %69 = arith.truncf %68 : vector<16x256xf32> to vector<16x256xbf16>
    %70 = tpu.concatenate %33, %38, %43, %48, %49, %54, %59, %64, %69 in 0 : vector<16x256xbf16>, vector<16x256xbf16>, vector<16x256xbf16>, vector<16x256xbf16>, vector<16x256xbf16>, vector<16x256xbf16>, vector<16x256xbf16>, vector<16x256xbf16>, vector<16x256xbf16> -> vector<144x256xbf16>
    %c0_19 = arith.constant 0 : index
    %c0_20 = arith.constant 0 : index
    %71 = vector.load %arg6[%c0_19, %c0_20] : memref<32x144xbf16, #tpu.memory_space<vmem>>, vector<32x144xbf16>
    %cst_21 = arith.constant dense<0.000000e+00> : vector<32x256xf32>
    %72 = tpu.matmul %71, %70, %cst_21 {dimension_numbers = #tpu.dot_dimension_numbers<[1], [0], [0], [1], [0, 0, 1, 1], [], []>} : vector<32x144xbf16>, vector<144x256xbf16>, vector<32x256xf32> -> vector<32x256xf32>
    %73 = vector.broadcast %28 : vector<32x1xf32> to vector<32x256xf32>
    %74 = arith.addf %72, %73 : vector<32x256xf32>
    %75 = vector.extract_strided_slice %74 {offsets = [0, 0], sizes = [16, 256], strides = [1, 1]} : vector<32x256xf32> to vector<16x256xf32>
    %76 = vector.extract_strided_slice %74 {offsets = [16, 0], sizes = [16, 256], strides = [1, 1]} : vector<32x256xf32> to vector<16x256xf32>
    %cst_22 = arith.constant 1.000000e+00 : f32
    %77 = vector.broadcast %cst_22 : f32 to vector<16x256xf32>
    %78 = arith.addf %77, %75 : vector<16x256xf32>
    %79 = arith.mulf %20, %78 : vector<16x256xf32>
    %80 = arith.addf %79, %76 : vector<16x256xf32>
    %cst_23 = arith.constant 0.000000e+00 : f32
    %81 = vector.broadcast %cst_23 : f32 to vector<16x256xf32>
    %82 = arith.cmpf ogt, %80, %81 : vector<16x256xf32>
    %cst_24 = arith.constant 2.000000e-01 : f32
    %83 = vector.broadcast %cst_24 : f32 to vector<16x256xf32>
    %84 = arith.mulf %83, %80 : vector<16x256xf32>
    %85 = arith.select %82, %80, %84 : vector<16x256xi1>, vector<16x256xf32>
    %c0_25 = arith.constant 0 : index
    %c0_26 = arith.constant 0 : index
    %86 = vector.load %arg9[%c0_25, %c0_26] : memref<16x1xf32, #tpu.memory_space<vmem>>, vector<16x1xf32>
    %c17_i32_27 = arith.constant 17 : i32
    %87 = tpu.dynamic_rotate %85 by %c17_i32_27 dim 1 : vector<16x256xf32>, i32 -> vector<16x256xf32>
    %88 = vector.extract_strided_slice %4 {offsets = [0, 0], sizes = [1, 256], strides = [1, 1]} : vector<9x256xf32> to vector<1x256xf32>
    %89 = vector.broadcast %88 : vector<1x256xf32> to vector<16x256xf32>
    %90 = arith.mulf %87, %89 : vector<16x256xf32>
    %91 = arith.truncf %90 : vector<16x256xf32> to vector<16x256xbf16>
    %c16_i32_28 = arith.constant 16 : i32
    %92 = tpu.dynamic_rotate %85 by %c16_i32_28 dim 1 : vector<16x256xf32>, i32 -> vector<16x256xf32>
    %93 = vector.extract_strided_slice %4 {offsets = [1, 0], sizes = [1, 256], strides = [1, 1]} : vector<9x256xf32> to vector<1x256xf32>
    %94 = vector.broadcast %93 : vector<1x256xf32> to vector<16x256xf32>
    %95 = arith.mulf %92, %94 : vector<16x256xf32>
    %96 = arith.truncf %95 : vector<16x256xf32> to vector<16x256xbf16>
    %c15_i32_29 = arith.constant 15 : i32
    %97 = tpu.dynamic_rotate %85 by %c15_i32_29 dim 1 : vector<16x256xf32>, i32 -> vector<16x256xf32>
    %98 = vector.extract_strided_slice %4 {offsets = [2, 0], sizes = [1, 256], strides = [1, 1]} : vector<9x256xf32> to vector<1x256xf32>
    %99 = vector.broadcast %98 : vector<1x256xf32> to vector<16x256xf32>
    %100 = arith.mulf %97, %99 : vector<16x256xf32>
    %101 = arith.truncf %100 : vector<16x256xf32> to vector<16x256xbf16>
    %c1_i32_30 = arith.constant 1 : i32
    %102 = tpu.dynamic_rotate %85 by %c1_i32_30 dim 1 : vector<16x256xf32>, i32 -> vector<16x256xf32>
    %103 = vector.extract_strided_slice %4 {offsets = [3, 0], sizes = [1, 256], strides = [1, 1]} : vector<9x256xf32> to vector<1x256xf32>
    %104 = vector.broadcast %103 : vector<1x256xf32> to vector<16x256xf32>
    %105 = arith.mulf %102, %104 : vector<16x256xf32>
    %106 = arith.truncf %105 : vector<16x256xf32> to vector<16x256xbf16>
    %107 = arith.truncf %85 : vector<16x256xf32> to vector<16x256xbf16>
    %c255_i32_31 = arith.constant 255 : i32
    %108 = tpu.dynamic_rotate %85 by %c255_i32_31 dim 1 : vector<16x256xf32>, i32 -> vector<16x256xf32>
    %109 = vector.extract_strided_slice %4 {offsets = [5, 0], sizes = [1, 256], strides = [1, 1]} : vector<9x256xf32> to vector<1x256xf32>
    %110 = vector.broadcast %109 : vector<1x256xf32> to vector<16x256xf32>
    %111 = arith.mulf %108, %110 : vector<16x256xf32>
    %112 = arith.truncf %111 : vector<16x256xf32> to vector<16x256xbf16>
    %c241_i32_32 = arith.constant 241 : i32
    %113 = tpu.dynamic_rotate %85 by %c241_i32_32 dim 1 : vector<16x256xf32>, i32 -> vector<16x256xf32>
    %114 = vector.extract_strided_slice %4 {offsets = [6, 0], sizes = [1, 256], strides = [1, 1]} : vector<9x256xf32> to vector<1x256xf32>
    %115 = vector.broadcast %114 : vector<1x256xf32> to vector<16x256xf32>
    %116 = arith.mulf %113, %115 : vector<16x256xf32>
    %117 = arith.truncf %116 : vector<16x256xf32> to vector<16x256xbf16>
    %c240_i32_33 = arith.constant 240 : i32
    %118 = tpu.dynamic_rotate %85 by %c240_i32_33 dim 1 : vector<16x256xf32>, i32 -> vector<16x256xf32>
    %119 = vector.extract_strided_slice %4 {offsets = [7, 0], sizes = [1, 256], strides = [1, 1]} : vector<9x256xf32> to vector<1x256xf32>
    %120 = vector.broadcast %119 : vector<1x256xf32> to vector<16x256xf32>
    %121 = arith.mulf %118, %120 : vector<16x256xf32>
    %122 = arith.truncf %121 : vector<16x256xf32> to vector<16x256xbf16>
    %c239_i32_34 = arith.constant 239 : i32
    %123 = tpu.dynamic_rotate %85 by %c239_i32_34 dim 1 : vector<16x256xf32>, i32 -> vector<16x256xf32>
    %124 = vector.extract_strided_slice %4 {offsets = [8, 0], sizes = [1, 256], strides = [1, 1]} : vector<9x256xf32> to vector<1x256xf32>
    %125 = vector.broadcast %124 : vector<1x256xf32> to vector<16x256xf32>
    %126 = arith.mulf %123, %125 : vector<16x256xf32>
    %127 = arith.truncf %126 : vector<16x256xf32> to vector<16x256xbf16>
    %128 = tpu.concatenate %91, %96, %101, %106, %107, %112, %117, %122, %127 in 0 : vector<16x256xbf16>, vector<16x256xbf16>, vector<16x256xbf16>, vector<16x256xbf16>, vector<16x256xbf16>, vector<16x256xbf16>, vector<16x256xbf16>, vector<16x256xbf16>, vector<16x256xbf16> -> vector<144x256xbf16>
    %c0_35 = arith.constant 0 : index
    %c0_36 = arith.constant 0 : index
    %129 = vector.load %arg8[%c0_35, %c0_36] : memref<16x144xbf16, #tpu.memory_space<vmem>>, vector<16x144xbf16>
    %cst_37 = arith.constant dense<0.000000e+00> : vector<16x256xf32>
    %130 = tpu.matmul %129, %128, %cst_37 {dimension_numbers = #tpu.dot_dimension_numbers<[1], [0], [0], [1], [0, 0, 1, 1], [], []>} : vector<16x144xbf16>, vector<144x256xbf16>, vector<16x256xf32> -> vector<16x256xf32>
    %131 = vector.broadcast %86 : vector<16x1xf32> to vector<16x256xf32>
    %132 = arith.addf %130, %131 : vector<16x256xf32>
    %c0_38 = arith.constant 0 : index
    %c0_39 = arith.constant 0 : index
    %c0_40 = arith.constant 0 : index
    %133 = vector.load %arg15[%c0_38, %c0_39, %c0_40] : memref<1x16x256xf32, #tpu.memory_space<vmem>>, vector<1x16x256xf32>
    %134 = vector.shape_cast %133 : vector<1x16x256xf32> to vector<16x256xf32>
    %135 = vector.shape_cast %132 : vector<16x256xf32> to vector<1x16x256xf32>
    tpu.vector_store %arg15[%c0_38, %c0_39, %c0_40], %135 {strides = array<i32>} : memref<1x16x256xf32, #tpu.memory_space<vmem>>, vector<1x16x256xf32>,
    %c0_41 = arith.constant 0 : index
    %c0_42 = arith.constant 0 : index
    %136 = vector.load %arg10[%c0_41, %c0_42] : memref<16x144xbf16, #tpu.memory_space<vmem>>, vector<16x144xbf16>
    %cst_43 = arith.constant dense<0.000000e+00> : vector<16x256xf32>
    %137 = tpu.matmul %136, %3, %cst_43 {dimension_numbers = #tpu.dot_dimension_numbers<[1], [0], [0], [1], [0, 0, 1, 1], [], []>} : vector<16x144xbf16>, vector<144x256xbf16>, vector<16x256xf32> -> vector<16x256xf32>
    %c0_44 = arith.constant 0 : index
    %c0_45 = arith.constant 0 : index
    %138 = vector.load %arg11[%c0_44, %c0_45] : memref<16x1xf32, #tpu.memory_space<vmem>>, vector<16x1xf32>
    %139 = vector.broadcast %138 : vector<16x1xf32> to vector<16x256xf32>
    %140 = arith.addf %137, %139 : vector<16x256xf32>
    %cst_46 = arith.constant 0.000000e+00 : f32
    %141 = vector.broadcast %cst_46 : f32 to vector<16x256xf32>
    %142 = arith.maximumf %140, %141 : vector<16x256xf32>
    %c0_47 = arith.constant 0 : index
    %c0_48 = arith.constant 0 : index
    %143 = vector.load %arg13[%c0_47, %c0_48] : memref<32x1xf32, #tpu.memory_space<vmem>>, vector<32x1xf32>
    %c17_i32_49 = arith.constant 17 : i32
    %144 = tpu.dynamic_rotate %142 by %c17_i32_49 dim 1 : vector<16x256xf32>, i32 -> vector<16x256xf32>
    %145 = vector.extract_strided_slice %4 {offsets = [0, 0], sizes = [1, 256], strides = [1, 1]} : vector<9x256xf32> to vector<1x256xf32>
    %146 = vector.broadcast %145 : vector<1x256xf32> to vector<16x256xf32>
    %147 = arith.mulf %144, %146 : vector<16x256xf32>
    %148 = arith.truncf %147 : vector<16x256xf32> to vector<16x256xbf16>
    %c16_i32_50 = arith.constant 16 : i32
    %149 = tpu.dynamic_rotate %142 by %c16_i32_50 dim 1 : vector<16x256xf32>, i32 -> vector<16x256xf32>
    %150 = vector.extract_strided_slice %4 {offsets = [1, 0], sizes = [1, 256], strides = [1, 1]} : vector<9x256xf32> to vector<1x256xf32>
    %151 = vector.broadcast %150 : vector<1x256xf32> to vector<16x256xf32>
    %152 = arith.mulf %149, %151 : vector<16x256xf32>
    %153 = arith.truncf %152 : vector<16x256xf32> to vector<16x256xbf16>
    %c15_i32_51 = arith.constant 15 : i32
    %154 = tpu.dynamic_rotate %142 by %c15_i32_51 dim 1 : vector<16x256xf32>, i32 -> vector<16x256xf32>
    %155 = vector.extract_strided_slice %4 {offsets = [2, 0], sizes = [1, 256], strides = [1, 1]} : vector<9x256xf32> to vector<1x256xf32>
    %156 = vector.broadcast %155 : vector<1x256xf32> to vector<16x256xf32>
    %157 = arith.mulf %154, %156 : vector<16x256xf32>
    %158 = arith.truncf %157 : vector<16x256xf32> to vector<16x256xbf16>
    %c1_i32_52 = arith.constant 1 : i32
    %159 = tpu.dynamic_rotate %142 by %c1_i32_52 dim 1 : vector<16x256xf32>, i32 -> vector<16x256xf32>
    %160 = vector.extract_strided_slice %4 {offsets = [3, 0], sizes = [1, 256], strides = [1, 1]} : vector<9x256xf32> to vector<1x256xf32>
    %161 = vector.broadcast %160 : vector<1x256xf32> to vector<16x256xf32>
    %162 = arith.mulf %159, %161 : vector<16x256xf32>
    %163 = arith.truncf %162 : vector<16x256xf32> to vector<16x256xbf16>
    %164 = arith.truncf %142 : vector<16x256xf32> to vector<16x256xbf16>
    %c255_i32_53 = arith.constant 255 : i32
    %165 = tpu.dynamic_rotate %142 by %c255_i32_53 dim 1 : vector<16x256xf32>, i32 -> vector<16x256xf32>
    %166 = vector.extract_strided_slice %4 {offsets = [5, 0], sizes = [1, 256], strides = [1, 1]} : vector<9x256xf32> to vector<1x256xf32>
    %167 = vector.broadcast %166 : vector<1x256xf32> to vector<16x256xf32>
    %168 = arith.mulf %165, %167 : vector<16x256xf32>
    %169 = arith.truncf %168 : vector<16x256xf32> to vector<16x256xbf16>
    %c241_i32_54 = arith.constant 241 : i32
    %170 = tpu.dynamic_rotate %142 by %c241_i32_54 dim 1 : vector<16x256xf32>, i32 -> vector<16x256xf32>
    %171 = vector.extract_strided_slice %4 {offsets = [6, 0], sizes = [1, 256], strides = [1, 1]} : vector<9x256xf32> to vector<1x256xf32>
    %172 = vector.broadcast %171 : vector<1x256xf32> to vector<16x256xf32>
    %173 = arith.mulf %170, %172 : vector<16x256xf32>
    %174 = arith.truncf %173 : vector<16x256xf32> to vector<16x256xbf16>
    %c240_i32_55 = arith.constant 240 : i32
    %175 = tpu.dynamic_rotate %142 by %c240_i32_55 dim 1 : vector<16x256xf32>, i32 -> vector<16x256xf32>
    %176 = vector.extract_strided_slice %4 {offsets = [7, 0], sizes = [1, 256], strides = [1, 1]} : vector<9x256xf32> to vector<1x256xf32>
    %177 = vector.broadcast %176 : vector<1x256xf32> to vector<16x256xf32>
    %178 = arith.mulf %175, %177 : vector<16x256xf32>
    %179 = arith.truncf %178 : vector<16x256xf32> to vector<16x256xbf16>
    %c239_i32_56 = arith.constant 239 : i32
    %180 = tpu.dynamic_rotate %142 by %c239_i32_56 dim 1 : vector<16x256xf32>, i32 -> vector<16x256xf32>
    %181 = vector.extract_strided_slice %4 {offsets = [8, 0], sizes = [1, 256], strides = [1, 1]} : vector<9x256xf32> to vector<1x256xf32>
    %182 = vector.broadcast %181 : vector<1x256xf32> to vector<16x256xf32>
    %183 = arith.mulf %180, %182 : vector<16x256xf32>
    %184 = arith.truncf %183 : vector<16x256xf32> to vector<16x256xbf16>
    %185 = tpu.concatenate %148, %153, %158, %163, %164, %169, %174, %179, %184 in 0 : vector<16x256xbf16>, vector<16x256xbf16>, vector<16x256xbf16>, vector<16x256xbf16>, vector<16x256xbf16>, vector<16x256xbf16>, vector<16x256xbf16>, vector<16x256xbf16>, vector<16x256xbf16> -> vector<144x256xbf16>
    %c0_57 = arith.constant 0 : index
    %c0_58 = arith.constant 0 : index
    %186 = vector.load %arg12[%c0_57, %c0_58] : memref<32x144xbf16, #tpu.memory_space<vmem>>, vector<32x144xbf16>
    %cst_59 = arith.constant dense<0.000000e+00> : vector<32x256xf32>
    %187 = tpu.matmul %186, %185, %cst_59 {dimension_numbers = #tpu.dot_dimension_numbers<[1], [0], [0], [1], [0, 0, 1, 1], [], []>} : vector<32x144xbf16>, vector<144x256xbf16>, vector<32x256xf32> -> vector<32x256xf32>
    %188 = vector.broadcast %143 : vector<32x1xf32> to vector<32x256xf32>
    %189 = arith.addf %187, %188 : vector<32x256xf32>
    %190 = vector.extract_strided_slice %189 {offsets = [0, 0], sizes = [16, 256], strides = [1, 1]} : vector<32x256xf32> to vector<16x256xf32>
    %191 = vector.extract_strided_slice %189 {offsets = [16, 0], sizes = [16, 256], strides = [1, 1]} : vector<32x256xf32> to vector<16x256xf32>
    %cst_60 = arith.constant 1.000000e+00 : f32
    %192 = vector.broadcast %cst_60 : f32 to vector<16x256xf32>
    %193 = arith.addf %192, %190 : vector<16x256xf32>
    %194 = arith.mulf %20, %193 : vector<16x256xf32>
    %195 = arith.addf %194, %191 : vector<16x256xf32>
    %c0_61 = arith.constant 0 : index
    %c0_62 = arith.constant 0 : index
    %196 = vector.load %arg14[%c0_61, %c0_62] : memref<16x16xbf16, #tpu.memory_space<vmem>>, vector<16x16xbf16>
    %197 = arith.truncf %195 : vector<16x256xf32> to vector<16x256xbf16>
    %cst_63 = arith.constant dense<0.000000e+00> : vector<16x256xf32>
    %198 = tpu.matmul %196, %197, %cst_63 {dimension_numbers = #tpu.dot_dimension_numbers<[1], [0], [0], [1], [0, 0, 1, 1], [], []>} : vector<16x16xbf16>, vector<16x256xbf16>, vector<16x256xf32> -> vector<16x256xf32>
    %c0_64 = arith.constant 0 : index
    %c0_65 = arith.constant 0 : index
    %c0_66 = arith.constant 0 : index
    %199 = vector.load %arg16[%c0_64, %c0_65, %c0_66] : memref<1x16x256xf32, #tpu.memory_space<vmem>>, vector<1x16x256xf32>
    %200 = vector.shape_cast %199 : vector<1x16x256xf32> to vector<16x256xf32>
    %201 = vector.shape_cast %198 : vector<16x256xf32> to vector<1x16x256xf32>
    tpu.vector_store %arg16[%c0_64, %c0_65, %c0_66], %201 {strides = array<i32>} : memref<1x16x256xf32, #tpu.memory_space<vmem>>, vector<1x16x256xf32>,
    return
  }
  func.func @transform_0(%arg0: i32) -> (i32, i32, i32) {
    %c0_i32 = arith.constant 0 : i32
    %c0_i32_0 = arith.constant 0 : i32
    %c0_i32_1 = arith.constant 0 : i32
    return %arg0, %c0_i32, %c0_i32_0 : i32, i32, i32
  }
  func.func @transform_1(%arg0: i32) -> (i32, i32, i32) {
    %c0_i32 = arith.constant 0 : i32
    %c0_i32_0 = arith.constant 0 : i32
    %c0_i32_1 = arith.constant 0 : i32
    return %arg0, %c0_i32, %c0_i32_0 : i32, i32, i32
  }
  func.func @transform_2(%arg0: i32) -> (i32, i32) {
    %c0_i32 = arith.constant 0 : i32
    %c0_i32_0 = arith.constant 0 : i32
    %c0_i32_1 = arith.constant 0 : i32
    return %c0_i32, %c0_i32_0 : i32, i32
  }
  func.func @transform_3(%arg0: i32) -> (i32, i32) {
    %c0_i32 = arith.constant 0 : i32
    %c0_i32_0 = arith.constant 0 : i32
    %c0_i32_1 = arith.constant 0 : i32
    return %c0_i32, %c0_i32_0 : i32, i32
  }
  func.func @transform_4(%arg0: i32) -> (i32, i32) {
    %c0_i32 = arith.constant 0 : i32
    %c0_i32_0 = arith.constant 0 : i32
    %c0_i32_1 = arith.constant 0 : i32
    return %c0_i32, %c0_i32_0 : i32, i32
  }
  func.func @transform_5(%arg0: i32) -> (i32, i32) {
    %c0_i32 = arith.constant 0 : i32
    %c0_i32_0 = arith.constant 0 : i32
    %c0_i32_1 = arith.constant 0 : i32
    return %c0_i32, %c0_i32_0 : i32, i32
  }
  func.func @transform_6(%arg0: i32) -> (i32, i32) {
    %c0_i32 = arith.constant 0 : i32
    %c0_i32_0 = arith.constant 0 : i32
    %c0_i32_1 = arith.constant 0 : i32
    return %c0_i32, %c0_i32_0 : i32, i32
  }
  func.func @transform_7(%arg0: i32) -> (i32, i32) {
    %c0_i32 = arith.constant 0 : i32
    %c0_i32_0 = arith.constant 0 : i32
    %c0_i32_1 = arith.constant 0 : i32
    return %c0_i32, %c0_i32_0 : i32, i32
  }
  func.func @transform_8(%arg0: i32) -> (i32, i32) {
    %c0_i32 = arith.constant 0 : i32
    %c0_i32_0 = arith.constant 0 : i32
    %c0_i32_1 = arith.constant 0 : i32
    return %c0_i32, %c0_i32_0 : i32, i32
  }
  func.func @transform_9(%arg0: i32) -> (i32, i32) {
    %c0_i32 = arith.constant 0 : i32
    %c0_i32_0 = arith.constant 0 : i32
    %c0_i32_1 = arith.constant 0 : i32
    return %c0_i32, %c0_i32_0 : i32, i32
  }
  func.func @transform_10(%arg0: i32) -> (i32, i32) {
    %c0_i32 = arith.constant 0 : i32
    %c0_i32_0 = arith.constant 0 : i32
    %c0_i32_1 = arith.constant 0 : i32
    return %c0_i32, %c0_i32_0 : i32, i32
  }
  func.func @transform_11(%arg0: i32) -> (i32, i32) {
    %c0_i32 = arith.constant 0 : i32
    %c0_i32_0 = arith.constant 0 : i32
    %c0_i32_1 = arith.constant 0 : i32
    return %c0_i32, %c0_i32_0 : i32, i32
  }
  func.func @transform_12(%arg0: i32) -> (i32, i32) {
    %c0_i32 = arith.constant 0 : i32
    %c0_i32_0 = arith.constant 0 : i32
    %c0_i32_1 = arith.constant 0 : i32
    return %c0_i32, %c0_i32_0 : i32, i32
  }
  func.func @transform_13(%arg0: i32) -> (i32, i32) {
    %c0_i32 = arith.constant 0 : i32
    %c0_i32_0 = arith.constant 0 : i32
    %c0_i32_1 = arith.constant 0 : i32
    return %c0_i32, %c0_i32_0 : i32, i32
  }
  func.func @transform_14(%arg0: i32) -> (i32, i32, i32) {
    %c0_i32 = arith.constant 0 : i32
    %c0_i32_0 = arith.constant 0 : i32
    %c0_i32_1 = arith.constant 0 : i32
    return %arg0, %c0_i32, %c0_i32_0 : i32, i32, i32
  }
  func.func @transform_15(%arg0: i32) -> (i32, i32, i32) {
    %c0_i32 = arith.constant 0 : i32
    %c0_i32_0 = arith.constant 0 : i32
    %c0_i32_1 = arith.constant 0 : i32
    return %arg0, %c0_i32, %c0_i32_0 : i32, i32, i32
  }
}

module attributes {stable_mosaic.version = 11 : i64} {
  func.func @_fused_stage_kernel(%arg0: i32, %arg1: memref<1x16x256xf32, #tpu.memory_space<vmem>>, %arg2: memref<1x144x256xbf16, #tpu.memory_space<vmem>>, %arg3: memref<9x256xf32, #tpu.memory_space<vmem>>, %arg4: memref<16x144xbf16, #tpu.memory_space<vmem>>, %arg5: memref<16x1xf32, #tpu.memory_space<vmem>>, %arg6: memref<32x144xbf16, #tpu.memory_space<vmem>>, %arg7: memref<32x1xf32, #tpu.memory_space<vmem>>, %arg8: memref<16x144xbf16, #tpu.memory_space<vmem>>, %arg9: memref<16x1xf32, #tpu.memory_space<vmem>>, %arg10: memref<16x144xbf16, #tpu.memory_space<vmem>>, %arg11: memref<16x1xf32, #tpu.memory_space<vmem>>, %arg12: memref<32x144xbf16, #tpu.memory_space<vmem>>, %arg13: memref<32x1xf32, #tpu.memory_space<vmem>>, %arg14: memref<16x16xbf16, #tpu.memory_space<vmem>>, %arg15: memref<1x16x256xf32, #tpu.memory_space<vmem>>, %arg16: memref<1x16x256xf32, #tpu.memory_space<vmem>>) attributes {dimension_semantics = [#tpu.dimension_semantics<parallel>], iteration_bounds = array<i64: 2>, scalar_prefetch = 0 : i64, scratch_operands = 0 : i64, tpu.core_type = #tpu.core_type<tc>, window_params = [{transform_indices = @transform_0, window_bounds = array<i64: 1, 16, 256>}, {transform_indices = @transform_1, window_bounds = array<i64: 1, 144, 256>}, {pipeline_mode = #tpu.pipeline_mode<synchronous>, transform_indices = @transform_2, window_bounds = array<i64: 9, 256>}, {pipeline_mode = #tpu.pipeline_mode<synchronous>, transform_indices = @transform_3, window_bounds = array<i64: 16, 144>}, {pipeline_mode = #tpu.pipeline_mode<synchronous>, transform_indices = @transform_4, window_bounds = array<i64: 16, 1>}, {pipeline_mode = #tpu.pipeline_mode<synchronous>, transform_indices = @transform_5, window_bounds = array<i64: 32, 144>}, {pipeline_mode = #tpu.pipeline_mode<synchronous>, transform_indices = @transform_6, window_bounds = array<i64: 32, 1>}, {pipeline_mode = #tpu.pipeline_mode<synchronous>, transform_indices = @transform_7, window_bounds = array<i64: 16, 144>}, {pipeline_mode = #tpu.pipeline_mode<synchronous>, transform_indices = @transform_8, window_bounds = array<i64: 16, 1>}, {pipeline_mode = #tpu.pipeline_mode<synchronous>, transform_indices = @transform_9, window_bounds = array<i64: 16, 144>}, {pipeline_mode = #tpu.pipeline_mode<synchronous>, transform_indices = @transform_10, window_bounds = array<i64: 16, 1>}, {pipeline_mode = #tpu.pipeline_mode<synchronous>, transform_indices = @transform_11, window_bounds = array<i64: 32, 144>}, {pipeline_mode = #tpu.pipeline_mode<synchronous>, transform_indices = @transform_12, window_bounds = array<i64: 32, 1>}, {pipeline_mode = #tpu.pipeline_mode<synchronous>, transform_indices = @transform_13, window_bounds = array<i64: 16, 16>}, {transform_indices = @transform_14, window_bounds = array<i64: 1, 16, 256>}, {transform_indices = @transform_15, window_bounds = array<i64: 1, 16, 256>}]} {
    %c0 = arith.constant 0 : index
    %c0_0 = arith.constant 0 : index
    %c0_1 = arith.constant 0 : index
    %0 = vector.load %arg1[%c0, %c0_0, %c0_1] : memref<1x16x256xf32, #tpu.memory_space<vmem>>, vector<1x16x256xf32>
    %1 = vector.shape_cast %0 : vector<1x16x256xf32> to vector<16x256xf32>
    %c0_2 = arith.constant 0 : index
    %c0_3 = arith.constant 0 : index
    %c0_4 = arith.constant 0 : index
    %2 = vector.load %arg2[%c0_2, %c0_3, %c0_4] : memref<1x144x256xbf16, #tpu.memory_space<vmem>>, vector<1x144x256xbf16>
    %3 = vector.shape_cast %2 : vector<1x144x256xbf16> to vector<144x256xbf16>
    %c0_5 = arith.constant 0 : index
    %c0_6 = arith.constant 0 : index
    %4 = vector.load %arg3[%c0_5, %c0_6] : memref<9x256xf32, #tpu.memory_space<vmem>>, vector<9x256xf32>
    %cst = arith.constant dense<0.000000e+00> : vector<16xf32>
    %5 = vector.multi_reduction <add>, %1, %cst [1] : vector<16x256xf32> to vector<16xf32>
    %6 = vector.shape_cast %5 : vector<16xf32> to vector<16x1xf32>
    %cst_7 = arith.constant 2.560000e+02 : f32
    %7 = vector.broadcast %cst_7 : f32 to vector<16x1xf32>
    %8 = arith.divf %6, %7 : vector<16x1xf32>
    %9 = vector.broadcast %8 : vector<16x1xf32> to vector<16x256xf32>
    %10 = arith.subf %1, %9 : vector<16x256xf32>
    %11 = arith.mulf %10, %10 : vector<16x256xf32>
    %cst_8 = arith.constant dense<0.000000e+00> : vector<16xf32>
    %12 = vector.multi_reduction <add>, %11, %cst_8 [1] : vector<16x256xf32> to vector<16xf32>
    %13 = vector.shape_cast %12 : vector<16xf32> to vector<16x1xf32>
    %cst_9 = arith.constant 2.560000e+02 : f32
    %14 = vector.broadcast %cst_9 : f32 to vector<16x1xf32>
    %15 = arith.divf %13, %14 : vector<16x1xf32>
    %cst_10 = arith.constant 9.99999974E-6 : f32
    %16 = vector.broadcast %cst_10 : f32 to vector<16x1xf32>
    %17 = arith.addf %15, %16 : vector<16x1xf32>
    %18 = math.rsqrt %17 : vector<16x1xf32>
    %19 = vector.broadcast %18 : vector<16x1xf32> to vector<16x256xf32>
    %20 = arith.mulf %10, %19 : vector<16x256xf32>
    %c0_11 = arith.constant 0 : index
    %c0_12 = arith.constant 0 : index
    %21 = vector.load %arg4[%c0_11, %c0_12] : memref<16x144xbf16, #tpu.memory_space<vmem>>, vector<16x144xbf16>
    %cst_13 = arith.constant dense<0.000000e+00> : vector<16x256xf32>
    %22 = tpu.matmul %21, %3, %cst_13 {dimension_numbers = #tpu.dot_dimension_numbers<[1], [0], [0], [1], [0, 0, 1, 1], [], []>} : vector<16x144xbf16>, vector<144x256xbf16>, vector<16x256xf32> -> vector<16x256xf32>
    %c0_14 = arith.constant 0 : index
    %c0_15 = arith.constant 0 : index
    %23 = vector.load %arg5[%c0_14, %c0_15] : memref<16x1xf32, #tpu.memory_space<vmem>>, vector<16x1xf32>
    %24 = vector.broadcast %23 : vector<16x1xf32> to vector<16x256xf32>
    %25 = arith.addf %22, %24 : vector<16x256xf32>
    %cst_16 = arith.constant 0.000000e+00 : f32
    %26 = vector.broadcast %cst_16 : f32 to vector<16x256xf32>
    %27 = arith.maximumf %25, %26 : vector<16x256xf32>
    %c0_17 = arith.constant 0 : index
    %c0_18 = arith.constant 0 : index
    %28 = vector.load %arg7[%c0_17, %c0_18] : memref<32x1xf32, #tpu.memory_space<vmem>>, vector<32x1xf32>
    %c17_i32 = arith.constant 17 : i32
    %29 = tpu.dynamic_rotate %27 by %c17_i32 dim 1 : vector<16x256xf32>, i32 -> vector<16x256xf32>
    %30 = vector.extract_strided_slice %4 {offsets = [0, 0], sizes = [1, 256], strides = [1, 1]} : vector<9x256xf32> to vector<1x256xf32>
    %31 = vector.broadcast %30 : vector<1x256xf32> to vector<16x256xf32>
    %32 = arith.mulf %29, %31 : vector<16x256xf32>
    %33 = arith.truncf %32 : vector<16x256xf32> to vector<16x256xbf16>
    %c16_i32 = arith.constant 16 : i32
    %34 = tpu.dynamic_rotate %27 by %c16_i32 dim 1 : vector<16x256xf32>, i32 -> vector<16x256xf32>
    %35 = vector.extract_strided_slice %4 {offsets = [1, 0], sizes = [1, 256], strides = [1, 1]} : vector<9x256xf32> to vector<1x256xf32>
    %36 = vector.broadcast %35 : vector<1x256xf32> to vector<16x256xf32>
    %37 = arith.mulf %34, %36 : vector<16x256xf32>
    %38 = arith.truncf %37 : vector<16x256xf32> to vector<16x256xbf16>
    %c15_i32 = arith.constant 15 : i32
    %39 = tpu.dynamic_rotate %27 by %c15_i32 dim 1 : vector<16x256xf32>, i32 -> vector<16x256xf32>
    %40 = vector.extract_strided_slice %4 {offsets = [2, 0], sizes = [1, 256], strides = [1, 1]} : vector<9x256xf32> to vector<1x256xf32>
    %41 = vector.broadcast %40 : vector<1x256xf32> to vector<16x256xf32>
    %42 = arith.mulf %39, %41 : vector<16x256xf32>
    %43 = arith.truncf %42 : vector<16x256xf32> to vector<16x256xbf16>
    %c1_i32 = arith.constant 1 : i32
    %44 = tpu.dynamic_rotate %27 by %c1_i32 dim 1 : vector<16x256xf32>, i32 -> vector<16x256xf32>
    %45 = vector.extract_strided_slice %4 {offsets = [3, 0], sizes = [1, 256], strides = [1, 1]} : vector<9x256xf32> to vector<1x256xf32>
    %46 = vector.broadcast %45 : vector<1x256xf32> to vector<16x256xf32>
    %47 = arith.mulf %44, %46 : vector<16x256xf32>
    %48 = arith.truncf %47 : vector<16x256xf32> to vector<16x256xbf16>
    %49 = arith.truncf %27 : vector<16x256xf32> to vector<16x256xbf16>
    %c255_i32 = arith.constant 255 : i32
    %50 = tpu.dynamic_rotate %27 by %c255_i32 dim 1 : vector<16x256xf32>, i32 -> vector<16x256xf32>
    %51 = vector.extract_strided_slice %4 {offsets = [5, 0], sizes = [1, 256], strides = [1, 1]} : vector<9x256xf32> to vector<1x256xf32>
    %52 = vector.broadcast %51 : vector<1x256xf32> to vector<16x256xf32>
    %53 = arith.mulf %50, %52 : vector<16x256xf32>
    %54 = arith.truncf %53 : vector<16x256xf32> to vector<16x256xbf16>
    %c241_i32 = arith.constant 241 : i32
    %55 = tpu.dynamic_rotate %27 by %c241_i32 dim 1 : vector<16x256xf32>, i32 -> vector<16x256xf32>
    %56 = vector.extract_strided_slice %4 {offsets = [6, 0], sizes = [1, 256], strides = [1, 1]} : vector<9x256xf32> to vector<1x256xf32>
    %57 = vector.broadcast %56 : vector<1x256xf32> to vector<16x256xf32>
    %58 = arith.mulf %55, %57 : vector<16x256xf32>
    %59 = arith.truncf %58 : vector<16x256xf32> to vector<16x256xbf16>
    %c240_i32 = arith.constant 240 : i32
    %60 = tpu.dynamic_rotate %27 by %c240_i32 dim 1 : vector<16x256xf32>, i32 -> vector<16x256xf32>
    %61 = vector.extract_strided_slice %4 {offsets = [7, 0], sizes = [1, 256], strides = [1, 1]} : vector<9x256xf32> to vector<1x256xf32>
    %62 = vector.broadcast %61 : vector<1x256xf32> to vector<16x256xf32>
    %63 = arith.mulf %60, %62 : vector<16x256xf32>
    %64 = arith.truncf %63 : vector<16x256xf32> to vector<16x256xbf16>
    %c239_i32 = arith.constant 239 : i32
    %65 = tpu.dynamic_rotate %27 by %c239_i32 dim 1 : vector<16x256xf32>, i32 -> vector<16x256xf32>
    %66 = vector.extract_strided_slice %4 {offsets = [8, 0], sizes = [1, 256], strides = [1, 1]} : vector<9x256xf32> to vector<1x256xf32>
    %67 = vector.broadcast %66 : vector<1x256xf32> to vector<16x256xf32>
    %68 = arith.mulf %65, %67 : vector<16x256xf32>
    %69 = arith.truncf %68 : vector<16x256xf32> to vector<16x256xbf16>
    %70 = tpu.concatenate %33, %38, %43, %48, %49, %54, %59, %64, %69 in 0 : vector<16x256xbf16>, vector<16x256xbf16>, vector<16x256xbf16>, vector<16x256xbf16>, vector<16x256xbf16>, vector<16x256xbf16>, vector<16x256xbf16>, vector<16x256xbf16>, vector<16x256xbf16> -> vector<144x256xbf16>
    %c0_19 = arith.constant 0 : index
    %c0_20 = arith.constant 0 : index
    %71 = vector.load %arg6[%c0_19, %c0_20] : memref<32x144xbf16, #tpu.memory_space<vmem>>, vector<32x144xbf16>
    %cst_21 = arith.constant dense<0.000000e+00> : vector<32x256xf32>
    %72 = tpu.matmul %71, %70, %cst_21 {dimension_numbers = #tpu.dot_dimension_numbers<[1], [0], [0], [1], [0, 0, 1, 1], [], []>} : vector<32x144xbf16>, vector<144x256xbf16>, vector<32x256xf32> -> vector<32x256xf32>
    %73 = vector.broadcast %28 : vector<32x1xf32> to vector<32x256xf32>
    %74 = arith.addf %72, %73 : vector<32x256xf32>
    %75 = vector.extract_strided_slice %74 {offsets = [0, 0], sizes = [16, 256], strides = [1, 1]} : vector<32x256xf32> to vector<16x256xf32>
    %76 = vector.extract_strided_slice %74 {offsets = [16, 0], sizes = [16, 256], strides = [1, 1]} : vector<32x256xf32> to vector<16x256xf32>
    %cst_22 = arith.constant 1.000000e+00 : f32
    %77 = vector.broadcast %cst_22 : f32 to vector<16x256xf32>
    %78 = arith.addf %77, %75 : vector<16x256xf32>
    %79 = arith.mulf %20, %78 : vector<16x256xf32>
    %80 = arith.addf %79, %76 : vector<16x256xf32>
    %cst_23 = arith.constant 0.000000e+00 : f32
    %81 = vector.broadcast %cst_23 : f32 to vector<16x256xf32>
    %82 = arith.cmpf ogt, %80, %81 : vector<16x256xf32>
    %cst_24 = arith.constant 2.000000e-01 : f32
    %83 = vector.broadcast %cst_24 : f32 to vector<16x256xf32>
    %84 = arith.mulf %83, %80 : vector<16x256xf32>
    %85 = arith.select %82, %80, %84 : vector<16x256xi1>, vector<16x256xf32>
    %c0_25 = arith.constant 0 : index
    %c0_26 = arith.constant 0 : index
    %86 = vector.load %arg9[%c0_25, %c0_26] : memref<16x1xf32, #tpu.memory_space<vmem>>, vector<16x1xf32>
    %c17_i32_27 = arith.constant 17 : i32
    %87 = tpu.dynamic_rotate %85 by %c17_i32_27 dim 1 : vector<16x256xf32>, i32 -> vector<16x256xf32>
    %88 = vector.extract_strided_slice %4 {offsets = [0, 0], sizes = [1, 256], strides = [1, 1]} : vector<9x256xf32> to vector<1x256xf32>
    %89 = vector.broadcast %88 : vector<1x256xf32> to vector<16x256xf32>
    %90 = arith.mulf %87, %89 : vector<16x256xf32>
    %91 = arith.truncf %90 : vector<16x256xf32> to vector<16x256xbf16>
    %c16_i32_28 = arith.constant 16 : i32
    %92 = tpu.dynamic_rotate %85 by %c16_i32_28 dim 1 : vector<16x256xf32>, i32 -> vector<16x256xf32>
    %93 = vector.extract_strided_slice %4 {offsets = [1, 0], sizes = [1, 256], strides = [1, 1]} : vector<9x256xf32> to vector<1x256xf32>
    %94 = vector.broadcast %93 : vector<1x256xf32> to vector<16x256xf32>
    %95 = arith.mulf %92, %94 : vector<16x256xf32>
    %96 = arith.truncf %95 : vector<16x256xf32> to vector<16x256xbf16>
    %c15_i32_29 = arith.constant 15 : i32
    %97 = tpu.dynamic_rotate %85 by %c15_i32_29 dim 1 : vector<16x256xf32>, i32 -> vector<16x256xf32>
    %98 = vector.extract_strided_slice %4 {offsets = [2, 0], sizes = [1, 256], strides = [1, 1]} : vector<9x256xf32> to vector<1x256xf32>
    %99 = vector.broadcast %98 : vector<1x256xf32> to vector<16x256xf32>
    %100 = arith.mulf %97, %99 : vector<16x256xf32>
    %101 = arith.truncf %100 : vector<16x256xf32> to vector<16x256xbf16>
    %c1_i32_30 = arith.constant 1 : i32
    %102 = tpu.dynamic_rotate %85 by %c1_i32_30 dim 1 : vector<16x256xf32>, i32 -> vector<16x256xf32>
    %103 = vector.extract_strided_slice %4 {offsets = [3, 0], sizes = [1, 256], strides = [1, 1]} : vector<9x256xf32> to vector<1x256xf32>
    %104 = vector.broadcast %103 : vector<1x256xf32> to vector<16x256xf32>
    %105 = arith.mulf %102, %104 : vector<16x256xf32>
    %106 = arith.truncf %105 : vector<16x256xf32> to vector<16x256xbf16>
    %107 = arith.truncf %85 : vector<16x256xf32> to vector<16x256xbf16>
    %c255_i32_31 = arith.constant 255 : i32
    %108 = tpu.dynamic_rotate %85 by %c255_i32_31 dim 1 : vector<16x256xf32>, i32 -> vector<16x256xf32>
    %109 = vector.extract_strided_slice %4 {offsets = [5, 0], sizes = [1, 256], strides = [1, 1]} : vector<9x256xf32> to vector<1x256xf32>
    %110 = vector.broadcast %109 : vector<1x256xf32> to vector<16x256xf32>
    %111 = arith.mulf %108, %110 : vector<16x256xf32>
    %112 = arith.truncf %111 : vector<16x256xf32> to vector<16x256xbf16>
    %c241_i32_32 = arith.constant 241 : i32
    %113 = tpu.dynamic_rotate %85 by %c241_i32_32 dim 1 : vector<16x256xf32>, i32 -> vector<16x256xf32>
    %114 = vector.extract_strided_slice %4 {offsets = [6, 0], sizes = [1, 256], strides = [1, 1]} : vector<9x256xf32> to vector<1x256xf32>
    %115 = vector.broadcast %114 : vector<1x256xf32> to vector<16x256xf32>
    %116 = arith.mulf %113, %115 : vector<16x256xf32>
    %117 = arith.truncf %116 : vector<16x256xf32> to vector<16x256xbf16>
    %c240_i32_33 = arith.constant 240 : i32
    %118 = tpu.dynamic_rotate %85 by %c240_i32_33 dim 1 : vector<16x256xf32>, i32 -> vector<16x256xf32>
    %119 = vector.extract_strided_slice %4 {offsets = [7, 0], sizes = [1, 256], strides = [1, 1]} : vector<9x256xf32> to vector<1x256xf32>
    %120 = vector.broadcast %119 : vector<1x256xf32> to vector<16x256xf32>
    %121 = arith.mulf %118, %120 : vector<16x256xf32>
    %122 = arith.truncf %121 : vector<16x256xf32> to vector<16x256xbf16>
    %c239_i32_34 = arith.constant 239 : i32
    %123 = tpu.dynamic_rotate %85 by %c239_i32_34 dim 1 : vector<16x256xf32>, i32 -> vector<16x256xf32>
    %124 = vector.extract_strided_slice %4 {offsets = [8, 0], sizes = [1, 256], strides = [1, 1]} : vector<9x256xf32> to vector<1x256xf32>
    %125 = vector.broadcast %124 : vector<1x256xf32> to vector<16x256xf32>
    %126 = arith.mulf %123, %125 : vector<16x256xf32>
    %127 = arith.truncf %126 : vector<16x256xf32> to vector<16x256xbf16>
    %128 = tpu.concatenate %91, %96, %101, %106, %107, %112, %117, %122, %127 in 0 : vector<16x256xbf16>, vector<16x256xbf16>, vector<16x256xbf16>, vector<16x256xbf16>, vector<16x256xbf16>, vector<16x256xbf16>, vector<16x256xbf16>, vector<16x256xbf16>, vector<16x256xbf16> -> vector<144x256xbf16>
    %c0_35 = arith.constant 0 : index
    %c0_36 = arith.constant 0 : index
    %129 = vector.load %arg8[%c0_35, %c0_36] : memref<16x144xbf16, #tpu.memory_space<vmem>>, vector<16x144xbf16>
    %cst_37 = arith.constant dense<0.000000e+00> : vector<16x256xf32>
    %130 = tpu.matmul %129, %128, %cst_37 {dimension_numbers = #tpu.dot_dimension_numbers<[1], [0], [0], [1], [0, 0, 1, 1], [], []>} : vector<16x144xbf16>, vector<144x256xbf16>, vector<16x256xf32> -> vector<16x256xf32>
    %131 = vector.broadcast %86 : vector<16x1xf32> to vector<16x256xf32>
    %132 = arith.addf %130, %131 : vector<16x256xf32>
    %c0_38 = arith.constant 0 : index
    %c0_39 = arith.constant 0 : index
    %c0_40 = arith.constant 0 : index
    %133 = vector.load %arg15[%c0_38, %c0_39, %c0_40] : memref<1x16x256xf32, #tpu.memory_space<vmem>>, vector<1x16x256xf32>
    %134 = vector.shape_cast %133 : vector<1x16x256xf32> to vector<16x256xf32>
    %135 = vector.shape_cast %132 : vector<16x256xf32> to vector<1x16x256xf32>
    tpu.vector_store %arg15[%c0_38, %c0_39, %c0_40], %135 {strides = array<i32>} : memref<1x16x256xf32, #tpu.memory_space<vmem>>, vector<1x16x256xf32>,
    %c0_41 = arith.constant 0 : index
    %c0_42 = arith.constant 0 : index
    %136 = vector.load %arg10[%c0_41, %c0_42] : memref<16x144xbf16, #tpu.memory_space<vmem>>, vector<16x144xbf16>
    %cst_43 = arith.constant dense<0.000000e+00> : vector<16x256xf32>
    %137 = tpu.matmul %136, %3, %cst_43 {dimension_numbers = #tpu.dot_dimension_numbers<[1], [0], [0], [1], [0, 0, 1, 1], [], []>} : vector<16x144xbf16>, vector<144x256xbf16>, vector<16x256xf32> -> vector<16x256xf32>
    %c0_44 = arith.constant 0 : index
    %c0_45 = arith.constant 0 : index
    %138 = vector.load %arg11[%c0_44, %c0_45] : memref<16x1xf32, #tpu.memory_space<vmem>>, vector<16x1xf32>
    %139 = vector.broadcast %138 : vector<16x1xf32> to vector<16x256xf32>
    %140 = arith.addf %137, %139 : vector<16x256xf32>
    %cst_46 = arith.constant 0.000000e+00 : f32
    %141 = vector.broadcast %cst_46 : f32 to vector<16x256xf32>
    %142 = arith.maximumf %140, %141 : vector<16x256xf32>
    %c0_47 = arith.constant 0 : index
    %c0_48 = arith.constant 0 : index
    %143 = vector.load %arg13[%c0_47, %c0_48] : memref<32x1xf32, #tpu.memory_space<vmem>>, vector<32x1xf32>
    %c17_i32_49 = arith.constant 17 : i32
    %144 = tpu.dynamic_rotate %142 by %c17_i32_49 dim 1 : vector<16x256xf32>, i32 -> vector<16x256xf32>
    %145 = vector.extract_strided_slice %4 {offsets = [0, 0], sizes = [1, 256], strides = [1, 1]} : vector<9x256xf32> to vector<1x256xf32>
    %146 = vector.broadcast %145 : vector<1x256xf32> to vector<16x256xf32>
    %147 = arith.mulf %144, %146 : vector<16x256xf32>
    %148 = arith.truncf %147 : vector<16x256xf32> to vector<16x256xbf16>
    %c16_i32_50 = arith.constant 16 : i32
    %149 = tpu.dynamic_rotate %142 by %c16_i32_50 dim 1 : vector<16x256xf32>, i32 -> vector<16x256xf32>
    %150 = vector.extract_strided_slice %4 {offsets = [1, 0], sizes = [1, 256], strides = [1, 1]} : vector<9x256xf32> to vector<1x256xf32>
    %151 = vector.broadcast %150 : vector<1x256xf32> to vector<16x256xf32>
    %152 = arith.mulf %149, %151 : vector<16x256xf32>
    %153 = arith.truncf %152 : vector<16x256xf32> to vector<16x256xbf16>
    %c15_i32_51 = arith.constant 15 : i32
    %154 = tpu.dynamic_rotate %142 by %c15_i32_51 dim 1 : vector<16x256xf32>, i32 -> vector<16x256xf32>
    %155 = vector.extract_strided_slice %4 {offsets = [2, 0], sizes = [1, 256], strides = [1, 1]} : vector<9x256xf32> to vector<1x256xf32>
    %156 = vector.broadcast %155 : vector<1x256xf32> to vector<16x256xf32>
    %157 = arith.mulf %154, %156 : vector<16x256xf32>
    %158 = arith.truncf %157 : vector<16x256xf32> to vector<16x256xbf16>
    %c1_i32_52 = arith.constant 1 : i32
    %159 = tpu.dynamic_rotate %142 by %c1_i32_52 dim 1 : vector<16x256xf32>, i32 -> vector<16x256xf32>
    %160 = vector.extract_strided_slice %4 {offsets = [3, 0], sizes = [1, 256], strides = [1, 1]} : vector<9x256xf32> to vector<1x256xf32>
    %161 = vector.broadcast %160 : vector<1x256xf32> to vector<16x256xf32>
    %162 = arith.mulf %159, %161 : vector<16x256xf32>
    %163 = arith.truncf %162 : vector<16x256xf32> to vector<16x256xbf16>
    %164 = arith.truncf %142 : vector<16x256xf32> to vector<16x256xbf16>
    %c255_i32_53 = arith.constant 255 : i32
    %165 = tpu.dynamic_rotate %142 by %c255_i32_53 dim 1 : vector<16x256xf32>, i32 -> vector<16x256xf32>
    %166 = vector.extract_strided_slice %4 {offsets = [5, 0], sizes = [1, 256], strides = [1, 1]} : vector<9x256xf32> to vector<1x256xf32>
    %167 = vector.broadcast %166 : vector<1x256xf32> to vector<16x256xf32>
    %168 = arith.mulf %165, %167 : vector<16x256xf32>
    %169 = arith.truncf %168 : vector<16x256xf32> to vector<16x256xbf16>
    %c241_i32_54 = arith.constant 241 : i32
    %170 = tpu.dynamic_rotate %142 by %c241_i32_54 dim 1 : vector<16x256xf32>, i32 -> vector<16x256xf32>
    %171 = vector.extract_strided_slice %4 {offsets = [6, 0], sizes = [1, 256], strides = [1, 1]} : vector<9x256xf32> to vector<1x256xf32>
    %172 = vector.broadcast %171 : vector<1x256xf32> to vector<16x256xf32>
    %173 = arith.mulf %170, %172 : vector<16x256xf32>
    %174 = arith.truncf %173 : vector<16x256xf32> to vector<16x256xbf16>
    %c240_i32_55 = arith.constant 240 : i32
    %175 = tpu.dynamic_rotate %142 by %c240_i32_55 dim 1 : vector<16x256xf32>, i32 -> vector<16x256xf32>
    %176 = vector.extract_strided_slice %4 {offsets = [7, 0], sizes = [1, 256], strides = [1, 1]} : vector<9x256xf32> to vector<1x256xf32>
    %177 = vector.broadcast %176 : vector<1x256xf32> to vector<16x256xf32>
    %178 = arith.mulf %175, %177 : vector<16x256xf32>
    %179 = arith.truncf %178 : vector<16x256xf32> to vector<16x256xbf16>
    %c239_i32_56 = arith.constant 239 : i32
    %180 = tpu.dynamic_rotate %142 by %c239_i32_56 dim 1 : vector<16x256xf32>, i32 -> vector<16x256xf32>
    %181 = vector.extract_strided_slice %4 {offsets = [8, 0], sizes = [1, 256], strides = [1, 1]} : vector<9x256xf32> to vector<1x256xf32>
    %182 = vector.broadcast %181 : vector<1x256xf32> to vector<16x256xf32>
    %183 = arith.mulf %180, %182 : vector<16x256xf32>
    %184 = arith.truncf %183 : vector<16x256xf32> to vector<16x256xbf16>
    %185 = tpu.concatenate %148, %153, %158, %163, %164, %169, %174, %179, %184 in 0 : vector<16x256xbf16>, vector<16x256xbf16>, vector<16x256xbf16>, vector<16x256xbf16>, vector<16x256xbf16>, vector<16x256xbf16>, vector<16x256xbf16>, vector<16x256xbf16>, vector<16x256xbf16> -> vector<144x256xbf16>
    %c0_57 = arith.constant 0 : index
    %c0_58 = arith.constant 0 : index
    %186 = vector.load %arg12[%c0_57, %c0_58] : memref<32x144xbf16, #tpu.memory_space<vmem>>, vector<32x144xbf16>
    %cst_59 = arith.constant dense<0.000000e+00> : vector<32x256xf32>
    %187 = tpu.matmul %186, %185, %cst_59 {dimension_numbers = #tpu.dot_dimension_numbers<[1], [0], [0], [1], [0, 0, 1, 1], [], []>} : vector<32x144xbf16>, vector<144x256xbf16>, vector<32x256xf32> -> vector<32x256xf32>
    %188 = vector.broadcast %143 : vector<32x1xf32> to vector<32x256xf32>
    %189 = arith.addf %187, %188 : vector<32x256xf32>
    %190 = vector.extract_strided_slice %189 {offsets = [0, 0], sizes = [16, 256], strides = [1, 1]} : vector<32x256xf32> to vector<16x256xf32>
    %191 = vector.extract_strided_slice %189 {offsets = [16, 0], sizes = [16, 256], strides = [1, 1]} : vector<32x256xf32> to vector<16x256xf32>
    %cst_60 = arith.constant 1.000000e+00 : f32
    %192 = vector.broadcast %cst_60 : f32 to vector<16x256xf32>
    %193 = arith.addf %192, %190 : vector<16x256xf32>
    %194 = arith.mulf %20, %193 : vector<16x256xf32>
    %195 = arith.addf %194, %191 : vector<16x256xf32>
    %c0_61 = arith.constant 0 : index
    %c0_62 = arith.constant 0 : index
    %196 = vector.load %arg14[%c0_61, %c0_62] : memref<16x16xbf16, #tpu.memory_space<vmem>>, vector<16x16xbf16>
    %197 = arith.truncf %195 : vector<16x256xf32> to vector<16x256xbf16>
    %cst_63 = arith.constant dense<0.000000e+00> : vector<16x256xf32>
    %198 = tpu.matmul %196, %197, %cst_63 {dimension_numbers = #tpu.dot_dimension_numbers<[1], [0], [0], [1], [0, 0, 1, 1], [], []>} : vector<16x16xbf16>, vector<16x256xbf16>, vector<16x256xf32> -> vector<16x256xf32>
    %c0_64 = arith.constant 0 : index
    %c0_65 = arith.constant 0 : index
    %c0_66 = arith.constant 0 : index
    %199 = vector.load %arg16[%c0_64, %c0_65, %c0_66] : memref<1x16x256xf32, #tpu.memory_space<vmem>>, vector<1x16x256xf32>
    %200 = vector.shape_cast %199 : vector<1x16x256xf32> to vector<16x256xf32>
    %201 = vector.shape_cast %198 : vector<16x256xf32> to vector<1x16x256xf32>
    tpu.vector_store %arg16[%c0_64, %c0_65, %c0_66], %201 {strides = array<i32>} : memref<1x16x256xf32, #tpu.memory_space<vmem>>, vector<1x16x256xf32>,
    return
  }
  func.func @transform_0(%arg0: i32) -> (i32, i32, i32) {
    %c0_i32 = arith.constant 0 : i32
    %c0_i32_0 = arith.constant 0 : i32
    %c0_i32_1 = arith.constant 0 : i32
    return %arg0, %c0_i32, %c0_i32_0 : i32, i32, i32
  }
  func.func @transform_1(%arg0: i32) -> (i32, i32, i32) {
    %c0_i32 = arith.constant 0 : i32
    %c0_i32_0 = arith.constant 0 : i32
    %c0_i32_1 = arith.constant 0 : i32
    return %arg0, %c0_i32, %c0_i32_0 : i32, i32, i32
  }
  func.func @transform_2(%arg0: i32) -> (i32, i32) {
    %c0_i32 = arith.constant 0 : i32
    %c0_i32_0 = arith.constant 0 : i32
    %c0_i32_1 = arith.constant 0 : i32
    return %c0_i32, %c0_i32_0 : i32, i32
  }
  func.func @transform_3(%arg0: i32) -> (i32, i32) {
    %c0_i32 = arith.constant 0 : i32
    %c0_i32_0 = arith.constant 0 : i32
    %c0_i32_1 = arith.constant 0 : i32
    return %c0_i32, %c0_i32_0 : i32, i32
  }
  func.func @transform_4(%arg0: i32) -> (i32, i32) {
    %c0_i32 = arith.constant 0 : i32
    %c0_i32_0 = arith.constant 0 : i32
    %c0_i32_1 = arith.constant 0 : i32
    return %c0_i32, %c0_i32_0 : i32, i32
  }
  func.func @transform_5(%arg0: i32) -> (i32, i32) {
    %c0_i32 = arith.constant 0 : i32
    %c0_i32_0 = arith.constant 0 : i32
    %c0_i32_1 = arith.constant 0 : i32
    return %c0_i32, %c0_i32_0 : i32, i32
  }
  func.func @transform_6(%arg0: i32) -> (i32, i32) {
    %c0_i32 = arith.constant 0 : i32
    %c0_i32_0 = arith.constant 0 : i32
    %c0_i32_1 = arith.constant 0 : i32
    return %c0_i32, %c0_i32_0 : i32, i32
  }
  func.func @transform_7(%arg0: i32) -> (i32, i32) {
    %c0_i32 = arith.constant 0 : i32
    %c0_i32_0 = arith.constant 0 : i32
    %c0_i32_1 = arith.constant 0 : i32
    return %c0_i32, %c0_i32_0 : i32, i32
  }
  func.func @transform_8(%arg0: i32) -> (i32, i32) {
    %c0_i32 = arith.constant 0 : i32
    %c0_i32_0 = arith.constant 0 : i32
    %c0_i32_1 = arith.constant 0 : i32
    return %c0_i32, %c0_i32_0 : i32, i32
  }
  func.func @transform_9(%arg0: i32) -> (i32, i32) {
    %c0_i32 = arith.constant 0 : i32
    %c0_i32_0 = arith.constant 0 : i32
    %c0_i32_1 = arith.constant 0 : i32
    return %c0_i32, %c0_i32_0 : i32, i32
  }
  func.func @transform_10(%arg0: i32) -> (i32, i32) {
    %c0_i32 = arith.constant 0 : i32
    %c0_i32_0 = arith.constant 0 : i32
    %c0_i32_1 = arith.constant 0 : i32
    return %c0_i32, %c0_i32_0 : i32, i32
  }
  func.func @transform_11(%arg0: i32) -> (i32, i32) {
    %c0_i32 = arith.constant 0 : i32
    %c0_i32_0 = arith.constant 0 : i32
    %c0_i32_1 = arith.constant 0 : i32
    return %c0_i32, %c0_i32_0 : i32, i32
  }
  func.func @transform_12(%arg0: i32) -> (i32, i32) {
    %c0_i32 = arith.constant 0 : i32
    %c0_i32_0 = arith.constant 0 : i32
    %c0_i32_1 = arith.constant 0 : i32
    return %c0_i32, %c0_i32_0 : i32, i32
  }
  func.func @transform_13(%arg0: i32) -> (i32, i32) {
    %c0_i32 = arith.constant 0 : i32
    %c0_i32_0 = arith.constant 0 : i32
    %c0_i32_1 = arith.constant 0 : i32
    return %c0_i32, %c0_i32_0 : i32, i32
  }
  func.func @transform_14(%arg0: i32) -> (i32, i32, i32) {
    %c0_i32 = arith.constant 0 : i32
    %c0_i32_0 = arith.constant 0 : i32
    %c0_i32_1 = arith.constant 0 : i32
    return %arg0, %c0_i32, %c0_i32_0 : i32, i32, i32
  }
  func.func @transform_15(%arg0: i32) -> (i32, i32, i32) {
    %c0_i32 = arith.constant 0 : i32
    %c0_i32_0 = arith.constant 0 : i32
    %c0_i32_1 = arith.constant 0 : i32
    return %arg0, %c0_i32, %c0_i32_0 : i32, i32, i32
  }
}

</mosaic_0001>

<bundles_post_ra>
// kernel: tpu_custom_call.1
= control target key start
LH: loop header
LB: loop body
LE: loop exit
PB: predicated region body
PF: predicated region fallthrough
CT: control target
= control target key end

     0   :  { %s3741_s0 = inlined_call_operand.vmem [shape: f32[2,16,256], index: 0, kind: input, shape index: {}]   ;;  %s3742_s1 = inlined_call_operand.hbm [shape: bf16[2,144,256], index: 1, kind: input, shape index: {}]   ;;  %s3743_s2 = inlined_call_operand.vmem [shape: f32[9,256], index: 2, kind: input, shape index: {}]   ;;  %s3744_s3 = inlined_call_operand.hbm [shape: bf16[16,144], index: 3, kind: input, shape index: {}]   ;;  %s3745_s4 = inlined_call_operand.vmem [shape: f32[16,1], index: 4, kind: input, shape index: {}]   ;;  %s3746_s5 = inlined_call_operand.vmem [shape: bf16[32,144], index: 5, kind: input, shape index: {}]   ;;  %s3747_s6 = inlined_call_operand.vmem [shape: f32[32,1], index: 6, kind: input, shape index: {}]   ;;  %s3748_s7 = inlined_call_operand.hbm [shape: bf16[16,144], index: 7, kind: input, shape index: {}]   ;;  %s3749_s8 = inlined_call_operand.vmem [shape: f32[16,1], index: 8, kind: input, shape index: {}]   ;;  %s3750_s9 = inlined_call_operand.vmem [shape: bf16[16,144], index: 9, kind: input, shape index: {}]   ;;  %s3751_s10 = inlined_call_operand.vmem [shape: f32[16,1], index: 10, kind: input, shape index: {}]   ;;  %s3752_s11 = inlined_call_operand.hbm [shape: bf16[32,144], index: 11, kind: input, shape index: {}]   ;;  %s3753_s12 = inlined_call_operand.vmem [shape: f32[32,1], index: 12, kind: input, shape index: {}]   ;;  %s3754_s13 = inlined_call_operand.vmem [shape: bf16[16,16], index: 13, kind: input, shape index: {}]   ;;  %s3755_s14 = inlined_call_operand.hbm [shape: f32[2,16,256], index: 14, kind: output, shape index: {0}]   ;;  %s3756_s15 = inlined_call_operand.hbm [shape: f32[2,16,256], index: 15, kind: output, shape index: {1}]  }
   0x1   :  { %3782 = sst [smem:[#allocation21_spill]] %s3741_s0 }
   0x2   :  { %3783 = sst [smem:[#allocation22_spill]] %s3742_s1 }
   0x3   :  { %3784 = sst [smem:[#allocation23_spill]] %s3743_s2 }
   0x4   :  { %3785 = sst [smem:[#allocation24_spill]] %s3744_s3 }
   0x5   :  { %3786 = sst [smem:[#allocation25_spill]] %s3749_s8 }
   0x6   :  { %3787 = sst [smem:[#allocation26_spill]] %s3750_s9 }
   0x7   :  { %3788 = sst [smem:[#allocation27_spill]] %s3751_s10 }
   0x8   :  { %3789 = sst [smem:[#allocation28_spill]] %s3753_s12 }
   0x9   :  { %3790 = sst [smem:[#allocation29_spill]] %s3754_s13 }
   0xa   :  { %3791 = sst [smem:[#allocation30_spill]] %s3755_s14 }
   0xb   :  { %3792 = sst [smem:[#allocation31_spill]] %s3756_s15 }
   0xc   :  { %21 = vsyncpa [#allocation3], 0 }
   0xd   :  { %23 = vsyncpa [#allocation3 + $0x1], 0 }
   0xe   :  { %24 = vsyncpa [#allocation6], 0 }
   0xf   :  { %25 = vsyncpa [#allocation9], 0 }
  0x10   :  { %26 = vsyncpa [#allocation4], 0 }
  0x11   :  { %28 = vsyncpa [#allocation4 + $0x1], 0 }
  0x12   :  { %29 = vsyncpa [#allocation12], 0 }
  0x13   :  { %31 = vsyncpa [#allocation12 + $0x1], 0  ;;  %s2497_s18 = smov 0   ;;  %s2499_s19 = smov 0  }
  0x14   :  { %s2501_s20 = smov 0   ;;  %s2503_s21 = smov 0  }
  0x15 LB: > { %3793 = sst [smem:[#allocation18_spill]] %s2385_s18  ;;  %s2518_s22 = sadd.s32 4294967295, %s2397_s21   ;;  %s2397_s21 = sphi %s2503_s21, %s3840_s21   ;;  %s2393_s20 = sphi %s2501_s20, %s3839_s20   ;;  %s2389_s19 = sphi %s2499_s19, %s3838_s19   ;;  %s2385_s18 = sphi %s2497_s18, %s3837_s18  }
  0x16   : > { %s1956_s23 = sadd.s32 4294967294, %s2397_s21   ;;  %p83_p0 = scmp.ne.s32.totalorder %s2389_s19, %s2385_s18 }
  0x17   : > { %p3761_p1 = scmp.eq.s32.totalorder %s2518_s22, 0  ;;  %p365_p3 = scmp.eq.s32.totalorder %s1956_s23, 1 }
  0x18   : > { %p1957_p5 = scmp.ge.s32.totalorder %s2397_s21, 1  ;;  %p398_p7 = scmp.lt.s32.totalorder %s2397_s21, 3 }
  0x19   : > { %p2527_p4 = por %p3761_p1, %p83_p0  ;;  %p2532_p6 = por %p365_p3, %p83_p0 }
  0x1a   : > { %p2537_p8 = pnand %p1957_p5, %p398_p7  ;;  %s2399_s27 = smov [#allocation5]  }
  0x1b   : > { %s3794_s24 = scalar_select %p2527_p4, 1, 0 }
  0x1c   : > { %s3795_s25 = scalar_select %p2532_p6, 1, 0 }
  0x1d   : > { %s3797_s26 = scalar_select %p2537_p8, 1, 0 }
  0x1e   : > { %3796 = sst [smem:[#allocation19_spill]] %s3795_s25  ;;  %s413_s28 = sshll.u32 %s2399_s27, 4  ;;  %s2541_s28 = int_to_ptr.vmem [resolvable:$true] %s413_s28 }
  0x1f   : > { %p2046_p9 = pneg %p2537_p8  ;;  %s2400_s30 = smov [#allocation7]  }
  0x20   : > { %s435_s16 = sshll.u32 %s2400_s30, 4  ;;  %s2401_s17 = smov [#allocation8]   ;;  %s2552_s16 = int_to_ptr.vmem [resolvable:$true] %s435_s16 }
  0x21   : > { %p2548_p11 = pnand %p2046_p9, %p3761_p1  ;;  %s2554_s23 = sshll.u32 %s2401_s17, 4  ;;  %s458_s23 = int_to_ptr.vmem [resolvable:$true] %s2554_s23 }
  0x22   : > { %s3799_s3 = sld [smem:[#allocation24_spill]] }
  0x23   : > { %p2564_p13 = pneg %p2548_p11 }
  0x28   : > { %s2177_s18 = scalar_lea.hbm %s3799_s3, 256 }
  0x29   : > { %p2178_p12 = scmp.ne.s32.totalorder %s3799_s3, %s2177_s18  ;;  %p2184_p5 = scmp.lt.u32.totalorder %s2177_s18, %s3799_s3 }
  0x2b   : > { %p2180_p0 = pnand %p2564_p13, %p2178_p12 }
  0x2d   : > { %p2181_p3 = pneg %p2180_p0 }
  0x2f   : > { %p2186_p7 = pnand %p2184_p5, %p2181_p3 }
  0x31   : > { %2189 = shalt.err (!%p2186_p7)
}
  0x32   : > { %s2190_s14 = scalar_lea.vmem %s2541_s28, 256  ;;  %p2198_p2 = scmp.lt.s32.totalorder %s2541_s28, %s2541_s28 }
  0x33   : > { %p2191_p9 = scmp.ne.s32.totalorder %s2541_s28, %s2190_s14  ;;  %p2199_p6 = scmp.lt.s32.totalorder %s2190_s14, %s2190_s14 }
  0x35   : > { %p2193_p10 = pnand %p2191_p9, %p2564_p13  ;;  %p2200_p12 = por %p2199_p6, %p2198_p2 }
  0x37   : > { %p2194_p1 = pneg %p2193_p10 }
  0x39   : > { %p2201_p0 = pnand %p2200_p12, %p2194_p1 }
  0x3b   : > { %2204 = shalt.err (!%p2201_p0)
}
  0x3c   : > { %s3768_s15 = smov 128   ;;  %s3769_s18 = smov 8  }
  0x3d   : > { %2049 = dma.hbm_to_vmem [thread:$0]  (!%p2548_p11), %s3799_s3, 256, %s2541_s28, [#allocation6], %s3768_s15, %s3768_s15, %s3769_s18  }
  0x3e   : > { %s2205_s14 = scalar_lea.hbm %s3748_s7, 256 }
  0x3f   : > { %p2206_p1 = scmp.ne.s32.totalorder %s3748_s7, %s2205_s14  ;;  %p2212_p10 = scmp.lt.u32.totalorder %s2205_s14, %s3748_s7 }
  0x41   : > { %p2208_p2 = pnand %p2206_p1, %p2564_p13 }
  0x43   : > { %p2209_p6 = pneg %p2208_p2 }
  0x45   : > { %p2214_p3 = pnand %p2212_p10, %p2209_p6 }
  0x47   : > { %2217 = shalt.err (!%p2214_p3)
}
  0x48   : > { %s2218_s28 = scalar_lea.vmem %s2552_s16, 256  ;;  %p2226_p12 = scmp.lt.s32.totalorder %s2552_s16, %s2552_s16 }
  0x49   : > { %p2219_p5 = scmp.ne.s32.totalorder %s2552_s16, %s2218_s28  ;;  %p2227_p0 = scmp.lt.s32.totalorder %s2218_s28, %s2218_s28 }
  0x4b   : > { %p2221_p7 = pnand %p2219_p5, %p2564_p13  ;;  %p2228_p1 = por %p2227_p0, %p2226_p12 }
  0x4d   : > { %p2222_p9 = pneg %p2221_p7 }
  0x4f   : > { %p2229_p2 = pnand %p2228_p1, %p2222_p9 }
  0x51   : > { %2232 = shalt.err (!%p2229_p2)
}
  0x52   : > { %2052 = dma.hbm_to_vmem [thread:$0]  (!%p2548_p11), %s3748_s7, 256, %s2552_s16, [#allocation6], %s3768_s15, %s3768_s15, %s3769_s18  }
  0x53   : > { %s2233_s25 = scalar_lea.hbm %s3752_s11, 512 }
  0x54   : > { %p2234_p6 = scmp.ne.s32.totalorder %s3752_s11, %s2233_s25  ;;  %p2240_p5 = scmp.lt.u32.totalorder %s2233_s25, %s3752_s11 }
  0x56   : > { %p2236_p10 = pnand %p2234_p6, %p2564_p13 }
  0x58   : > { %p2237_p3 = pneg %p2236_p10 }
  0x5a   : > { %p2242_p7 = pnand %p2240_p5, %p2237_p3 }
  0x5c   : > { %2245 = shalt.err (!%p2242_p7)
}
  0x5d   : > { %s2246_s28 = scalar_lea.vmem %s458_s23, 512  ;;  %p2254_p1 = scmp.lt.s32.totalorder %s458_s23, %s458_s23 }
  0x5e   : > { %p2247_p9 = scmp.ne.s32.totalorder %s458_s23, %s2246_s28  ;;  %p2255_p2 = scmp.lt.s32.totalorder %s2246_s28, %s2246_s28 }
  0x60   : > { %p2249_p12 = pnand %p2247_p9, %p2564_p13  ;;  %p2256_p4 = por %p2255_p2, %p2254_p1 }
  0x62   : > { %p2250_p0 = pneg %p2249_p12 }
  0x64   : > { %p2257_p8 = pnand %p2256_p4, %p2250_p0 }
  0x66   : > { %2260 = shalt.err (!%p2257_p8)
}
  0x67   : > { %2055 = dma.hbm_to_vmem [thread:$0]  (!%p2548_p11), %s3752_s11, 512, %s458_s23, [#allocation9], %s3768_s15, %s3768_s15, %s3769_s18  }
  0x68   : > { %s2637_s13 = sadd.s32 1, %s2397_s21   ;;  %s70_s9 = sadd.s32 1, %s2393_s20 }
  0x69   : > { %s67_s29 = ssub.s32 %s2397_s21, %s2637_s13  ;;  %p77_p8 = scmp.ne.s32.totalorder %s2393_s20, %s2389_s19 }
  0x6a   : > { %p68_p4 = scmp.eq.s32.totalorder %s67_s29, 0  ;;  %p78_p13 = scmp.eq.s32.totalorder %s2397_s21, 0 }
  0x6b   : > { %p2070_p6 = scmp.lt.s32.totalorder %s2397_s21, 2  ;;  %p3801_p3 = scmp.eq.s32.totalorder %s2518_s22, 1 }
  0x6c   : > { %s2647_s10 = scalar_select %p68_p4, %s2393_s20, %s70_s9  }
  0x6d   : > { %p79_p10 = por %p78_p13, %p77_p8  ;;  %p2651_p5 = por %p3801_p3, %p77_p8 }
  0x6e   : > { %s485_s25 = sand.u32 1, %s2393_s20   ;;  %s2026_s27 = smul.u32 2304, %s2397_s21 }
  0x6f   : > { %s2025_s23 = smul.u32 144, %s485_s25  ;;  %p2657_p11 = pnand %p2070_p6, %p79_p10 }
  0x70   : > { %s3804_s1 = sld [smem:[#allocation22_spill]]  ;;  %s2668_s29 = scalar_lea.sflag [#allocation3], %s485_s25 }
  0x71   : > { %s489_s16 = scalar_lea.vmem [#allocation2], %s2025_s23  ;;  %p2263_p9 = pneg %p2657_p11 }
  0x72   : > { %s496_s8 = sshll.u32 %s489_s16, 4  ;;  %s2666_s8 = int_to_ptr.vmem [resolvable:$true] %s496_s8 }
  0x76   : > { %s2664_s28 = scalar_lea.hbm %s3804_s1, %s2026_s27  ;;  %s2266_s14 = scalar_lea.hbm %s3804_s1, 4608 }
  0x77   : > { %s2261_s9 = scalar_lea.hbm %s2664_s28, 2304  ;;  %p2267_p1 = scmp.lt.u32.totalorder %s2664_s28, %s3804_s1 }
  0x78   : > { %p2262_p7 = scmp.ne.s32.totalorder %s2664_s28, %s2261_s9  ;;  %p2268_p2 = scmp.lt.u32.totalorder %s2266_s14, %s2261_s9 }
  0x79   : > { %p2270_p8 = scmp.lt.u32.totalorder %s2261_s9, %s2664_s28 }
  0x7a   : > { %p2264_p12 = pnand %p2263_p9, %p2262_p7  ;;  %p2269_p4 = por %p2268_p2, %p2267_p1 }
  0x7c   : > { %p2265_p0 = pneg %p2264_p12  ;;  %p2271_p13 = por %p2270_p8, %p2269_p4 }
  0x7e   : > { %p2272_p6 = pnand %p2271_p13, %p2265_p0 }
  0x80   : > { %2275 = shalt.err (!%p2272_p6)
}
  0x81   : > { %s2276_s25 = scalar_lea.vmem %s2666_s8, 2304  ;;  %s2404_s23 = smov [#allocation2]  }
  0x82   : > { %p2277_p10 = scmp.ne.s32.totalorder %s2666_s8, %s2276_s25  ;;  %s2281_s16 = sshll.u32 %s2404_s23, 4  ;;  %s2282_s16 = int_to_ptr.vmem [resolvable:$false] %s2281_s16 }
  0x83   : > { %s2283_s15 = scalar_lea.vmem %s2282_s16, 4608  ;;  %p2284_p12 = scmp.lt.s32.totalorder %s2666_s8, %s2282_s16 }
  0x84   : > { %p2279_p3 = pnand %p2277_p10, %p2263_p9  ;;  %p2285_p1 = scmp.lt.s32.totalorder %s2283_s15, %s2276_s25 }
  0x86   : > { %p2280_p7 = pneg %p2279_p3  ;;  %p2286_p2 = por %p2285_p1, %p2284_p12 }
  0x88   : > { %p2287_p4 = pnand %p2286_p2, %p2280_p7 }
  0x8a   : > { %2290 = shalt.err (!%p2287_p4)
}
  0x8b   : > { %s3805_s18 = smov 8   ;;  %s3806_s9 = smov 128  }
  0x8c   : > { %2059 = dma.hbm_to_vmem [thread:$0]  (!%p2657_p11), %s2664_s28, 2304, %s2666_s8, %s2668_s29, %s3806_s9, %s3806_s9, %s3805_s18  }
  0x8d   : > { %p3807_p9 = scmp.ne.s32.totalorder %s3797_s26, 0 }
  0x8f   : > { %508 = sbr.rel (%p3807_p9) target bundleno = 1544 (0x608), region = 76 }
  0x96   : > { %s2702_s27 = sand.u32 1, %s2389_s19   ;;  %p3808_p0 = scmp.ne.s32.totalorder %s3794_s24, 0 }
  0x97   : > { %s2027_s17 = smul.u32 144, %s2702_s27  ;;  %s511_s14 = scalar_lea.sflag [#allocation3], %s2702_s27 }
  0x99   : > { %s2706_s25 = scalar_lea.vmem [#allocation2], %s2027_s17 }
  0x9a   : > { %2364 = dma.done.wait (%p3808_p0), %s511_s14, 2304  }
  0x9b   : > { %2366 = vsyncadd (%p3808_p0), %s511_s14, 4294964992  ;;  %p3809_p11 = scmp.eq.s32.totalorder %s2518_s22, 0 }
  0x9d   : > { %2368 = dma.done.wait (%p3809_p11), [#allocation6], 512   ;;  %p3810_p8 = pmov %p3809_p11 }
  0x9f   : > { %2370 = vsyncadd (%p3810_p8), [#allocation6], 4294966784  ;;  %p3811_p13 = pmov %p3810_p8 }
  0xa0   : > { %p3812_p6 = pmov %p3810_p8 }
  0xa1   : > { %2372 = dma.done.wait (%p3811_p13), [#allocation9], 512  }
  0xa2   : > { %2374 = vsyncadd (%p3812_p6), [#allocation9], 4294966784  ;;  %v3772_v0 = vmov 0   ;;  %v2723_v1 = vld [vmem:[%s2706_s25 + $0x4] ss:$8 sps:$4 sm:$0xff]   ;;  %vm761_vm0 = vcmask 130048   ;;  %v824_v59 = vlaneseq }
  0xa3   : > { %2122 = vset.pattern.permute.xlu0 %v3772_v0  ;;  %2123 = vset.pattern.permute.xlu1 %v3772_v0  ;;  %v2726_v2 = vld [vmem:[%s2706_s25] ss:$8 sps:$4 sm:$0xff]   ;;  %v2730_v3 = vld [vmem:[%s2706_s25 + $0x14] ss:$8 sps:$4 sm:$0xff]   ;;  %v2734_v4 = vld [vmem:[%s2706_s25 + $0x10] ss:$8 sps:$4 sm:$0xff]  }
  0xa4   : > { %765 = vmatprep.subr.bf16.mxu0 %v2723_v1  ;;  %v2738_v5 = vld [vmem:[%s2706_s25 + $0x24] ss:$8 sps:$4 sm:$0xff]   ;;  %v2742_v6 = vld [vmem:[%s2706_s25 + $0x20] ss:$8 sps:$4 sm:$0xff]   ;;  %v2746_v7 = vld [vmem:[%s2706_s25 + $0x34] ss:$8 sps:$4 sm:$0xff]  }
  0xa5   : > { %766 = vmatpush1.bf16.msra.mxu0 %v2726_v2  ;;  %v2750_v8 = vld [vmem:[%s2706_s25 + $0x30] ss:$8 sps:$4 sm:$0xff]   ;;  %v2754_v9 = vld [vmem:[%s2706_s25 + $0x44] ss:$8 sps:$4 sm:$0xff]   ;;  %v2757_v10 = vld [vmem:[%s2706_s25 + $0x40] ss:$8 sps:$4 sm:$0xff]  }
  0xa6   : > { %767 = vmatprep.subr.bf16.mxu0 %v2730_v3  ;;  %v2153_v11 = vld [vmem:[#allocation5 + $0x4] ss:$8 sps:$4 sm:$0xff]   ;;  %v2773_v15 = vld [vmem:[%s2706_s25 + $0x50] ss:$8 sps:$4 sm:$0xff]   ;;  %v2781_v17 = vld [vmem:[%s2706_s25 + $0x60] ss:$8 sps:$4 sm:$0xff]  }
  0xa7   : > { %v650_v12 = vld [vmem:[%s3745_s4] sm:$0xff]  ;;  %v651_v13 = vld [vmem:[%s3745_s4 + $0x8] sm:$0xff]  ;;  %1991 = vmatprep.mubr.msk.bf16.mxu0 %vm761_vm0, %v2153_v11  ;;  %s3778_s8 = smov 16   ;;  %s2407_s29 = smov 17   ;;  %v814_v53 = vld [vmem:[%s3747_s6 + $0x10] sm:$0xff]  ;;  %v2923_v62 = vshrl.u32 %v824_v59, 7 }
  0xa8   : > { %v2766_v14 = vld [vmem:[%s2706_s25 + $0x54] ss:$8 sps:$4 sm:$0xff]   ;;  %654 = vperm.xlu0 %2122, %v650_v12   ;;  %v2777_v16 = vld [vmem:[%s2706_s25 + $0x64] ss:$8 sps:$4 sm:$0xff]   ;;  %v2789_v19 = vld [vmem:[%s2706_s25 + $0x70] ss:$8 sps:$4 sm:$0xff]  }
  0xa9   : > { %768 = vmatpush1.bf16.msra.mxu0 %v2734_v4  ;;  %v2785_v18 = vld [vmem:[%s2706_s25 + $0x74] ss:$8 sps:$4 sm:$0xff]   ;;  %v2793_v20 = vld [vmem:[%s2706_s25 + $0x84] ss:$8 sps:$4 sm:$0xff]   ;;  %v2797_v21 = vld [vmem:[%s2706_s25 + $0x80] ss:$8 sps:$4 sm:$0xff]  }
  0xaa   : > { %769 = vmatprep.subr.bf16.mxu0 %v2738_v5  ;;  %v2151_v22 = vld [vmem:[#allocation5] ss:$8 sps:$4 sm:$0xff]   ;;  %s2408_s23 = smov 15   ;;  %s2409_s16 = smov 1   ;;  %v2156_v39 = vld [vmem:[%s3746_s5 + $0x4] ss:$8 sps:$4 sm:$0xff]  }
  0xab   : > { %s3770_s15 = smov 127   ;;  %s2411_s18 = smov 113   ;;  %1998 = vmatprep.mubr.msk.bf16.mxu1 %vm761_vm0, %v2156_v39  ;;  %v812_v52 = vld [vmem:[%s3747_s6] sm:$0xff]  ;;  %v815_v56 = vld [vmem:[%s3747_s6 + $0x18] sm:$0xff]  ;;  %v2925_v63 = vand.u32 127, %v824_v59 }
  0xac   : > { %659 = vperm.xlu0 %2122, %v651_v13   ;;  %s2412_s9 = smov 112   ;;  %s3775_s17 = smov 111   ;;  %v833_v13 = vsub.s32 0, %v2923_v62 }
  0xad   : > { %770 = vmatpush1.bf16.msra.mxu0 %v2742_v6  ;;  %p583_p10 = scmp.lt.s32.totalorder %s2518_s22, 1  ;;  %s3813_s0 = sld [smem:[#allocation21_spill]]  ;;  %vm826_vm1 = vcmp.lt.s32.totalorder %v2925_v63, 17  ;;  %vm853_vm2 = vcmp.lt.s32.totalorder %v2925_v63, 16  ;;  %vm880_vm3 = vcmp.lt.s32.totalorder %v2925_v63, 15  ;;  %vm907_vm4 = vcmp.lt.s32.totalorder %v2925_v63, 1 }
  0xae   : > { %771 = vmatprep.subr.bf16.mxu0 %v2746_v7  ;;  %s3814_s2 = sld [smem:[#allocation23_spill]]  ;;  %s3816_s30 = sld [smem:[#allocation27_spill]]  ;;  %vm936_vm5 = vcmp.lt.s32.totalorder %v2925_v63, 127  ;;  %vm963_vm6 = vcmp.lt.s32.totalorder %v2925_v63, 113  ;;  %vm990_vm7 = vcmp.lt.s32.totalorder %v2925_v63, 112  ;;  %vm1017_vm8 = vcmp.lt.s32.totalorder %v2925_v63, 111 }
  0xaf   : > { %s584_s24 = scalar_select %p583_p10, %s2518_s22, 1  ;;  %v2171_v63 = vld [vmem:[#allocation8 + $0x10] ss:$8 sps:$4 sm:$0xff]  }
  0xb0   : > { %s3821_s28 = smov 127   ;;  %s3822_s14 = smov 111  }
  0xb1   : > { %772 = vmatpush1.bf16.msra.mxu0 %v2750_v8  ;;  %s2022_s26 = sshll.u32 %s584_s24, 5  ;;  %s3777_s25 = sshll.u32 %s2702_s27, 5 }
  0xb2   : > { %773 = vmatprep.subr.bf16.mxu0 %v2754_v9  ;;  %s2414_s24 = smov [#allocation10]  }
  0xb5   : > { %774 = vmatpush1.bf16.msra.mxu0 %v2757_v10 }
  0xb6   : > { %775 = vmatprep.subr.bf16.mxu0 %v2766_v14 }
  0xb9   : > { %776 = vmatpush1.bf16.msra.mxu0 %v2773_v15 }
  0xba   : > { %777 = vmatprep.subr.bf16.mxu0 %v2777_v16 }
  0xbd   : > { %778 = vmatpush1.bf16.msra.mxu0 %v2781_v17 }
  0xbe   : > { %779 = vmatprep.subr.bf16.mxu0 %v2785_v18 }
  0xc1   : > { %780 = vmatpush1.bf16.msra.mxu0 %v2789_v19 }
  0xc2   : > { %781 = vmatprep.subr.bf16.mxu0 %v2793_v20 }
  0xc5   : > { %782 = vmatpush1.bf16.msra.mxu0 %v2797_v21 }
  0xc8   : > { %798 = vmatmul.mubr.bf16.vlgmr.msra.gmra.mrb[0].mxu0 %v2151_v22  ;;  %v2933_v22 = vld [vmem:[%s3814_s2] sm:$0xff] }
 0x127   : > { %v655_v23 = vpop.permute.xlu0 %654 }
 0x12b   : > { %v660_v27 = vpop.permute.xlu0 %659 }
 0x19b   : > { %v799_v24 = vpop.f32.mrb[0].mxu0 }
 0x19c   : > { %v800_v25 = vadd.f32 %v799_v24, %v655_v23  ;;  %v801_v26 = vpop.f32.mrb[1].mxu0 }
 0x19d   : > { %v802_v28 = vadd.f32 %v801_v26, %v655_v23  ;;  %v803_v29 = vpop.f32.mrb[2].mxu0  ;;  %v2938_v23 = vld [vmem:[%s3814_s2 + $0x8] sm:$0xff]  ;;  %v860_v26 = vsub.s32 1, %v2923_v62 }
 0x19e   : > { %v2801_v30 = vmax.f32 %v800_v25, 0.0  ;;  %v804_v31 = vadd.f32 %v803_v29, %v660_v27  ;;  %v805_v32 = vpop.f32.mrb[3].mxu0  ;;  %v1383_v29 = vld [vmem:[%s3816_s30 + $0x8] sm:$0xff] }
 0x19f   : > { %v806_v33 = vadd.f32 %v805_v32, %v660_v27  ;;  %v2809_v35 = vmax.f32 %v802_v28, 0.0  ;;  %v2945_v27 = vrot.slane %v2933_v22, %v833_v13  ;;  %v2948_v28 = vrot.slane %v2938_v23, %v833_v13 }
 0x1a0   : > { %v2803_v34 = vmax.f32 %v804_v31, 0.0  ;;  %845 = vrot.lane.b32.xlu0 %v2801_v30, %s3778_s8  ;;  %816 = vrot.lane.b32.xlu1 %v2801_v30, %s2407_s29 }
 0x1a1   : > { %v2811_v36 = vmax.f32 %v806_v33, 0.0  ;;  %3815 = vst [vmem:[#allocation20_spill] sm:$0xff] %v2948_v28  ;;  %v887_v33 = vsub.s32 2, %v2923_v62 }
 0x1a3   : > { %v2979_v0 = vrot.slane %v2933_v22, %v887_v33 }
 0x1a4   : > { %872 = vrot.lane.b32.xlu0 %v2801_v30, %s2408_s23  ;;  %818 = vrot.lane.b32.xlu1 %v2803_v34, %s2407_s29 }
 0x1a8   : > { %899 = vrot.lane.b32.xlu0 %v2801_v30, %s2409_s16  ;;  %847 = vrot.lane.b32.xlu1 %v2803_v34, %s3778_s8 }
 0x1ac   : > { %928 = vrot.lane.b32.xlu0 %v2801_v30, %s3770_s15  ;;  %874 = vrot.lane.b32.xlu1 %v2803_v34, %s2408_s23 }
 0x1b0   : > { %955 = vrot.lane.b32.xlu0 %v2801_v30, %s2411_s18  ;;  %901 = vrot.lane.b32.xlu1 %v2803_v34, %s2409_s16 }
 0x1b4   : > { %982 = vrot.lane.b32.xlu0 %v2801_v30, %s2412_s9  ;;  %930 = vrot.lane.b32.xlu1 %v2803_v34, %s3770_s15 }
 0x1b8   : > { %820 = vrot.lane.b32.xlu0 %v2809_v35, %s2407_s29  ;;  %957 = vrot.lane.b32.xlu1 %v2803_v34, %s2411_s18 }
 0x1bc   : > { %849 = vrot.lane.b32.xlu0 %v2809_v35, %s3778_s8  ;;  %984 = vrot.lane.b32.xlu1 %v2803_v34, %s2412_s9 }
 0x1c0   : > { %876 = vrot.lane.b32.xlu0 %v2809_v35, %s2408_s23  ;;  %822 = vrot.lane.b32.xlu1 %v2811_v36, %s2407_s29 }
 0x1c4   : > { %903 = vrot.lane.b32.xlu0 %v2809_v35, %s2409_s16  ;;  %851 = vrot.lane.b32.xlu1 %v2811_v36, %s3778_s8 }
 0x1c8   : > { %1009 = vrot.lane.b32.xlu0 %v2801_v30, %s3775_s17  ;;  %878 = vrot.lane.b32.xlu1 %v2811_v36, %s2408_s23 }
 0x1cc   : > { %932 = vrot.lane.b32.xlu0 %v2809_v35, %s3770_s15  ;;  %905 = vrot.lane.b32.xlu1 %v2811_v36, %s2409_s16 }
 0x1d0   : > { %959 = vrot.lane.b32.xlu0 %v2809_v35, %s2411_s18  ;;  %1011 = vrot.lane.b32.xlu1 %v2803_v34, %s3775_s17 }
 0x1d4   : > { %986 = vrot.lane.b32.xlu0 %v2809_v35, %s2412_s9  ;;  %934 = vrot.lane.b32.xlu1 %v2811_v36, %s3770_s15  ;;  %s587_s15 = scalar_lea.vmem %s3813_s0, %s2022_s26  ;;  %s3826_s26 = sld [smem:[#allocation29_spill]] }
 0x1d5   : > { %v2886_v40 = vld [vmem:[%s587_s15] sm:$0xff]  ;;  %v2888_v41 = vld [vmem:[%s587_s15 + $0x8] sm:$0xff]  ;;  %v2892_v43 = vld [vmem:[%s587_s15 + $0x10] sm:$0xff]  ;;  %s1776_s0 = scalar_lea.sflag [#allocation4], %s2702_s27 }
 0x1d6   : > { %v615_v42 = vadd.f32 %v2888_v41, %v2886_v40  ;;  %v2894_v44 = vld [vmem:[%s587_s15 + $0x18] sm:$0xff] }
 0x1d7   : > { %v618_v45 = vadd.f32 %v2894_v44, %v2892_v43 }
 0x1d8   : > { %1013 = vrot.lane.b32.xlu0 %v2809_v35, %s3775_s17  ;;  %961 = vrot.lane.b32.xlu1 %v2811_v36, %s2411_s18 }
 0x1dc   : > { %988 = vrot.lane.b32.xlu1 %v2811_v36, %s2412_s9 }
 0x1e0   : > { %1015 = vrot.lane.b32.xlu1 %v2811_v36, %s3775_s17  ;;  %s3819_s17 = sld [smem:[#allocation26_spill]] }
 0x1f7   : > { %616 = vadd.xlane.f32.xlu0 %v615_v42 }
 0x204   : > { %619 = vadd.xlane.f32.xlu1 %v618_v45  ;;  %v2960_v45 = vrot.slane %v2933_v22, %v860_v26 }
 0x212   : > { %v846_v46 = vpop.permute.xlu0 %845  ;;  %v817_v47 = vpop.permute.xlu1 %816 }
 0x215   : > { %1042 = vperm.xlu1 %2123, %v812_v52   ;;  %v2963_v52 = vrot.slane %v2938_v23, %v860_v26 }
 0x216   : > { %v2898_v48 = vpop.permute.xlu0 %872  ;;  %v819_v49 = vpop.permute.xlu1 %818 }
 0x219   : > { %1052 = vperm.xlu1 %2123, %v814_v53  }
 0x21a   : > { %v2900_v50 = vpop.permute.xlu0 %899  ;;  %v848_v51 = vpop.permute.xlu1 %847 }
 0x21d   : > { %1057 = vperm.xlu1 %2123, %v815_v56  }
 0x21e   : > { %v2908_v54 = vpop.permute.xlu0 %928  ;;  %v2910_v55 = vpop.permute.xlu1 %874 }
 0x221   : > { %1391 = vperm.xlu1 %2123, %v1383_v29  }
 0x222   : > { %v2915_v57 = vpop.permute.xlu0 %955  ;;  %v2917_v58 = vpop.permute.xlu1 %901 }
 0x226   : > { %v2919_v60 = vpop.permute.xlu0 %982  ;;  %v2921_v61 = vpop.permute.xlu1 %930 }
 0x22a   : > { %v821_v11 = vpop.permute.xlu0 %820  ;;  %v2927_v12 = vpop.permute.xlu1 %957 }
 0x22b   : > { %v827_v31 = vsel %vm826_vm1, %v817_v47, %v821_v11  ;;  %v829_v32 = vsel %vm826_vm1, %v821_v11, %v817_v47 }
 0x22c   : > { %v839_v47 = vmul.f32 %v2945_v27, %v829_v32  ;;  %v840_v11 = vmul.f32 %v2948_v28, %v827_v31  ;;  %v914_v31 = vsub.s32 3, %v2923_v62 }
 0x22e   : > { %v850_v24 = vpop.permute.xlu0 %849  ;;  %v2941_v25 = vpop.permute.xlu1 %984 }
 0x22f   : > { %v854_v29 = vsel %vm853_vm2, %v846_v46, %v850_v24  ;;  %v856_v26 = vsel %vm853_vm2, %v850_v24, %v846_v46 }
 0x230   : > { %v866_v24 = vmul.f32 %v2960_v45, %v856_v26  ;;  %v867_v38 = vmul.f32 %v2963_v52, %v854_v29  ;;  %v3003_v26 = vrot.slane %v2933_v22, %v914_v31 }
 0x232   : > { %v877_v39 = vpop.permute.xlu0 %876  ;;  %v823_v42 = vpop.permute.xlu1 %822 }
 0x233   : > { %v828_v53 = vsel %vm826_vm1, %v819_v49, %v823_v42  ;;  %v830_v56 = vsel %vm826_vm1, %v823_v42, %v819_v49 }
 0x234   : > { %v841_v59 = vmul.f32 %v2945_v27, %v830_v56  ;;  %v842_v13 = vmul.f32 %v2948_v28, %v828_v53  ;;  %v2982_v56 = vrot.slane %v2938_v23, %v887_v33  ;;  %v881_v33 = vsel %vm880_vm3, %v2898_v48, %v877_v39 }
 0x236   : > { %v904_v49 = vpop.permute.xlu0 %903  ;;  %v852_v42 = vpop.permute.xlu1 %851  ;;  %v844_v32 = vpack.c.bf16 %v842_v13, %v840_v11  ;;  %v843_v37 = vpack.c.bf16 %v841_v59, %v839_v47  ;;  %v883_v47 = vsel %vm880_vm3, %v877_v39, %v2898_v48  ;;  %v894_v39 = vmul.f32 %v2982_v56, %v881_v33 }
 0x237   : > { %v855_v53 = vsel %vm853_vm2, %v848_v51, %v852_v42  ;;  %v857_v46 = vsel %vm853_vm2, %v852_v42, %v848_v51  ;;  %v3006_v42 = vrot.slane %v2938_v23, %v914_v31  ;;  %v893_v48 = vmul.f32 %v2979_v0, %v883_v47 }
 0x238   : > { %v868_v28 = vmul.f32 %v2960_v45, %v857_v46  ;;  %v869_v11 = vmul.f32 %v2963_v52, %v855_v53  ;;  %1084 = vmatprep.subr.bf16.mxu1 %v844_v32  ;;  %v908_v31 = vsel %vm907_vm4, %v2900_v50, %v904_v49  ;;  %v910_v53 = vsel %vm907_vm4, %v904_v49, %v2900_v50 }
 0x239   : > { %1085 = vmatpush1.bf16.msra.mxu1 %v843_v37  ;;  %v943_v33 = vsub.s32 5, %v2923_v62 }
 0x23a   : > { %v3000_v51 = vpop.permute.xlu0 %1009  ;;  %v879_v59 = vpop.permute.xlu1 %878  ;;  %v871_v13 = vpack.c.bf16 %v869_v11, %v867_v38  ;;  %v870_v29 = vpack.c.bf16 %v868_v28, %v866_v24 }
 0x23b   : > { %v882_v32 = vsel %vm880_vm3, %v2910_v55, %v879_v59  ;;  %v884_v37 = vsel %vm880_vm3, %v879_v59, %v2910_v55 }
 0x23c   : > { %v895_v38 = vmul.f32 %v2979_v0, %v884_v37  ;;  %v896_v28 = vmul.f32 %v2982_v56, %v882_v32  ;;  %1086 = vmatprep.subr.bf16.mxu1 %v871_v13  ;;  %v920_v13 = vmul.f32 %v3003_v26, %v910_v53  ;;  %v921_v32 = vmul.f32 %v3006_v42, %v908_v31 }
 0x23d   : > { %1087 = vmatpush1.bf16.msra.mxu1 %v870_v29  ;;  %v970_v29 = vsub.s32 6, %v2923_v62 }
 0x23e   : > { %v933_v46 = vpop.permute.xlu0 %932  ;;  %v906_v55 = vpop.permute.xlu1 %905  ;;  %v898_v24 = vpack.c.bf16 %v896_v28, %v894_v39  ;;  %v897_v11 = vpack.c.bf16 %v895_v38, %v893_v48  ;;  %v3043_v28 = vrot.slane %v2938_v23, %v943_v33 }
 0x23f   : > { %v909_v47 = vsel %vm907_vm4, %v2917_v58, %v906_v55  ;;  %v911_v59 = vsel %vm907_vm4, %v906_v55, %v2917_v58  ;;  %v3040_v58 = vrot.slane %v2933_v22, %v943_v33  ;;  %v937_v31 = vsel %vm936_vm5, %v2908_v54, %v933_v46 }
 0x240   : > { %v922_v50 = vmul.f32 %v3003_v26, %v911_v59  ;;  %v923_v49 = vmul.f32 %v3006_v42, %v909_v47  ;;  %1088 = vmatprep.subr.bf16.mxu1 %v898_v24  ;;  %v939_v53 = vsel %vm936_vm5, %v933_v46, %v2908_v54  ;;  %v3053_v55 = vrot.slane %v2933_v22, %v970_v29 }
 0x241   : > { %1089 = vmatpush1.bf16.msra.mxu1 %v897_v11  ;;  %v3817_v24 = vpack.c.bf16 %v2811_v36, %v2809_v35  ;;  %v3059_v33 = vrot.slane %v2938_v23, %v970_v29  ;;  %v997_v47 = vsub.s32 7, %v2923_v62  ;;  %v949_v59 = vmul.f32 %v3040_v58, %v937_v31 }
 0x242   : > { %v960_v37 = vpop.permute.xlu0 %959  ;;  %v3037_v48 = vpop.permute.xlu1 %1011  ;;  %v925_v39 = vpack.c.bf16 %v923_v49, %v921_v32  ;;  %v924_v38 = vpack.c.bf16 %v922_v50, %v920_v13  ;;  %v950_v13 = vmul.f32 %v3043_v28, %v939_v53 }
 0x243   : > { %v964_v62 = vsel %vm963_vm6, %v2915_v57, %v960_v37  ;;  %v966_v50 = vsel %vm963_vm6, %v960_v37, %v2915_v57  ;;  %v3086_v31 = vrot.slane %v2938_v23, %v997_v47 }
 0x244   : > { %1090 = vmatprep.subr.bf16.mxu1 %v925_v39  ;;  %v977_v57 = vmul.f32 %v3059_v33, %v966_v50 }
 0x245   : > { %1091 = vmatpush1.bf16.msra.mxu1 %v924_v38  ;;  %v3083_v38 = vrot.slane %v2933_v22, %v997_v47 }
 0x246   : > { %1092 = vmatprep.subr.bf16.mxu1 %v3817_v24  ;;  %v935_v11 = vpop.permute.xlu1 %934  ;;  %v987_v35 = vpop.permute.xlu0 %986 }
 0x247   : > { %v938_v54 = vsel %vm936_vm5, %v2921_v61, %v935_v11  ;;  %v940_v46 = vsel %vm936_vm5, %v935_v11, %v2921_v61  ;;  %v3818_v61 = vpack.c.bf16 %v2803_v34, %v2801_v30  ;;  %v976_v34 = vmul.f32 %v3053_v55, %v964_v62  ;;  %v3123_v62 = vld [vmem:[%s3814_s2 + $0x18] ss:$0 sm:$0xff] }
 0x248   : > { %v951_v36 = vmul.f32 %v3040_v58, %v938_v54  ;;  %v952_v32 = vmul.f32 %v3043_v28, %v940_v46  ;;  %v991_v23 = vsel %vm990_vm7, %v2919_v60, %v987_v35  ;;  %v993_v24 = vsel %vm990_vm7, %v987_v35, %v2919_v60 }
 0x249   : > { %1093 = vmatpush1.bf16.msra.mxu1 %v3818_v61 }
 0x24a   : > { %v962_v49 = vpop.permute.xlu1 %961  ;;  %v954_v29 = vpack.c.bf16 %v952_v32, %v950_v13  ;;  %v953_v39 = vpack.c.bf16 %v951_v36, %v949_v59  ;;  %v1003_v13 = vmul.f32 %v3083_v38, %v991_v23  ;;  %v1004_v36 = vmul.f32 %v3086_v31, %v993_v24  ;;  %v3118_v32 = vld [vmem:[%s3814_s2 + $0x10] ss:$0 sm:$0xff]  ;;  %v2154_v23 = vld [vmem:[%s3746_s5] ss:$8 sps:$4 sm:$0xff]  }
 0x24b   : > { %v965_v53 = vsel %vm963_vm6, %v2927_v12, %v962_v49  ;;  %v967_v30 = vsel %vm963_vm6, %v962_v49, %v2927_v12  ;;  %v1014_v12 = vpop.permute.xlu0 %1013  ;;  %v2159_v24 = vld [vmem:[%s3746_s5 + $0x10] ss:$8 sps:$4 sm:$0xff]  }
 0x24c   : > { %v978_v37 = vmul.f32 %v3053_v55, %v965_v53  ;;  %v979_v22 = vmul.f32 %v3059_v33, %v967_v30  ;;  %1094 = vmatprep.subr.bf16.mxu1 %v954_v29  ;;  %v1020_v50 = vsel %vm1017_vm8, %v1014_v12, %v3000_v51 }
 0x24d   : > { %1095 = vmatpush1.bf16.msra.mxu1 %v953_v39 }
 0x24e   : > { %v989_v11 = vpop.permute.xlu1 %988  ;;  %v981_v47 = vpack.c.bf16 %v979_v22, %v977_v57  ;;  %v980_v54 = vpack.c.bf16 %v978_v37, %v976_v34  ;;  %v1031_v34 = vmul.f32 %v3123_v62, %v1020_v50 }
 0x24f   : > { %v992_v46 = vsel %vm990_vm7, %v2941_v25, %v989_v11  ;;  %v994_v59 = vsel %vm990_vm7, %v989_v11, %v2941_v25  ;;  %v1018_v25 = vsel %vm1017_vm8, %v3000_v51, %v1014_v12  ;;  %v2162_v12 = vld [vmem:[%s3819_s17 + $0x4] ss:$8 sps:$4 sm:$0xff]  }
 0x250   : > { %v1005_v60 = vmul.f32 %v3083_v38, %v992_v46  ;;  %v1006_v35 = vmul.f32 %v3086_v31, %v994_v59  ;;  %1096 = vmatprep.subr.bf16.mxu1 %v981_v47  ;;  %v1030_v30 = vmul.f32 %v3118_v32, %v1018_v25 }
 0x251   : > { %1097 = vmatpush1.bf16.msra.mxu1 %v980_v54 }
 0x252   : > { %v1016_v61 = vpop.permute.xlu1 %1015  ;;  %v1008_v49 = vpack.c.bf16 %v1006_v35, %v1004_v36  ;;  %v1007_v29 = vpack.c.bf16 %v1005_v60, %v1003_v13 }
 0x253   : > { %v1019_v39 = vsel %vm1017_vm8, %v3037_v48, %v1016_v61  ;;  %v1021_v53 = vsel %vm1017_vm8, %v1016_v61, %v3037_v48  ;;  %v2157_v48 = vld [vmem:[%s3746_s5 + $0x14] ss:$8 sps:$4 sm:$0xff]  }
 0x254   : > { %v1032_v57 = vmul.f32 %v3118_v32, %v1019_v39  ;;  %v1033_v51 = vmul.f32 %v3123_v62, %v1021_v53  ;;  %1098 = vmatprep.subr.bf16.mxu1 %v1008_v49 }
 0x255   : > { %1099 = vmatpush1.bf16.msra.mxu1 %v1007_v29 }
 0x256   : > { %v1035_v37 = vpack.c.bf16 %v1033_v51, %v1031_v34  ;;  %v1034_v22 = vpack.c.bf16 %v1032_v57, %v1030_v30 }
 0x258   : > { %1100 = vmatprep.subr.bf16.mxu1 %v1035_v37 }
 0x259   : > { %1101 = vmatpush1.bf16.msra.mxu1 %v1034_v22 }
 0x25a   : > { %1406 = vmatprep.subr.bf16.mxu1 %v2723_v1  ;;  %v2160_v1 = vld [vmem:[%s3819_s17] ss:$8 sps:$4 sm:$0xff]  }
 0x25c   : > { %1117 = vmatmul.mubr.bf16.vlgmr.msra.gmra.mrb[0].mxu1 %v2154_v23 }
 0x25d   : > { %1407 = vmatpush1.bf16.msra.mxu1 %v2726_v2  ;;  %1999 = vmatprep.mubr.msk.bf16.mxu1 %vm761_vm0, %v2157_v48  ;;  %v3820_v2 = vmov 0  }
 0x25e   : > { %1408 = vmatprep.subr.bf16.mxu1 %v2730_v3 }
 0x261   : > { %1409 = vmatpush1.bf16.msra.mxu1 %v2734_v4 }
 0x262   : > { %1410 = vmatprep.subr.bf16.mxu1 %v2738_v5 }
 0x264   : > { %1127 = vmatmul.mubr.bf16.gmra.mrb[4].mxu1 %v2159_v24 }
 0x265   : > { %1411 = vmatpush1.bf16.msra.mxu1 %v2742_v6  ;;  %2005 = vmatprep.mubr.msk.bf16.mxu1 %vm761_vm0, %v2162_v12 }
 0x266   : > { %1412 = vmatprep.subr.bf16.mxu1 %v2746_v7 }
 0x269   : > { %1413 = vmatpush1.bf16.msra.mxu1 %v2750_v8 }
 0x26a   : > { %1414 = vmatprep.subr.bf16.mxu1 %v2754_v9 }
 0x26d   : > { %1415 = vmatpush1.bf16.msra.mxu1 %v2757_v10 }
 0x26e   : > { %1416 = vmatprep.subr.bf16.mxu1 %v2766_v14 }
 0x271   : > { %1417 = vmatpush1.bf16.msra.mxu1 %v2773_v15 }
 0x272   : > { %1418 = vmatprep.subr.bf16.mxu1 %v2777_v16 }
 0x275   : > { %1419 = vmatpush1.bf16.msra.mxu1 %v2781_v17 }
 0x276   : > { %1420 = vmatprep.subr.bf16.mxu1 %v2785_v18 }
 0x279   : > { %1421 = vmatpush1.bf16.msra.mxu1 %v2789_v19 }
 0x27a   : > { %1422 = vmatprep.subr.bf16.mxu1 %v2793_v20  ;;  %v813_v20 = vld [vmem:[%s3747_s6 + $0x8] sm:$0xff] }
 0x27d   : > { %1423 = vmatpush1.bf16.msra.mxu1 %v2797_v21  ;;  %v1382_v21 = vld [vmem:[%s3816_s30] sm:$0xff] }
 0x280   : > { %1439 = vmatmul.mubr.bf16.vlgmr.msra.gmra.mrb[8].mxu1 %v2160_v1 }
 0x281   : > { %1760 = vmatprep.mubr.bf16.mxu1 %v3820_v2 }
 0x284   : > { %v617_v3 = vpop.xlane.xlu0 %616 }
 0x285   : > { %v622_v4 = vmul.f32 0.00390625, %v617_v3 }
 0x287   : > { %v624_v5 = vsub.f32 %v2886_v40, %v622_v4  ;;  %v625_v6 = vsub.f32 %v2888_v41, %v622_v4 }
 0x289   : > { %v628_v7 = vmul.f32 %v624_v5, %v624_v5  ;;  %v629_v8 = vmul.f32 %v625_v6, %v625_v6 }
 0x28b   : > { %v632_v9 = vadd.f32 %v629_v8, %v628_v7 }
 0x28d   : > { %633 = vadd.xlane.f32.xlu0 %v632_v9 }
 0x291   : > { %v620_v10 = vpop.xlane.xlu1 %619 }
 0x292   : > { %v623_v14 = vmul.f32 0.00390625, %v620_v10 }
 0x294   : > { %v626_v15 = vsub.f32 %v2892_v43, %v623_v14  ;;  %v627_v16 = vsub.f32 %v2894_v44, %v623_v14 }
 0x295   : > { %v1043_v54 = vpop.permute.xlu1 %1042 }
 0x296   : > { %v630_v17 = vmul.f32 %v626_v15, %v626_v15  ;;  %v631_v18 = vmul.f32 %v627_v16, %v627_v16 }
 0x298   : > { %v635_v19 = vadd.f32 %v631_v18, %v630_v17 }
 0x299   : > { %v1053_v61 = vpop.permute.xlu1 %1052 }
 0x29a   : > { %636 = vadd.xlane.f32.xlu0 %v635_v19 }
 0x29d   : > { %v1058_v1 = vpop.permute.xlu1 %1057 }
 0x2b0   : > { %1047 = vperm.xlu0 %2122, %v813_v20  }
 0x2b4   : > { %1386 = vperm.xlu0 %2122, %v1382_v21  }
 0x31a   : > { %v634_v40 = vpop.xlane.xlu0 %633 }
 0x31b   : > { %v638_v41 = vmul.f32 0.00390625, %v634_v40 }
 0x31d   : > { %v640_v11 = vadd.f32 1e-05, %v638_v41 }
 0x31f   : > { %2173 = vrsqrt.f32 %v640_v11 }
 0x327   : > { %v637_v43 = vpop.xlane.xlu0 %636 }
 0x328   : > { %v639_v47 = vmul.f32 0.00390625, %v637_v43 }
 0x329   : > { %v2174_v50 = vpop.eup %2173 }
 0x32a   : > { %v641_v44 = vadd.f32 1e-05, %v639_v47  ;;  %v3187_v34 = vmul.f32 %v2174_v50, %v624_v5  ;;  %v3189_v57 = vmul.f32 %v2174_v50, %v625_v6 }
 0x32c   : > { %2175 = vrsqrt.f32 %v641_v44 }
 0x32f   : > { %v1118_v46 = vpop.f32.mrb[0].mxu1  ;;  %v1048_v35 = vpop.permute.xlu0 %1047 }
 0x330   : > { %v1119_v59 = vadd.f32 %v1118_v46, %v1043_v54  ;;  %v1120_v13 = vpop.f32.mrb[1].mxu1 }
 0x331   : > { %v1121_v36 = vadd.f32 %v1120_v13, %v1043_v54  ;;  %v1122_v60 = vpop.f32.mrb[2].mxu1 }
 0x332   : > { %v1124_v25 = vpop.f32.mrb[3].mxu1  ;;  %v1123_v49 = vadd.f32 %v1122_v60, %v1048_v35  ;;  %v1137_v29 = vadd.f32 1.0, %v1119_v59 }
 0x333   : > { %v1138_v39 = vadd.f32 1.0, %v1121_v36  ;;  %v1125_v53 = vadd.f32 %v1124_v25, %v1048_v35  ;;  %v1387_v36 = vpop.permute.xlu0 %1386  ;;  %v1392_v35 = vpop.permute.xlu1 %1391  ;;  %v2163_v25 = vld [vmem:[#allocation7 + $0x4] ss:$8 sps:$4 sm:$0xff]  }
 0x334   : > { %v1139_v37 = vadd.f32 1.0, %v1123_v49  ;;  %v1141_v48 = vmul.f32 %v1137_v29, %v3187_v34  ;;  %2002 = vmatprep.mubr.msk.bf16.mxu0 %vm761_vm0, %v2163_v25 }
 0x335   : > { %v1142_v2 = vmul.f32 %v1138_v39, %v3189_v57  ;;  %v1140_v4 = vadd.f32 1.0, %v1125_v53 }
 0x336   : > { %v2176_v30 = vpop.eup %2175 }
 0x337   : > { %v3191_v51 = vmul.f32 %v2176_v30, %v626_v15  ;;  %v3193_v22 = vmul.f32 %v2176_v30, %v627_v16  ;;  %v1128_v23 = vpop.f32.mrb[4].mxu1 }
 0x338   : > { %v1129_v24 = vadd.f32 %v1128_v23, %v1053_v61  ;;  %v1130_v12 = vpop.f32.mrb[5].mxu1 }
 0x339   : > { %v1143_v3 = vmul.f32 %v1139_v37, %v3191_v51  ;;  %v1131_v5 = vadd.f32 %v1130_v12, %v1053_v61  ;;  %v1132_v7 = vpop.f32.mrb[6].mxu1  ;;  %v1144_v10 = vmul.f32 %v1140_v4, %v3193_v22 }
 0x33a   : > { %v1145_v6 = vadd.f32 %v1141_v48, %v1129_v24  ;;  %v1133_v8 = vadd.f32 %v1132_v7, %v1058_v1  ;;  %v1134_v9 = vpop.f32.mrb[7].mxu1 }
 0x33b   : > { %v1146_v14 = vadd.f32 %v1142_v2, %v1131_v5  ;;  %v1135_v15 = vadd.f32 %v1134_v9, %v1058_v1 }
 0x33c   : > { %vm1149_vm9 = vcmp.gt.f32.partialorder %v1145_v6, 0.0  ;;  %v1153_v16 = vmul.f32 0.2, %v1145_v6  ;;  %v1147_v17 = vadd.f32 %v1143_v3, %v1133_v8 }
 0x33d   : > { %v1154_v18 = vmul.f32 0.2, %v1146_v14  ;;  %v1148_v19 = vadd.f32 %v1144_v10, %v1135_v15  ;;  %vm1150_vm10 = vcmp.gt.f32.partialorder %v1146_v14, 0.0 }
 0x33e   : > { %v3199_v20 = vsel %vm1149_vm9, %v1145_v6, %v1153_v16  ;;  %vm1151_vm11 = vcmp.gt.f32.partialorder %v1147_v17, 0.0  ;;  %v1155_v21 = vmul.f32 0.2, %v1147_v17 }
 0x33f   : > { %vm1152_vm12 = vcmp.gt.f32.partialorder %v1148_v19, 0.0  ;;  %v1156_v40 = vmul.f32 0.2, %v1148_v19  ;;  %1163 = vrot.lane.b32.xlu0 %v3199_v20, %s2407_s29  ;;  %v3205_v11 = vsel %vm1150_vm10, %v1146_v14, %v1154_v18 }
 0x340   : > { %v3203_v41 = vsel %vm1151_vm11, %v1147_v17, %v1155_v21 }
 0x341   : > { %v3207_v43 = vsel %vm1152_vm12, %v1148_v19, %v1156_v40  ;;  %1165 = vrot.lane.b32.xlu1 %v3203_v41, %s2407_s29  ;;  %v1235_v47 = vpack.c.bf16 %v3203_v41, %v3199_v20 }
 0x342   : > { %v1236_v44 = vpack.c.bf16 %v3207_v43, %v3205_v11 }
 0x343   : > { %1181 = vrot.lane.b32.xlu0 %v3199_v20, %s3778_s8 }
 0x345   : > { %1183 = vrot.lane.b32.xlu1 %v3203_v41, %s3778_s8 }
 0x347   : > { %1199 = vrot.lane.b32.xlu0 %v3199_v20, %s2408_s23 }
 0x349   : > { %1201 = vrot.lane.b32.xlu1 %v3203_v41, %s2408_s23 }
 0x34b   : > { %1217 = vrot.lane.b32.xlu0 %v3199_v20, %s2409_s16 }
 0x34d   : > { %1219 = vrot.lane.b32.xlu1 %v3203_v41, %s2409_s16 }
 0x34f   : > { %1237 = vrot.lane.b32.xlu0 %v3199_v20, %s3821_s28 }
 0x351   : > { %1239 = vrot.lane.b32.xlu1 %v3203_v41, %s3821_s28 }
 0x353   : > { %v1440_v54 = vpop.f32.mrb[8].mxu1  ;;  %1255 = vrot.lane.b32.xlu0 %v3199_v20, %s2411_s18 }
 0x354   : > { %v1442_v46 = vpop.f32.mrb[9].mxu1  ;;  %v1441_v60 = vadd.f32 %v1440_v54, %v1387_v36 }
 0x355   : > { %v1444_v59 = vpop.f32.mrb[10].mxu1  ;;  %1257 = vrot.lane.b32.xlu1 %v3203_v41, %s2411_s18  ;;  %v1443_v29 = vadd.f32 %v1442_v46, %v1387_v36 }
 0x356   : > { %v1446_v13 = vpop.f32.mrb[11].mxu1  ;;  %v1445_v50 = vadd.f32 %v1444_v59, %v1392_v35  ;;  %v3274_v61 = vmax.f32 %v1441_v60, 0.0 }
 0x357   : > { %1273 = vrot.lane.b32.xlu0 %v3199_v20, %s2412_s9  ;;  %v1447_v39 = vadd.f32 %v1446_v13, %v1392_v35  ;;  %v3306_v53 = vmax.f32 %v1443_v29, 0.0  ;;  %v3825_v35 = vld [vmem:[#allocation20_spill] sm:$0xff] }
 0x358   : > { %v3278_v49 = vmax.f32 %v1445_v50, 0.0 }
 0x359   : > { %1275 = vrot.lane.b32.xlu1 %v3203_v41, %s2412_s9  ;;  %v3310_v30 = vmax.f32 %v1447_v39, 0.0 }
 0x35b   : > { %1291 = vrot.lane.b32.xlu0 %v3199_v20, %s3822_s14 }
 0x35d   : > { %1293 = vrot.lane.b32.xlu1 %v3203_v41, %s3822_s14 }
 0x35f   : > { %1167 = vrot.lane.b32.xlu0 %v3205_v11, %s2407_s29 }
 0x361   : > { %1169 = vrot.lane.b32.xlu1 %v3207_v43, %s2407_s29 }
 0x363   : > { %1185 = vrot.lane.b32.xlu0 %v3205_v11, %s3778_s8 }
 0x365   : > { %1187 = vrot.lane.b32.xlu1 %v3207_v43, %s3778_s8 }
 0x367   : > { %1203 = vrot.lane.b32.xlu0 %v3205_v11, %s2408_s23 }
 0x369   : > { %1205 = vrot.lane.b32.xlu1 %v3207_v43, %s2408_s23 }
 0x36b   : > { %1221 = vrot.lane.b32.xlu0 %v3205_v11, %s2409_s16 }
 0x36d   : > { %1223 = vrot.lane.b32.xlu1 %v3207_v43, %s2409_s16 }
 0x36f   : > { %1241 = vrot.lane.b32.xlu0 %v3205_v11, %s3821_s28 }
 0x371   : > { %1243 = vrot.lane.b32.xlu1 %v3207_v43, %s3821_s28 }
 0x373   : > { %1259 = vrot.lane.b32.xlu0 %v3205_v11, %s2411_s18 }
 0x375   : > { %1261 = vrot.lane.b32.xlu1 %v3207_v43, %s2411_s18 }
 0x377   : > { %1277 = vrot.lane.b32.xlu0 %v3205_v11, %s2412_s9 }
 0x379   : > { %1279 = vrot.lane.b32.xlu1 %v3207_v43, %s2412_s9 }
 0x37b   : > { %1295 = vrot.lane.b32.xlu0 %v3205_v11, %s3822_s14 }
 0x37d   : > { %1297 = vrot.lane.b32.xlu1 %v3207_v43, %s3822_s14 }
 0x37f   : > { %1457 = vrot.lane.b32.xlu0 %v3274_v61, %s2407_s29 }
 0x381   : > { %1459 = vrot.lane.b32.xlu1 %v3278_v49, %s2407_s29 }
 0x383   : > { %1475 = vrot.lane.b32.xlu0 %v3274_v61, %s3778_s8 }
 0x385   : > { %1477 = vrot.lane.b32.xlu1 %v3278_v49, %s3778_s8 }
 0x387   : > { %1493 = vrot.lane.b32.xlu0 %v3274_v61, %s2408_s23 }
 0x389   : > { %1495 = vrot.lane.b32.xlu1 %v3278_v49, %s2408_s23 }
 0x38b   : > { %1511 = vrot.lane.b32.xlu0 %v3274_v61, %s2409_s16 }
 0x38d   : > { %1513 = vrot.lane.b32.xlu1 %v3278_v49, %s2409_s16 }
 0x38f   : > { %1531 = vrot.lane.b32.xlu0 %v3274_v61, %s3821_s28 }
 0x391   : > { %1533 = vrot.lane.b32.xlu1 %v3278_v49, %s3821_s28 }
 0x393   : > { %1549 = vrot.lane.b32.xlu0 %v3274_v61, %s2411_s18 }
 0x395   : > { %1551 = vrot.lane.b32.xlu1 %v3278_v49, %s2411_s18 }
 0x397   : > { %1567 = vrot.lane.b32.xlu0 %v3274_v61, %s2412_s9 }
 0x399   : > { %1569 = vrot.lane.b32.xlu1 %v3278_v49, %s2412_s9 }
 0x39b   : > { %1461 = vrot.lane.b32.xlu0 %v3306_v53, %s2407_s29 }
 0x39d   : > { %1463 = vrot.lane.b32.xlu1 %v3310_v30, %s2407_s29  ;;  %s3824_s29 = sld [smem:[#allocation25_spill]] }
 0x39f   : > { %1479 = vrot.lane.b32.xlu0 %v3306_v53, %s3778_s8 }
 0x3a1   : > { %1481 = vrot.lane.b32.xlu1 %v3310_v30, %s3778_s8 }
 0x3a3   : > { %1497 = vrot.lane.b32.xlu0 %v3306_v53, %s2408_s23  ;;  %v1161_v10 = vld [vmem:[%s3824_s29] sm:$0xff]  ;;  %v1162_v15 = vld [vmem:[%s3824_s29 + $0x8] sm:$0xff] }
 0x3a5   : > { %1499 = vrot.lane.b32.xlu1 %v3310_v30, %s2408_s23 }
 0x3a7   : > { %1515 = vrot.lane.b32.xlu0 %v3306_v53, %s2409_s16 }
 0x3a9   : > { %1517 = vrot.lane.b32.xlu1 %v3310_v30, %s2409_s16  ;;  %s3823_s16 = sld [smem:[#allocation28_spill]] }
 0x3ab   : > { %1585 = vrot.lane.b32.xlu0 %v3274_v61, %s3822_s14 }
 0x3ad   : > { %1587 = vrot.lane.b32.xlu1 %v3278_v49, %s3822_s14 }
 0x3af   : > { %1535 = vrot.lane.b32.xlu0 %v3306_v53, %s3821_s28  ;;  %v1453_v2 = vld [vmem:[%s3823_s16] sm:$0xff]  ;;  %v1454_v4 = vld [vmem:[%s3823_s16 + $0x8] sm:$0xff]  ;;  %v1455_v7 = vld [vmem:[%s3823_s16 + $0x10] sm:$0xff] }
 0x3b0   : > { %v1456_v8 = vld [vmem:[%s3823_s16 + $0x18] sm:$0xff] }
 0x3b1   : > { %1537 = vrot.lane.b32.xlu1 %v3310_v30, %s3821_s28  ;;  %v1164_v37 = vpop.permute.xlu0 %1163 }
 0x3b3   : > { %v1166_v23 = vpop.permute.xlu1 %1165  ;;  %1553 = vrot.lane.b32.xlu0 %v3306_v53, %s2411_s18 }
 0x3b5   : > { %1555 = vrot.lane.b32.xlu1 %v3310_v30, %s2411_s18  ;;  %v1182_v48 = vpop.permute.xlu0 %1181 }
 0x3b7   : > { %v1184_v24 = vpop.permute.xlu1 %1183  ;;  %1571 = vrot.lane.b32.xlu0 %v3306_v53, %s2412_s9 }
 0x3b9   : > { %1573 = vrot.lane.b32.xlu1 %v3310_v30, %s2412_s9  ;;  %v1200_v12 = vpop.permute.xlu0 %1199  ;;  %s3633_s9 = scalar_lea.vmem [#allocation10], %s3777_s25  ;;  %s3827_s25 = sld [smem:[#allocation30_spill]] }
 0x3ba   : > { %s1794_s28 = sshll.u32 %s3633_s9, 4  ;;  %s3648_s28 = int_to_ptr.vmem [resolvable:$true] %s1794_s28 }
 0x3bb   : > { %v1202_v1 = vpop.permute.xlu1 %1201  ;;  %1589 = vrot.lane.b32.xlu0 %v3306_v53, %s3822_s14  ;;  %s2291_s1 = scalar_lea.vmem %s3648_s28, 512 }
 0x3bc   : > { %p2292_p3 = scmp.ne.s32.totalorder %s3648_s28, %s2291_s1 }
 0x3bd   : > { %1591 = vrot.lane.b32.xlu1 %v3310_v30, %s3822_s14  ;;  %v1218_v3 = vpop.permute.xlu0 %1217  ;;  %s3780_s14 = sshll.u32 %s2518_s22, 9 }
 0x3be   : > { %p2293_p7 = pnand %p2292_p3, %p2651_p5 }
 0x3bf   : > { %v3354_v5 = vpop.permute.xlu1 %1219  ;;  %1609 = vperm.xlu0 %2122, %v1453_v2   ;;  %s3656_s8 = scalar_lea.hbm %s3827_s25, %s3780_s14 }
 0x3c0   : > { %p2294_p12 = pneg %p2293_p7 }
 0x3c1   : > { %1614 = vperm.xlu1 %2123, %v1454_v4   ;;  %v3359_v6 = vpop.permute.xlu0 %1237 }
 0x3c3   : > { %v3364_v9 = vpop.permute.xlu1 %1239  ;;  %1619 = vperm.xlu0 %2122, %v1455_v7  }
 0x3c5   : > { %1624 = vperm.xlu1 %2123, %v1456_v8   ;;  %v3369_v14 = vpop.permute.xlu0 %1255 }
 0x3c7   : > { %v3374_v16 = vpop.permute.xlu1 %1257  ;;  %1313 = vperm.xlu0 %2122, %v1161_v10  }
 0x3c9   : > { %1318 = vperm.xlu1 %2123, %v1162_v15   ;;  %v3376_v17 = vpop.permute.xlu0 %1273 }
 0x3cb   : > { %v3378_v18 = vpop.permute.xlu1 %1275 }
 0x3cd   : > { %v3380_v19 = vpop.permute.xlu0 %1291 }
 0x3cf   : > { %v3382_v21 = vpop.permute.xlu1 %1293 }
 0x3d1   : > { %v1168_v40 = vpop.permute.xlu0 %1167 }
 0x3d2   : > { %v1171_v54 = vsel %vm826_vm1, %v1164_v37, %v1168_v40  ;;  %v1173_v46 = vsel %vm826_vm1, %v1168_v40, %v1164_v37 }
 0x3d3   : > { %v1170_v59 = vpop.permute.xlu1 %1169  ;;  %v1175_v60 = vmul.f32 %v1173_v46, %v2945_v27  ;;  %v1176_v25 = vmul.f32 %v1171_v54, %v3825_v35 }
 0x3d4   : > { %v1172_v13 = vsel %vm826_vm1, %v1166_v23, %v1170_v59  ;;  %v1174_v36 = vsel %vm826_vm1, %v1170_v59, %v1166_v23 }
 0x3d5   : > { %v1177_v50 = vmul.f32 %v1174_v36, %v2945_v27  ;;  %v1178_v29 = vmul.f32 %v1172_v13, %v3825_v35  ;;  %v1186_v39 = vpop.permute.xlu0 %1185 }
 0x3d6   : > { %v1189_v2 = vsel %vm853_vm2, %v1182_v48, %v1186_v39  ;;  %v1191_v37 = vsel %vm853_vm2, %v1186_v39, %v1182_v48 }
 0x3d7   : > { %v1179_v4 = vpack.c.bf16 %v1177_v50, %v1175_v60  ;;  %v1188_v7 = vpop.permute.xlu1 %1187  ;;  %v1180_v8 = vpack.c.bf16 %v1178_v29, %v1176_v25  ;;  %v1193_v15 = vmul.f32 %v1191_v37, %v2960_v45  ;;  %v1194_v40 = vmul.f32 %v1189_v2, %v2963_v52 }
 0x3d8   : > { %v1190_v23 = vsel %vm853_vm2, %v1184_v24, %v1188_v7  ;;  %v1192_v10 = vsel %vm853_vm2, %v1188_v7, %v1184_v24 }
 0x3d9   : > { %v1195_v54 = vmul.f32 %v1192_v10, %v2960_v45  ;;  %v1196_v46 = vmul.f32 %v1190_v23, %v2963_v52  ;;  %1333 = vmatprep.subr.bf16.mxu0 %v1180_v8  ;;  %v1204_v59 = vpop.permute.xlu0 %1203 }
 0x3da   : > { %v1207_v48 = vsel %vm880_vm3, %v1200_v12, %v1204_v59  ;;  %v1209_v13 = vsel %vm880_vm3, %v1204_v59, %v1200_v12  ;;  %1334 = vmatpush1.bf16.msra.mxu0 %v1179_v4 }
 0x3db   : > { %v1197_v36 = vpack.c.bf16 %v1195_v54, %v1193_v15  ;;  %v1206_v60 = vpop.permute.xlu1 %1205  ;;  %v1198_v24 = vpack.c.bf16 %v1196_v46, %v1194_v40  ;;  %v1211_v29 = vmul.f32 %v1209_v13, %v2979_v0  ;;  %v1212_v39 = vmul.f32 %v1207_v48, %v2982_v56 }
 0x3dc   : > { %v1208_v25 = vsel %vm880_vm3, %v1202_v1, %v1206_v60  ;;  %v1210_v50 = vsel %vm880_vm3, %v1206_v60, %v1202_v1 }
 0x3dd   : > { %v1213_v2 = vmul.f32 %v1210_v50, %v2979_v0  ;;  %v1214_v37 = vmul.f32 %v1208_v25, %v2982_v56  ;;  %1335 = vmatprep.subr.bf16.mxu0 %v1198_v24  ;;  %v1222_v12 = vpop.permute.xlu0 %1221 }
 0x3de   : > { %v1225_v4 = vsel %vm907_vm4, %v1218_v3, %v1222_v12  ;;  %v1227_v7 = vsel %vm907_vm4, %v1222_v12, %v1218_v3  ;;  %1336 = vmatpush1.bf16.msra.mxu0 %v1197_v36 }
 0x3df   : > { %v1215_v8 = vpack.c.bf16 %v1213_v2, %v1211_v29  ;;  %v1224_v23 = vpop.permute.xlu1 %1223  ;;  %v1216_v1 = vpack.c.bf16 %v1214_v37, %v1212_v39  ;;  %v1229_v40 = vmul.f32 %v1227_v7, %v3003_v26  ;;  %v1230_v54 = vmul.f32 %v1225_v4, %v3006_v42 }
 0x3e0   : > { %v1226_v10 = vsel %vm907_vm4, %v3354_v5, %v1224_v23  ;;  %v1228_v15 = vsel %vm907_vm4, %v1224_v23, %v3354_v5 }
 0x3e1   : > { %v1231_v46 = vmul.f32 %v1228_v15, %v3003_v26  ;;  %v1232_v3 = vmul.f32 %v1226_v10, %v3006_v42  ;;  %1337 = vmatprep.subr.bf16.mxu0 %v1216_v1  ;;  %v1242_v59 = vpop.permute.xlu0 %1241 }
 0x3e2   : > { %1338 = vmatpush1.bf16.msra.mxu0 %v1215_v8  ;;  %v1247_v60 = vsel %vm936_vm5, %v1242_v59, %v3359_v6  ;;  %v1245_v29 = vsel %vm936_vm5, %v3359_v6, %v1242_v59 }
 0x3e3   : > { %v1233_v48 = vpack.c.bf16 %v1231_v46, %v1229_v40  ;;  %v1244_v13 = vpop.permute.xlu1 %1243  ;;  %v1234_v36 = vpack.c.bf16 %v1232_v3, %v1230_v54  ;;  %v1250_v39 = vmul.f32 %v1247_v60, %v3043_v28  ;;  %v1249_v11 = vmul.f32 %v1245_v29, %v3040_v58 }
 0x3e4   : > { %v1248_v5 = vsel %vm936_vm5, %v1244_v13, %v3364_v9  ;;  %v1246_v24 = vsel %vm936_vm5, %v3364_v9, %v1244_v13 }
 0x3e5   : > { %v1252_v25 = vmul.f32 %v1248_v5, %v3043_v28  ;;  %1339 = vmatprep.subr.bf16.mxu0 %v1234_v36  ;;  %v1260_v50 = vpop.permute.xlu0 %1259  ;;  %v1251_v37 = vmul.f32 %v1246_v24, %v3040_v58 }
 0x3e6   : > { %1340 = vmatpush1.bf16.msra.mxu0 %v1233_v48  ;;  %v1265_v9 = vsel %vm963_vm6, %v1260_v50, %v3369_v14  ;;  %v1263_v43 = vsel %vm963_vm6, %v3369_v14, %v1260_v50 }
 0x3e7   : > { %v1262_v2 = vpop.permute.xlu1 %1261  ;;  %1341 = vmatprep.subr.bf16.mxu0 %v1236_v44  ;;  %v1254_v8 = vpack.c.bf16 %v1252_v25, %v1250_v39  ;;  %v1268_v44 = vmul.f32 %v1265_v9, %v3059_v33  ;;  %v1253_v1 = vpack.c.bf16 %v1251_v37, %v1249_v11  ;;  %v1267_v40 = vmul.f32 %v1263_v43, %v3053_v55 }
 0x3e8   : > { %v1266_v12 = vsel %vm963_vm6, %v1262_v2, %v3374_v16  ;;  %v1264_v6 = vsel %vm963_vm6, %v3374_v16, %v1262_v2 }
 0x3e9   : > { %v1270_v4 = vmul.f32 %v1266_v12, %v3059_v33  ;;  %v1278_v7 = vpop.permute.xlu0 %1277  ;;  %v1269_v16 = vmul.f32 %v1264_v6, %v3053_v55 }
 0x3ea   : > { %1342 = vmatpush1.bf16.msra.mxu0 %v1235_v47  ;;  %v1283_v10 = vsel %vm990_vm7, %v1278_v7, %v3376_v17  ;;  %v1281_v54 = vsel %vm990_vm7, %v3376_v17, %v1278_v7  ;;  %v2165_v7 = vld [vmem:[#allocation7] ss:$8 sps:$4 sm:$0xff]  }
 0x3eb   : > { %v1280_v23 = vpop.permute.xlu1 %1279  ;;  %1343 = vmatprep.subr.bf16.mxu0 %v1254_v8  ;;  %v1272_v15 = vpack.c.bf16 %v1270_v4, %v1268_v44  ;;  %v1286_v46 = vmul.f32 %v1283_v10, %v3086_v31  ;;  %v1271_v59 = vpack.c.bf16 %v1269_v16, %v1267_v40  ;;  %v1285_v24 = vmul.f32 %v1281_v54, %v3083_v38  ;;  %v2166_v8 = vld [vmem:[#allocation8 + $0x4] ss:$8 sps:$4 sm:$0xff]  }
 0x3ec   : > { %v1284_v20 = vsel %vm990_vm7, %v1280_v23, %v3378_v18  ;;  %v1282_v41 = vsel %vm990_vm7, %v3378_v18, %v1280_v23 }
 0x3ed   : > { %v1288_v47 = vmul.f32 %v1284_v20, %v3086_v31  ;;  %v1296_v14 = vpop.permute.xlu0 %1295  ;;  %v1287_v48 = vmul.f32 %v1282_v41, %v3083_v38 }
 0x3ee   : > { %1344 = vmatpush1.bf16.msra.mxu0 %v1253_v1  ;;  %v1301_v18 = vsel %vm1017_vm8, %v1296_v14, %v3380_v19  ;;  %v1299_v25 = vsel %vm1017_vm8, %v3380_v19, %v1296_v14 }
 0x3ef   : > { %v1298_v3 = vpop.permute.xlu1 %1297  ;;  %1345 = vmatprep.subr.bf16.mxu0 %v1272_v15  ;;  %v1290_v5 = vpack.c.bf16 %v1288_v47, %v1286_v46  ;;  %v1304_v50 = vmul.f32 %v3123_v62, %v1301_v18  ;;  %v1289_v39 = vpack.c.bf16 %v1287_v48, %v1285_v24  ;;  %v1303_v9 = vmul.f32 %v3118_v32, %v1299_v25 }
 0x3f0   : > { %v1302_v13 = vsel %vm1017_vm8, %v1298_v3, %v3382_v21  ;;  %v1300_v36 = vsel %vm1017_vm8, %v3382_v21, %v1298_v3 }
 0x3f1   : > { %v1306_v17 = vmul.f32 %v3123_v62, %v1302_v13  ;;  %v1458_v60 = vpop.permute.xlu0 %1457  ;;  %v1305_v2 = vmul.f32 %v3118_v32, %v1300_v36 }
 0x3f2   : > { %1346 = vmatpush1.bf16.msra.mxu0 %v1271_v59 }
 0x3f3   : > { %v1460_v29 = vpop.permute.xlu1 %1459  ;;  %1347 = vmatprep.subr.bf16.mxu0 %v1290_v5  ;;  %v1308_v21 = vpack.c.bf16 %v1306_v17, %v1304_v50  ;;  %v1307_v6 = vpack.c.bf16 %v1305_v2, %v1303_v9 }
 0x3f5   : > { %v1476_v37 = vpop.permute.xlu0 %1475 }
 0x3f6   : > { %1348 = vmatpush1.bf16.msra.mxu0 %v1289_v39 }
 0x3f7   : > { %v1478_v12 = vpop.permute.xlu1 %1477  ;;  %1349 = vmatprep.subr.bf16.mxu0 %v1308_v21 }
 0x3f9   : > { %v1494_v4 = vpop.permute.xlu0 %1493 }
 0x3fa   : > { %1350 = vmatpush1.bf16.msra.mxu0 %v1307_v6 }
 0x3fb   : > { %v1496_v19 = vpop.permute.xlu1 %1495 }
 0x3fd   : > { %1366 = vmatmul.mubr.bf16.vlgmr.msra.gmra.mrb[4].mxu0 %v2165_v7  ;;  %v1512_v11 = vpop.permute.xlu0 %1511 }
 0x3fe   : > { %2010 = vmatprep.mubr.msk.bf16.mxu0 %vm761_vm0, %v2166_v8 }
 0x3ff   : > { %v1514_v43 = vpop.permute.xlu1 %1513 }
 0x401   : > { %v3505_v44 = vpop.permute.xlu0 %1531 }
 0x403   : > { %v3507_v23 = vpop.permute.xlu1 %1533 }
 0x405   : > { %v3509_v1 = vpop.permute.xlu0 %1549 }
 0x407   : > { %v3511_v16 = vpop.permute.xlu1 %1551 }
 0x409   : > { %v3513_v10 = vpop.permute.xlu0 %1567 }
 0x40b   : > { %v3515_v20 = vpop.permute.xlu1 %1569 }
 0x40d   : > { %v1462_v41 = vpop.permute.xlu0 %1461 }
 0x40e   : > { %v1465_v47 = vsel %vm826_vm1, %v1458_v60, %v1462_v41  ;;  %v1467_v14 = vsel %vm826_vm1, %v1462_v41, %v1458_v60 }
 0x40f   : > { %v1464_v15 = vpop.permute.xlu1 %1463  ;;  %v1469_v46 = vmul.f32 %v1467_v14, %v2945_v27  ;;  %v1470_v3 = vmul.f32 %v1465_v47, %v3825_v35 }
 0x410   : > { %v1466_v40 = vsel %vm826_vm1, %v1460_v29, %v1464_v15  ;;  %v1468_v54 = vsel %vm826_vm1, %v1464_v15, %v1460_v29 }
 0x411   : > { %v1471_v59 = vmul.f32 %v1468_v54, %v2945_v27  ;;  %v1472_v48 = vmul.f32 %v1466_v40, %v3825_v35  ;;  %v1480_v18 = vpop.permute.xlu0 %1479 }
 0x412   : > { %v1483_v13 = vsel %vm853_vm2, %v1476_v37, %v1480_v18  ;;  %v1485_v36 = vsel %vm853_vm2, %v1480_v18, %v1476_v37 }
 0x413   : > { %v1473_v17 = vpack.c.bf16 %v1471_v59, %v1469_v46  ;;  %v1482_v60 = vpop.permute.xlu1 %1481  ;;  %v1474_v5 = vpack.c.bf16 %v1472_v48, %v1470_v3  ;;  %v1487_v27 = vmul.f32 %v1485_v36, %v2960_v45  ;;  %v1488_v35 = vmul.f32 %v1483_v13, %v2963_v52 }
 0x414   : > { %v1484_v24 = vsel %vm853_vm2, %v1478_v12, %v1482_v60  ;;  %v1486_v25 = vsel %vm853_vm2, %v1482_v60, %v1478_v12 }
 0x415   : > { %v1489_v50 = vmul.f32 %v1486_v25, %v2960_v45  ;;  %v1490_v29 = vmul.f32 %v1484_v24, %v2963_v52  ;;  %1651 = vmatprep.subr.bf16.mxu0 %v1474_v5  ;;  %v1498_v39 = vpop.permute.xlu0 %1497 }
 0x416   : > { %v1501_v2 = vsel %vm880_vm3, %v1494_v4, %v1498_v39  ;;  %v1503_v37 = vsel %vm880_vm3, %v1498_v39, %v1494_v4  ;;  %1652 = vmatpush1.bf16.msra.mxu0 %v1473_v17  ;;  %v1530_v17 = vpack.c.bf16 %v3310_v30, %v3306_v53  ;;  %v1529_v53 = vpack.c.bf16 %v3278_v49, %v3274_v61 }
 0x417   : > { %v1491_v21 = vpack.c.bf16 %v1489_v50, %v1487_v27  ;;  %v1500_v9 = vpop.permute.xlu1 %1499  ;;  %v1492_v12 = vpack.c.bf16 %v1490_v29, %v1488_v35  ;;  %v1505_v52 = vmul.f32 %v1503_v37, %v2979_v0  ;;  %v1506_v7 = vmul.f32 %v1501_v2, %v2982_v56 }
 0x418   : > { %v1502_v6 = vsel %vm880_vm3, %v1496_v19, %v1500_v9  ;;  %v1504_v45 = vsel %vm880_vm3, %v1500_v9, %v1496_v19 }
 0x419   : > { %v1507_v8 = vmul.f32 %v1504_v45, %v2979_v0  ;;  %v1508_v41 = vmul.f32 %v1502_v6, %v2982_v56  ;;  %1653 = vmatprep.subr.bf16.mxu0 %v1492_v12  ;;  %v1516_v4 = vpop.permute.xlu0 %1515 }
 0x41a   : > { %v1519_v47 = vsel %vm907_vm4, %v1512_v11, %v1516_v4  ;;  %v1521_v14 = vsel %vm907_vm4, %v1516_v4, %v1512_v11  ;;  %1654 = vmatpush1.bf16.msra.mxu0 %v1491_v21 }
 0x41b   : > { %v1509_v15 = vpack.c.bf16 %v1507_v8, %v1505_v52  ;;  %v1518_v40 = vpop.permute.xlu1 %1517  ;;  %v1510_v19 = vpack.c.bf16 %v1508_v41, %v1506_v7  ;;  %v1523_v56 = vmul.f32 %v1521_v14, %v3003_v26  ;;  %v1524_v46 = vmul.f32 %v1519_v47, %v3006_v42 }
 0x41c   : > { %v1520_v54 = vsel %vm907_vm4, %v1514_v43, %v1518_v40  ;;  %v1522_v0 = vsel %vm907_vm4, %v1518_v40, %v1514_v43 }
 0x41d   : > { %v1525_v3 = vmul.f32 %v1522_v0, %v3003_v26  ;;  %v1526_v59 = vmul.f32 %v1520_v54, %v3006_v42  ;;  %1655 = vmatprep.subr.bf16.mxu0 %v1510_v19  ;;  %v1586_v11 = vpop.permute.xlu0 %1585 }
 0x41e   : > { %1656 = vmatpush1.bf16.msra.mxu0 %v1509_v15 }
 0x41f   : > { %v1527_v48 = vpack.c.bf16 %v1525_v3, %v1523_v56  ;;  %v1588_v18 = vpop.permute.xlu1 %1587  ;;  %v1528_v13 = vpack.c.bf16 %v1526_v59, %v1524_v46  ;;  %v2168_v46 = vld [vmem:[#allocation8] ss:$8 sps:$4 sm:$0xff]   ;;  %v2169_v3 = vld [vmem:[#allocation8 + $0x14] ss:$8 sps:$4 sm:$0xff]  }
 0x421   : > { %1657 = vmatprep.subr.bf16.mxu0 %v1528_v13  ;;  %v1536_v36 = vpop.permute.xlu0 %1535 }
 0x422   : > { %v1539_v43 = vsel %vm936_vm5, %v3505_v44, %v1536_v36  ;;  %v1541_v26 = vsel %vm936_vm5, %v1536_v36, %v3505_v44  ;;  %1658 = vmatpush1.bf16.msra.mxu0 %v1527_v48 }
 0x423   : > { %v1538_v42 = vpop.permute.xlu1 %1537  ;;  %1659 = vmatprep.subr.bf16.mxu0 %v1530_v17  ;;  %v1543_v30 = vmul.f32 %v1539_v43, %v3040_v58  ;;  %v1544_v24 = vmul.f32 %v1541_v26, %v3043_v28 }
 0x424   : > { %v1540_v60 = vsel %vm936_vm5, %v3507_v23, %v1538_v42  ;;  %v1542_v5 = vsel %vm936_vm5, %v1538_v42, %v3507_v23 }
 0x425   : > { %v1545_v44 = vmul.f32 %v1540_v60, %v3040_v58  ;;  %v1546_v25 = vmul.f32 %v1542_v5, %v3043_v28  ;;  %v1554_v27 = vpop.permute.xlu0 %1553 }
 0x426   : > { %v1557_v35 = vsel %vm963_vm6, %v3509_v1, %v1554_v27  ;;  %v1559_v23 = vsel %vm963_vm6, %v1554_v27, %v3509_v1  ;;  %1660 = vmatpush1.bf16.msra.mxu0 %v1529_v53 }
 0x427   : > { %v1547_v50 = vpack.c.bf16 %v1545_v44, %v1543_v30  ;;  %v1556_v61 = vpop.permute.xlu1 %1555  ;;  %v1548_v49 = vpack.c.bf16 %v1546_v25, %v1544_v24  ;;  %v1561_v28 = vmul.f32 %v1557_v35, %v3053_v55  ;;  %v1562_v39 = vmul.f32 %v1559_v23, %v3059_v33 }
 0x428   : > { %v1558_v29 = vsel %vm963_vm6, %v3511_v16, %v1556_v61  ;;  %v1560_v58 = vsel %vm963_vm6, %v1556_v61, %v3511_v16 }
 0x429   : > { %v1563_v2 = vmul.f32 %v1558_v29, %v3053_v55  ;;  %v1564_v1 = vmul.f32 %v1560_v58, %v3059_v33  ;;  %1661 = vmatprep.subr.bf16.mxu0 %v1548_v49  ;;  %v1572_v37 = vpop.permute.xlu0 %1571 }
 0x42a   : > { %v1575_v21 = vsel %vm990_vm7, %v3513_v10, %v1572_v37  ;;  %v1577_v9 = vsel %vm990_vm7, %v1572_v37, %v3513_v10  ;;  %1662 = vmatpush1.bf16.msra.mxu0 %v1547_v50 }
 0x42b   : > { %v1565_v16 = vpack.c.bf16 %v1563_v2, %v1561_v28  ;;  %v1574_v12 = vpop.permute.xlu1 %1573  ;;  %v1566_v6 = vpack.c.bf16 %v1564_v1, %v1562_v39  ;;  %v1579_v45 = vmul.f32 %v1575_v21, %v3083_v38  ;;  %v1580_v52 = vmul.f32 %v1577_v9, %v3086_v31 }
 0x42c   : > { %v1576_v55 = vsel %vm990_vm7, %v3515_v20, %v1574_v12  ;;  %v1578_v33 = vsel %vm990_vm7, %v1574_v12, %v3515_v20 }
 0x42d   : > { %v1581_v7 = vmul.f32 %v1576_v55, %v3083_v38  ;;  %v1582_v10 = vmul.f32 %v1578_v33, %v3086_v31  ;;  %1663 = vmatprep.subr.bf16.mxu0 %v1566_v6  ;;  %v1590_v8 = vpop.permute.xlu0 %1589 }
 0x42e   : > { %v1593_v41 = vsel %vm1017_vm8, %v1586_v11, %v1590_v8  ;;  %v1595_v4 = vsel %vm1017_vm8, %v1590_v8, %v1586_v11  ;;  %1664 = vmatpush1.bf16.msra.mxu0 %v1565_v16 }
 0x42f   : > { %v1583_v47 = vpack.c.bf16 %v1581_v7, %v1579_v45  ;;  %v1592_v14 = vpop.permute.xlu1 %1591  ;;  %v1584_v20 = vpack.c.bf16 %v1582_v10, %v1580_v52  ;;  %v1597_v31 = vmul.f32 %v3118_v32, %v1593_v41  ;;  %v1598_v40 = vmul.f32 %v3123_v62, %v1595_v4 }
 0x430   : > { %v1594_v15 = vsel %vm1017_vm8, %v1588_v18, %v1592_v14  ;;  %v1596_v38 = vsel %vm1017_vm8, %v1592_v14, %v1588_v18 }
 0x431   : > { %v1599_v19 = vmul.f32 %v3118_v32, %v1594_v15  ;;  %v1600_v54 = vmul.f32 %v3123_v62, %v1596_v38  ;;  %1665 = vmatprep.subr.bf16.mxu0 %v1584_v20 }
 0x432   : > { %1666 = vmatpush1.bf16.msra.mxu0 %v1583_v47 }
 0x433   : > { %v1601_v0 = vpack.c.bf16 %v1599_v19, %v1597_v31  ;;  %v1602_v56 = vpack.c.bf16 %v1600_v54, %v1598_v40 }
 0x435   : > { %1667 = vmatprep.subr.bf16.mxu0 %v1602_v56 }
 0x436   : > { %1668 = vmatpush1.bf16.msra.mxu0 %v1601_v0 }
 0x439   : > { %1684 = vmatmul.mubr.bf16.vlgmr.msra.gmra.mrb[8].mxu0 %v2168_v46 }
 0x43a   : > { %2011 = vmatprep.mubr.msk.bf16.mxu0 %vm761_vm0, %v2169_v3 }
 0x43e   : > { %v1610_v59 = vpop.permute.xlu0 %1609 }
 0x440   : > { %v1615_v11 = vpop.permute.xlu1 %1614 }
 0x441   : > { %1694 = vmatmul.mubr.bf16.gmra.mrb[12].mxu0 %v2171_v63 }
 0x442   : > { %v1620_v32 = vpop.permute.xlu0 %1619 }
 0x444   : > { %v1625_v48 = vpop.permute.xlu1 %1624 }
 0x446   : > { %v1314_v62 = vpop.permute.xlu0 %1313 }
 0x448   : > { %v1319_v17 = vpop.permute.xlu1 %1318 }
 0x4d0   : > { %v1367_v18 = vpop.f32.mrb[4].mxu0 }
 0x4d1   : > { %v1368_v13 = vadd.f32 %v1367_v18, %v1314_v62  ;;  %v1369_v36 = vpop.f32.mrb[5].mxu0 }
 0x4d2   : > { %v1370_v43 = vadd.f32 %v1369_v36, %v1314_v62  ;;  %v1371_v26 = vpop.f32.mrb[6].mxu0 }
 0x4d3   : > { %1376 = vst [vmem:[%s3633_s9] sm:$0xff] %v1368_v13  ;;  %v1372_v42 = vadd.f32 %v1371_v26, %v1319_v17  ;;  %v1373_v60 = vpop.f32.mrb[7].mxu0 }
 0x4d4   : > { %1377 = vst [vmem:[%s3633_s9 + $0x8] sm:$0xff] %v1370_v43  ;;  %v1374_v5 = vadd.f32 %v1373_v60, %v1319_v17 }
 0x4d5   : > { %1378 = vst [vmem:[%s3633_s9 + $0x10] sm:$0xff] %v1372_v42 }
 0x4d6   : > { %1379 = vst [vmem:[%s3633_s9 + $0x18] sm:$0xff] %v1374_v5  ;;  %s2295_s9 = sshll.u32 %s2414_s24, 4  ;;  %s2296_s9 = int_to_ptr.vmem [resolvable:$false] %s2295_s9 }
 0x4d7   : > { %s2297_s15 = scalar_lea.vmem %s2296_s9, 1024  ;;  %p2298_p1 = scmp.lt.s32.totalorder %s3648_s28, %s2296_s9 }
 0x4d8   : > { %p2299_p2 = scmp.lt.s32.totalorder %s2297_s15, %s2291_s1 }
 0x4da   : > { %p2300_p4 = por %p2299_p2, %p2298_p1 }
 0x4dc   : > { %p2301_p9 = pnand %p2300_p4, %p2294_p12 }
 0x50c   : > { %v1685_v53 = vpop.f32.mrb[8].mxu0 }
 0x50d   : > { %v1686_v30 = vadd.f32 %v1685_v53, %v1610_v59  ;;  %v1687_v24 = vpop.f32.mrb[9].mxu0 }
 0x50e   : > { %v1688_v44 = vadd.f32 %v1687_v24, %v1610_v59  ;;  %v1689_v25 = vpop.f32.mrb[10].mxu0 }
 0x50f   : > { %v1690_v27 = vadd.f32 %v1689_v25, %v1615_v11  ;;  %v1691_v35 = vpop.f32.mrb[11].mxu0  ;;  %v1704_v50 = vadd.f32 1.0, %v1686_v30 }
 0x510   : > { %v1692_v23 = vadd.f32 %v1691_v35, %v1615_v11  ;;  %v1705_v61 = vadd.f32 1.0, %v1688_v44 }
 0x511   : > { %v1706_v49 = vadd.f32 1.0, %v1690_v27  ;;  %v1708_v28 = vmul.f32 %v1704_v50, %v3187_v34 }
 0x512   : > { %v1707_v29 = vadd.f32 1.0, %v1692_v23  ;;  %v1709_v1 = vmul.f32 %v1705_v61, %v3189_v57 }
 0x513   : > { %v1710_v9 = vmul.f32 %v1706_v49, %v3191_v51  ;;  %v2172_v51 = vld [vmem:[%s3826_s26] sm:$0xff]  }
 0x514   : > { %v1695_v58 = vpop.f32.mrb[12].mxu0  ;;  %v1711_v55 = vmul.f32 %v1707_v29, %v3193_v22 }
 0x515   : > { %v1696_v39 = vadd.f32 %v1695_v58, %v1620_v32  ;;  %v1697_v2 = vpop.f32.mrb[13].mxu0 }
 0x516   : > { %v1698_v37 = vadd.f32 %v1697_v2, %v1620_v32  ;;  %v1699_v21 = vpop.f32.mrb[14].mxu0 }
 0x517   : > { %v1712_v16 = vadd.f32 %v1708_v28, %v1696_v39  ;;  %v1700_v12 = vadd.f32 %v1699_v21, %v1625_v48  ;;  %v1701_v6 = vpop.f32.mrb[15].mxu0 }
 0x518   : > { %v1713_v33 = vadd.f32 %v1709_v1, %v1698_v37  ;;  %v1702_v45 = vadd.f32 %v1701_v6, %v1625_v48 }
 0x519   : > { %v1714_v34 = vadd.f32 %v1710_v9, %v1700_v12 }
 0x51a   : > { %v1715_v52 = vadd.f32 %v1711_v55, %v1702_v45 }
 0x51b   : > { %v1718_v7 = vpack.c.bf16 %v1714_v34, %v1712_v16 }
 0x51c   : > { %v1719_v57 = vpack.c.bf16 %v1715_v52, %v1713_v33 }
 0x51e   : > { %1728 = vmatprep.subr.bf16.mxu1 %v1719_v57 }
 0x51f   : > { %1729 = vmatpush1.bf16.msra.mxu1 %v1718_v7 }
 0x522   : > { %2013 = vmatmul.mubr.msk.bf16.vlgmr.msra.gmra.mrb[12].mxu1 %vm761_vm0, %v2172_v51 }
 0x523   : > { %2304 = shalt.err (!%p2301_p9)
}
 0x524   : > { %s2305_s26 = scalar_lea.hbm %s3656_s8, 512  ;;  %s2309_s24 = scalar_lea.hbm %s3827_s25, 1024 }
 0x525   : > { %p2306_p0 = scmp.ne.s32.totalorder %s3656_s8, %s2305_s26  ;;  %p2310_p13 = scmp.lt.u32.totalorder %s3656_s8, %s3827_s25 }
 0x526   : > { %p2311_p6 = scmp.lt.u32.totalorder %s2309_s24, %s2305_s26  ;;  %p2313_p3 = scmp.lt.u32.totalorder %s2305_s26, %s3656_s8 }
 0x527   : > { %p2307_p11 = pnand %p2306_p0, %p2651_p5 }
 0x528   : > { %p2312_p10 = por %p2311_p6, %p2310_p13 }
 0x529   : > { %p2308_p8 = pneg %p2307_p11 }
 0x52a   : > { %p2314_p7 = por %p2313_p3, %p2312_p10 }
 0x52c   : > { %p2315_p12 = pnand %p2314_p7, %p2308_p8 }
 0x52e   : > { %2318 = shalt.err (!%p2315_p12)
}
 0x52f   : > { %s3781_s1 = smov 256   ;;  %s3828_s15 = smov 16  }
 0x530   : > { %2042 = dma.vmem_to_hbm [thread:$0]  (%p2651_p5), %s3648_s28, 512, %s3656_s8, %s1776_s0, %s3781_s1, %s3781_s1, %s3828_s15  }
 0x531   : > { %s3829_s14 = sshll.u32 %s2702_s27, 5  ;;  %s3830_s18 = sshll.u32 %s2518_s22, 9 }
 0x532   : > { %s582_s26 = scalar_lea.vmem [#allocation11], %s3829_s14  ;;  %s3831_s2 = sld [smem:[#allocation31_spill]] }
 0x533   : > { %s1810_s23 = sshll.u32 %s582_s26, 4  ;;  %s1781_s0 = scalar_lea.sflag [#allocation12], %s2702_s27  ;;  %s3687_s23 = int_to_ptr.vmem [resolvable:$true] %s1810_s23 }
 0x534   : > { %s2319_s8 = scalar_lea.vmem %s3687_s23, 512  ;;  %s2416_s28 = smov [#allocation11]  }
 0x535   : > { %p2320_p1 = scmp.ne.s32.totalorder %s3687_s23, %s2319_s8  ;;  %s2323_s14 = sshll.u32 %s2416_s28, 4  ;;  %s2324_s14 = int_to_ptr.vmem [resolvable:$false] %s2323_s14 }
 0x536   : > { %s2325_s1 = scalar_lea.vmem %s2324_s14, 1024  ;;  %p2326_p9 = scmp.lt.s32.totalorder %s3687_s23, %s2324_s14 }
 0x537   : > { %p2321_p2 = pnand %p2320_p1, %p2651_p5  ;;  %p2327_p0 = scmp.lt.s32.totalorder %s2325_s1, %s2319_s8 }
 0x538   : > { %s3694_s3 = scalar_lea.hbm %s3831_s2, %s3830_s18 }
 0x539   : > { %p2322_p4 = pneg %p2321_p2  ;;  %p2328_p11 = por %p2327_p0, %p2326_p9 }
 0x53b   : > { %p2329_p8 = pnand %p2328_p11, %p2322_p4 }
 0x5f5   : > { %v1762_v22 = vpop.f32.mrb[12].mxu1 }
 0x5f6   : > { %1771 = vst [vmem:[%s582_s26] sm:$0xff] %v1762_v22  ;;  %v1764_v10 = vpop.f32.mrb[13].mxu1 }
 0x5f7   : > { %1772 = vst [vmem:[%s582_s26 + $0x8] sm:$0xff] %v1764_v10  ;;  %v1766_v8 = vpop.f32.mrb[14].mxu1 }
 0x5f8   : > { %1773 = vst [vmem:[%s582_s26 + $0x10] sm:$0xff] %v1766_v8  ;;  %v1768_v41 = vpop.f32.mrb[15].mxu1 }
 0x5f9   : > { %1774 = vst [vmem:[%s582_s26 + $0x18] sm:$0xff] %v1768_v41 }
 0x5fa   : > { %2332 = shalt.err (!%p2329_p8)
}
 0x5fb   : > { %s2333_s22 = scalar_lea.hbm %s3694_s3, 512  ;;  %s2337_s24 = scalar_lea.hbm %s3831_s2, 1024 }
 0x5fc   : > { %p2334_p13 = scmp.ne.s32.totalorder %s3694_s3, %s2333_s22  ;;  %p2338_p3 = scmp.lt.u32.totalorder %s3694_s3, %s3831_s2 }
 0x5fd   : > { %p2339_p7 = scmp.lt.u32.totalorder %s2337_s24, %s2333_s22  ;;  %p2341_p1 = scmp.lt.u32.totalorder %s2333_s22, %s3694_s3 }
 0x5fe   : > { %p2335_p6 = pnand %p2334_p13, %p2651_p5 }
 0x5ff   : > { %p2340_p12 = por %p2339_p7, %p2338_p3 }
 0x600   : > { %p2336_p10 = pneg %p2335_p6 }
 0x601   : > { %p2342_p2 = por %p2341_p1, %p2340_p12 }
 0x603   : > { %p2343_p4 = pnand %p2342_p2, %p2336_p10 }
 0x605   : > { %2346 = shalt.err (!%p2343_p4)
}
 0x606   : > { %s3832_s1 = smov 256  }
 0x607   : > { %2043 = dma.vmem_to_hbm [thread:$0]  (%p2651_p5), %s3687_s23, 512, %s3694_s3, %s1781_s0, %s3832_s1, %s3832_s1, %s3828_s15  }
 0x608 PF: > { %s3833_s8 = sld [smem:[#allocation18_spill]]  ;;  %s3834_s14 = sld [smem:[#allocation19_spill]] }
 0x609   : > { %p3836_p0 = scmp.ge.s32.totalorder %s2397_s21, 2 }
 0x60e   : > { %s1825_s26 = sand.u32 1, %s3833_s8   ;;  %p3835_p9 = scmp.ne.s32.totalorder %s3834_s14, 0 }
 0x60f   : > { %s1826_s22 = scalar_lea.sflag [#allocation4], %s1825_s26 }
 0x610   : > { %p2061_p11 = pnand %p3836_p0, %p3835_p9 }
 0x612   : > { %2376 = dma.done.wait (!%p2061_p11), %s1826_s22, 512  }
 0x613   : > { %2378 = vsyncadd (!%p2061_p11), %s1826_s22, 4294966784  ;;  %s1835_s12 = scalar_lea.sflag [#allocation12], %s1825_s26 }
 0x614   : > { %2380 = dma.done.wait (!%p2061_p11), %s1835_s12, 512  }
 0x615   : > { %2382 = vsyncadd (!%p2061_p11), %s1835_s12, 4294966784  ;;  %p34_p5 = scmp.ge.s32.totalorder %s2637_s13, 4   ;;  %s3837_s18 = smov %s2389_s19 }
 0x616   : > { %s3838_s19 = smov %s2393_s20  ;;  %s3839_s20 = smov %s2647_s10 }
 0x617   : > { %s3840_s21 = smov %s2637_s13  ;;  %36 = sbr.rel (!%p34_p5) target bundleno = 21 (0x15), region = 153 }
 0x61e   :  { %1840 = vsyncpa [#allocation3], 1 }
 0x61f   :  { %1842 = vsyncpa [#allocation3 + $0x1], 1 }
 0x620   :  { %1843 = vsyncpa [#allocation6], 1 }
 0x621   :  { %1844 = vsyncpa [#allocation9], 1 }
 0x622   :  { %1845 = vsyncpa [#allocation4], 1 }
 0x623   :  { %1847 = vsyncpa [#allocation4 + $0x1], 1 }
 0x624   :  { %1848 = vsyncpa [#allocation12], 1 }
 0x625   :  { %1850 = vsyncpa [#allocation12 + $0x1], 1 }

// kernel: tpu_custom_call.1
= control target key start
LH: loop header
LB: loop body
LE: loop exit
PB: predicated region body
PF: predicated region fallthrough
CT: control target
= control target key end

     0   :  { %s3741_s0 = inlined_call_operand.vmem [shape: f32[2,16,256], index: 0, kind: input, shape index: {}]   ;;  %s3742_s1 = inlined_call_operand.hbm [shape: bf16[2,144,256], index: 1, kind: input, shape index: {}]   ;;  %s3743_s2 = inlined_call_operand.vmem [shape: f32[9,256], index: 2, kind: input, shape index: {}]   ;;  %s3744_s3 = inlined_call_operand.hbm [shape: bf16[16,144], index: 3, kind: input, shape index: {}]   ;;  %s3745_s4 = inlined_call_operand.vmem [shape: f32[16,1], index: 4, kind: input, shape index: {}]   ;;  %s3746_s5 = inlined_call_operand.vmem [shape: bf16[32,144], index: 5, kind: input, shape index: {}]   ;;  %s3747_s6 = inlined_call_operand.vmem [shape: f32[32,1], index: 6, kind: input, shape index: {}]   ;;  %s3748_s7 = inlined_call_operand.hbm [shape: bf16[16,144], index: 7, kind: input, shape index: {}]   ;;  %s3749_s8 = inlined_call_operand.vmem [shape: f32[16,1], index: 8, kind: input, shape index: {}]   ;;  %s3750_s9 = inlined_call_operand.vmem [shape: bf16[16,144], index: 9, kind: input, shape index: {}]   ;;  %s3751_s10 = inlined_call_operand.vmem [shape: f32[16,1], index: 10, kind: input, shape index: {}]   ;;  %s3752_s11 = inlined_call_operand.hbm [shape: bf16[32,144], index: 11, kind: input, shape index: {}]   ;;  %s3753_s12 = inlined_call_operand.vmem [shape: f32[32,1], index: 12, kind: input, shape index: {}]   ;;  %s3754_s13 = inlined_call_operand.vmem [shape: bf16[16,16], index: 13, kind: input, shape index: {}]   ;;  %s3755_s14 = inlined_call_operand.hbm [shape: f32[2,16,256], index: 14, kind: output, shape index: {0}]   ;;  %s3756_s15 = inlined_call_operand.hbm [shape: f32[2,16,256], index: 15, kind: output, shape index: {1}]  }
   0x1   :  { %3782 = sst [smem:[#allocation21_spill]] %s3741_s0 }
   0x2   :  { %3783 = sst [smem:[#allocation22_spill]] %s3742_s1 }
   0x3   :  { %3784 = sst [smem:[#allocation23_spill]] %s3743_s2 }
   0x4   :  { %3785 = sst [smem:[#allocation24_spill]] %s3744_s3 }
   0x5   :  { %3786 = sst [smem:[#allocation25_spill]] %s3749_s8 }
   0x6   :  { %3787 = sst [smem:[#allocation26_spill]] %s3750_s9 }
   0x7   :  { %3788 = sst [smem:[#allocation27_spill]] %s3751_s10 }
   0x8   :  { %3789 = sst [smem:[#allocation28_spill]] %s3753_s12 }
   0x9   :  { %3790 = sst [smem:[#allocation29_spill]] %s3754_s13 }
   0xa   :  { %3791 = sst [smem:[#allocation30_spill]] %s3755_s14 }
   0xb   :  { %3792 = sst [smem:[#allocation31_spill]] %s3756_s15 }
   0xc   :  { %21 = vsyncpa [#allocation3], 0 }
   0xd   :  { %23 = vsyncpa [#allocation3 + $0x1], 0 }
   0xe   :  { %24 = vsyncpa [#allocation6], 0 }
   0xf   :  { %25 = vsyncpa [#allocation9], 0 }
  0x10   :  { %26 = vsyncpa [#allocation4], 0 }
  0x11   :  { %28 = vsyncpa [#allocation4 + $0x1], 0 }
  0x12   :  { %29 = vsyncpa [#allocation12], 0 }
  0x13   :  { %31 = vsyncpa [#allocation12 + $0x1], 0  ;;  %s2497_s18 = smov 0   ;;  %s2499_s19 = smov 0  }
  0x14   :  { %s2501_s20 = smov 0   ;;  %s2503_s21 = smov 0  }
  0x15 LB: > { %3793 = sst [smem:[#allocation18_spill]] %s2385_s18  ;;  %s2518_s22 = sadd.s32 4294967295, %s2397_s21   ;;  %s2397_s21 = sphi %s2503_s21, %s3840_s21   ;;  %s2393_s20 = sphi %s2501_s20, %s3839_s20   ;;  %s2389_s19 = sphi %s2499_s19, %s3838_s19   ;;  %s2385_s18 = sphi %s2497_s18, %s3837_s18  }
  0x16   : > { %s1956_s23 = sadd.s32 4294967294, %s2397_s21   ;;  %p83_p0 = scmp.ne.s32.totalorder %s2389_s19, %s2385_s18 }
  0x17   : > { %p3761_p1 = scmp.eq.s32.totalorder %s2518_s22, 0  ;;  %p365_p3 = scmp.eq.s32.totalorder %s1956_s23, 1 }
  0x18   : > { %p1957_p5 = scmp.ge.s32.totalorder %s2397_s21, 1  ;;  %p398_p7 = scmp.lt.s32.totalorder %s2397_s21, 3 }
  0x19   : > { %p2527_p4 = por %p3761_p1, %p83_p0  ;;  %p2532_p6 = por %p365_p3, %p83_p0 }
  0x1a   : > { %p2537_p8 = pnand %p1957_p5, %p398_p7  ;;  %s2399_s27 = smov [#allocation5]  }
  0x1b   : > { %s3794_s24 = scalar_select %p2527_p4, 1, 0 }
  0x1c   : > { %s3795_s25 = scalar_select %p2532_p6, 1, 0 }
  0x1d   : > { %s3797_s26 = scalar_select %p2537_p8, 1, 0 }
  0x1e   : > { %3796 = sst [smem:[#allocation19_spill]] %s3795_s25  ;;  %s413_s28 = sshll.u32 %s2399_s27, 4  ;;  %s2541_s28 = int_to_ptr.vmem [resolvable:$true] %s413_s28 }
  0x1f   : > { %p2046_p9 = pneg %p2537_p8  ;;  %s2400_s30 = smov [#allocation7]  }
  0x20   : > { %s435_s16 = sshll.u32 %s2400_s30, 4  ;;  %s2401_s17 = smov [#allocation8]   ;;  %s2552_s16 = int_to_ptr.vmem [resolvable:$true] %s435_s16 }
  0x21   : > { %p2548_p11 = pnand %p2046_p9, %p3761_p1  ;;  %s2554_s23 = sshll.u32 %s2401_s17, 4  ;;  %s458_s23 = int_to_ptr.vmem [resolvable:$true] %s2554_s23 }
  0x22   : > { %s3799_s3 = sld [smem:[#allocation24_spill]] }
  0x23   : > { %p2564_p13 = pneg %p2548_p11 }
  0x28   : > { %s2177_s18 = scalar_lea.hbm %s3799_s3, 256 }
  0x29   : > { %p2178_p12 = scmp.ne.s32.totalorder %s3799_s3, %s2177_s18  ;;  %p2184_p5 = scmp.lt.u32.totalorder %s2177_s18, %s3799_s3 }
  0x2b   : > { %p2180_p0 = pnand %p2564_p13, %p2178_p12 }
  0x2d   : > { %p2181_p3 = pneg %p2180_p0 }
  0x2f   : > { %p2186_p7 = pnand %p2184_p5, %p2181_p3 }
  0x31   : > { %2189 = shalt.err (!%p2186_p7)
}
  0x32   : > { %s2190_s14 = scalar_lea.vmem %s2541_s28, 256  ;;  %p2198_p2 = scmp.lt.s32.totalorder %s2541_s28, %s2541_s28 }
  0x33   : > { %p2191_p9 = scmp.ne.s32.totalorder %s2541_s28, %s2190_s14  ;;  %p2199_p6 = scmp.lt.s32.totalorder %s2190_s14, %s2190_s14 }
  0x35   : > { %p2193_p10 = pnand %p2191_p9, %p2564_p13  ;;  %p2200_p12 = por %p2199_p6, %p2198_p2 }
  0x37   : > { %p2194_p1 = pneg %p2193_p10 }
  0x39   : > { %p2201_p0 = pnand %p2200_p12, %p2194_p1 }
  0x3b   : > { %2204 = shalt.err (!%p2201_p0)
}
  0x3c   : > { %s3768_s15 = smov 128   ;;  %s3769_s18 = smov 8  }
  0x3d   : > { %2049 = dma.hbm_to_vmem [thread:$0]  (!%p2548_p11), %s3799_s3, 256, %s2541_s28, [#allocation6], %s3768_s15, %s3768_s15, %s3769_s18  }
  0x3e   : > { %s2205_s14 = scalar_lea.hbm %s3748_s7, 256 }
  0x3f   : > { %p2206_p1 = scmp.ne.s32.totalorder %s3748_s7, %s2205_s14  ;;  %p2212_p10 = scmp.lt.u32.totalorder %s2205_s14, %s3748_s7 }
  0x41   : > { %p2208_p2 = pnand %p2206_p1, %p2564_p13 }
  0x43   : > { %p2209_p6 = pneg %p2208_p2 }
  0x45   : > { %p2214_p3 = pnand %p2212_p10, %p2209_p6 }
  0x47   : > { %2217 = shalt.err (!%p2214_p3)
}
  0x48   : > { %s2218_s28 = scalar_lea.vmem %s2552_s16, 256  ;;  %p2226_p12 = scmp.lt.s32.totalorder %s2552_s16, %s2552_s16 }
  0x49   : > { %p2219_p5 = scmp.ne.s32.totalorder %s2552_s16, %s2218_s28  ;;  %p2227_p0 = scmp.lt.s32.totalorder %s2218_s28, %s2218_s28 }
  0x4b   : > { %p2221_p7 = pnand %p2219_p5, %p2564_p13  ;;  %p2228_p1 = por %p2227_p0, %p2226_p12 }
  0x4d   : > { %p2222_p9 = pneg %p2221_p7 }
  0x4f   : > { %p2229_p2 = pnand %p2228_p1, %p2222_p9 }
  0x51   : > { %2232 = shalt.err (!%p2229_p2)
}
  0x52   : > { %2052 = dma.hbm_to_vmem [thread:$0]  (!%p2548_p11), %s3748_s7, 256, %s2552_s16, [#allocation6], %s3768_s15, %s3768_s15, %s3769_s18  }
  0x53   : > { %s2233_s25 = scalar_lea.hbm %s3752_s11, 512 }
  0x54   : > { %p2234_p6 = scmp.ne.s32.totalorder %s3752_s11, %s2233_s25  ;;  %p2240_p5 = scmp.lt.u32.totalorder %s2233_s25, %s3752_s11 }
  0x56   : > { %p2236_p10 = pnand %p2234_p6, %p2564_p13 }
  0x58   : > { %p2237_p3 = pneg %p2236_p10 }
  0x5a   : > { %p2242_p7 = pnand %p2240_p5, %p2237_p3 }
  0x5c   : > { %2245 = shalt.err (!%p2242_p7)
}
  0x5d   : > { %s2246_s28 = scalar_lea.vmem %s458_s23, 512  ;;  %p2254_p1 = scmp.lt.s32.totalorder %s458_s23, %s458_s23 }
  0x5e   : > { %p2247_p9 = scmp.ne.s32.totalorder %s458_s23, %s2246_s28  ;;  %p2255_p2 = scmp.lt.s32.totalorder %s2246_s28, %s2246_s28 }
  0x60   : > { %p2249_p12 = pnand %p2247_p9, %p2564_p13  ;;  %p2256_p4 = por %p2255_p2, %p2254_p1 }
  0x62   : > { %p2250_p0 = pneg %p2249_p12 }
  0x64   : > { %p2257_p8 = pnand %p2256_p4, %p2250_p0 }
  0x66   : > { %2260 = shalt.err (!%p2257_p8)
}
  0x67   : > { %2055 = dma.hbm_to_vmem [thread:$0]  (!%p2548_p11), %s3752_s11, 512, %s458_s23, [#allocation9], %s3768_s15, %s3768_s15, %s3769_s18  }
  0x68   : > { %s2637_s13 = sadd.s32 1, %s2397_s21   ;;  %s70_s9 = sadd.s32 1, %s2393_s20 }
  0x69   : > { %s67_s29 = ssub.s32 %s2397_s21, %s2637_s13  ;;  %p77_p8 = scmp.ne.s32.totalorder %s2393_s20, %s2389_s19 }
  0x6a   : > { %p68_p4 = scmp.eq.s32.totalorder %s67_s29, 0  ;;  %p78_p13 = scmp.eq.s32.totalorder %s2397_s21, 0 }
  0x6b   : > { %p2070_p6 = scmp.lt.s32.totalorder %s2397_s21, 2  ;;  %p3801_p3 = scmp.eq.s32.totalorder %s2518_s22, 1 }
  0x6c   : > { %s2647_s10 = scalar_select %p68_p4, %s2393_s20, %s70_s9  }
  0x6d   : > { %p79_p10 = por %p78_p13, %p77_p8  ;;  %p2651_p5 = por %p3801_p3, %p77_p8 }
  0x6e   : > { %s485_s25 = sand.u32 1, %s2393_s20   ;;  %s2026_s27 = smul.u32 2304, %s2397_s21 }
  0x6f   : > { %s2025_s23 = smul.u32 144, %s485_s25  ;;  %p2657_p11 = pnand %p2070_p6, %p79_p10 }
  0x70   : > { %s3804_s1 = sld [smem:[#allocation22_spill]]  ;;  %s2668_s29 = scalar_lea.sflag [#allocation3], %s485_s25 }
  0x71   : > { %s489_s16 = scalar_lea.vmem [#allocation2], %s2025_s23  ;;  %p2263_p9 = pneg %p2657_p11 }
  0x72   : > { %s496_s8 = sshll.u32 %s489_s16, 4  ;;  %s2666_s8 = int_to_ptr.vmem [resolvable:$true] %s496_s8 }
  0x76   : > { %s2664_s28 = scalar_lea.hbm %s3804_s1, %s2026_s27  ;;  %s2266_s14 = scalar_lea.hbm %s3804_s1, 4608 }
  0x77   : > { %s2261_s9 = scalar_lea.hbm %s2664_s28, 2304  ;;  %p2267_p1 = scmp.lt.u32.totalorder %s2664_s28, %s3804_s1 }
  0x78   : > { %p2262_p7 = scmp.ne.s32.totalorder %s2664_s28, %s2261_s9  ;;  %p2268_p2 = scmp.lt.u32.totalorder %s2266_s14, %s2261_s9 }
  0x79   : > { %p2270_p8 = scmp.lt.u32.totalorder %s2261_s9, %s2664_s28 }
  0x7a   : > { %p2264_p12 = pnand %p2263_p9, %p2262_p7  ;;  %p2269_p4 = por %p2268_p2, %p2267_p1 }
  0x7c   : > { %p2265_p0 = pneg %p2264_p12  ;;  %p2271_p13 = por %p2270_p8, %p2269_p4 }
  0x7e   : > { %p2272_p6 = pnand %p2271_p13, %p2265_p0 }
  0x80   : > { %2275 = shalt.err (!%p2272_p6)
}
  0x81   : > { %s2276_s25 = scalar_lea.vmem %s2666_s8, 2304  ;;  %s2404_s23 = smov [#allocation2]  }
  0x82   : > { %p2277_p10 = scmp.ne.s32.totalorder %s2666_s8, %s2276_s25  ;;  %s2281_s16 = sshll.u32 %s2404_s23, 4  ;;  %s2282_s16 = int_to_ptr.vmem [resolvable:$false] %s2281_s16 }
  0x83   : > { %s2283_s15 = scalar_lea.vmem %s2282_s16, 4608  ;;  %p2284_p12 = scmp.lt.s32.totalorder %s2666_s8, %s2282_s16 }
  0x84   : > { %p2279_p3 = pnand %p2277_p10, %p2263_p9  ;;  %p2285_p1 = scmp.lt.s32.totalorder %s2283_s15, %s2276_s25 }
  0x86   : > { %p2280_p7 = pneg %p2279_p3  ;;  %p2286_p2 = por %p2285_p1, %p2284_p12 }
  0x88   : > { %p2287_p4 = pnand %p2286_p2, %p2280_p7 }
  0x8a   : > { %2290 = shalt.err (!%p2287_p4)
}
  0x8b   : > { %s3805_s18 = smov 8   ;;  %s3806_s9 = smov 128  }
  0x8c   : > { %2059 = dma.hbm_to_vmem [thread:$0]  (!%p2657_p11), %s2664_s28, 2304, %s2666_s8, %s2668_s29, %s3806_s9, %s3806_s9, %s3805_s18  }
  0x8d   : > { %p3807_p9 = scmp.ne.s32.totalorder %s3797_s26, 0 }
  0x8f   : > { %508 = sbr.rel (%p3807_p9) target bundleno = 1544 (0x608), region = 76 }
  0x96   : > { %s2702_s27 = sand.u32 1, %s2389_s19   ;;  %p3808_p0 = scmp.ne.s32.totalorder %s3794_s24, 0 }
  0x97   : > { %s2027_s17 = smul.u32 144, %s2702_s27  ;;  %s511_s14 = scalar_lea.sflag [#allocation3], %s2702_s27 }
  0x99   : > { %s2706_s25 = scalar_lea.vmem [#allocation2], %s2027_s17 }
  0x9a   : > { %2364 = dma.done.wait (%p3808_p0), %s511_s14, 2304  }
  0x9b   : > { %2366 = vsyncadd (%p3808_p0), %s511_s14, 4294964992  ;;  %p3809_p11 = scmp.eq.s32.totalorder %s2518_s22, 0 }
  0x9d   : > { %2368 = dma.done.wait (%p3809_p11), [#allocation6], 512   ;;  %p3810_p8 = pmov %p3809_p11 }
  0x9f   : > { %2370 = vsyncadd (%p3810_p8), [#allocation6], 4294966784  ;;  %p3811_p13 = pmov %p3810_p8 }
  0xa0   : > { %p3812_p6 = pmov %p3810_p8 }
  0xa1   : > { %2372 = dma.done.wait (%p3811_p13), [#allocation9], 512  }
  0xa2   : > { %2374 = vsyncadd (%p3812_p6), [#allocation9], 4294966784  ;;  %v3772_v0 = vmov 0   ;;  %v2723_v1 = vld [vmem:[%s2706_s25 + $0x4] ss:$8 sps:$4 sm:$0xff]   ;;  %vm761_vm0 = vcmask 130048   ;;  %v824_v59 = vlaneseq }
  0xa3   : > { %2122 = vset.pattern.permute.xlu0 %v3772_v0  ;;  %2123 = vset.pattern.permute.xlu1 %v3772_v0  ;;  %v2726_v2 = vld [vmem:[%s2706_s25] ss:$8 sps:$4 sm:$0xff]   ;;  %v2730_v3 = vld [vmem:[%s2706_s25 + $0x14] ss:$8 sps:$4 sm:$0xff]   ;;  %v2734_v4 = vld [vmem:[%s2706_s25 + $0x10] ss:$8 sps:$4 sm:$0xff]  }
  0xa4   : > { %765 = vmatprep.subr.bf16.mxu0 %v2723_v1  ;;  %v2738_v5 = vld [vmem:[%s2706_s25 + $0x24] ss:$8 sps:$4 sm:$0xff]   ;;  %v2742_v6 = vld [vmem:[%s2706_s25 + $0x20] ss:$8 sps:$4 sm:$0xff]   ;;  %v2746_v7 = vld [vmem:[%s2706_s25 + $0x34] ss:$8 sps:$4 sm:$0xff]  }
  0xa5   : > { %766 = vmatpush1.bf16.msra.mxu0 %v2726_v2  ;;  %v2750_v8 = vld [vmem:[%s2706_s25 + $0x30] ss:$8 sps:$4 sm:$0xff]   ;;  %v2754_v9 = vld [vmem:[%s2706_s25 + $0x44] ss:$8 sps:$4 sm:$0xff]   ;;  %v2757_v10 = vld [vmem:[%s2706_s25 + $0x40] ss:$8 sps:$4 sm:$0xff]  }
  0xa6   : > { %767 = vmatprep.subr.bf16.mxu0 %v2730_v3  ;;  %v2153_v11 = vld [vmem:[#allocation5 + $0x4] ss:$8 sps:$4 sm:$0xff]   ;;  %v2773_v15 = vld [vmem:[%s2706_s25 + $0x50] ss:$8 sps:$4 sm:$0xff]   ;;  %v2781_v17 = vld [vmem:[%s2706_s25 + $0x60] ss:$8 sps:$4 sm:$0xff]  }
  0xa7   : > { %v650_v12 = vld [vmem:[%s3745_s4] sm:$0xff]  ;;  %v651_v13 = vld [vmem:[%s3745_s4 + $0x8] sm:$0xff]  ;;  %1991 = vmatprep.mubr.msk.bf16.mxu0 %vm761_vm0, %v2153_v11  ;;  %s3778_s8 = smov 16   ;;  %s2407_s29 = smov 17   ;;  %v814_v53 = vld [vmem:[%s3747_s6 + $0x10] sm:$0xff]  ;;  %v2923_v62 = vshrl.u32 %v824_v59, 7 }
  0xa8   : > { %v2766_v14 = vld [vmem:[%s2706_s25 + $0x54] ss:$8 sps:$4 sm:$0xff]   ;;  %654 = vperm.xlu0 %2122, %v650_v12   ;;  %v2777_v16 = vld [vmem:[%s2706_s25 + $0x64] ss:$8 sps:$4 sm:$0xff]   ;;  %v2789_v19 = vld [vmem:[%s2706_s25 + $0x70] ss:$8 sps:$4 sm:$0xff]  }
  0xa9   : > { %768 = vmatpush1.bf16.msra.mxu0 %v2734_v4  ;;  %v2785_v18 = vld [vmem:[%s2706_s25 + $0x74] ss:$8 sps:$4 sm:$0xff]   ;;  %v2793_v20 = vld [vmem:[%s2706_s25 + $0x84] ss:$8 sps:$4 sm:$0xff]   ;;  %v2797_v21 = vld [vmem:[%s2706_s25 + $0x80] ss:$8 sps:$4 sm:$0xff]  }
  0xaa   : > { %769 = vmatprep.subr.bf16.mxu0 %v2738_v5  ;;  %v2151_v22 = vld [vmem:[#allocation5] ss:$8 sps:$4 sm:$0xff]   ;;  %s2408_s23 = smov 15   ;;  %s2409_s16 = smov 1   ;;  %v2156_v39 = vld [vmem:[%s3746_s5 + $0x4] ss:$8 sps:$4 sm:$0xff]  }
  0xab   : > { %s3770_s15 = smov 127   ;;  %s2411_s18 = smov 113   ;;  %1998 = vmatprep.mubr.msk.bf16.mxu1 %vm761_vm0, %v2156_v39  ;;  %v812_v52 = vld [vmem:[%s3747_s6] sm:$0xff]  ;;  %v815_v56 = vld [vmem:[%s3747_s6 + $0x18] sm:$0xff]  ;;  %v2925_v63 = vand.u32 127, %v824_v59 }
  0xac   : > { %659 = vperm.xlu0 %2122, %v651_v13   ;;  %s2412_s9 = smov 112   ;;  %s3775_s17 = smov 111   ;;  %v833_v13 = vsub.s32 0, %v2923_v62 }
  0xad   : > { %770 = vmatpush1.bf16.msra.mxu0 %v2742_v6  ;;  %p583_p10 = scmp.lt.s32.totalorder %s2518_s22, 1  ;;  %s3813_s0 = sld [smem:[#allocation21_spill]]  ;;  %vm826_vm1 = vcmp.lt.s32.totalorder %v2925_v63, 17  ;;  %vm853_vm2 = vcmp.lt.s32.totalorder %v2925_v63, 16  ;;  %vm880_vm3 = vcmp.lt.s32.totalorder %v2925_v63, 15  ;;  %vm907_vm4 = vcmp.lt.s32.totalorder %v2925_v63, 1 }
  0xae   : > { %771 = vmatprep.subr.bf16.mxu0 %v2746_v7  ;;  %s3814_s2 = sld [smem:[#allocation23_spill]]  ;;  %s3816_s30 = sld [smem:[#allocation27_spill]]  ;;  %vm936_vm5 = vcmp.lt.s32.totalorder %v2925_v63, 127  ;;  %vm963_vm6 = vcmp.lt.s32.totalorder %v2925_v63, 113  ;;  %vm990_vm7 = vcmp.lt.s32.totalorder %v2925_v63, 112  ;;  %vm1017_vm8 = vcmp.lt.s32.totalorder %v2925_v63, 111 }
  0xaf   : > { %s584_s24 = scalar_select %p583_p10, %s2518_s22, 1  ;;  %v2171_v63 = vld [vmem:[#allocation8 + $0x10] ss:$8 sps:$4 sm:$0xff]  }
  0xb0   : > { %s3821_s28 = smov 127   ;;  %s3822_s14 = smov 111  }
  0xb1   : > { %772 = vmatpush1.bf16.msra.mxu0 %v2750_v8  ;;  %s2022_s26 = sshll.u32 %s584_s24, 5  ;;  %s3777_s25 = sshll.u32 %s2702_s27, 5 }
  0xb2   : > { %773 = vmatprep.subr.bf16.mxu0 %v2754_v9  ;;  %s2414_s24 = smov [#allocation10]  }
  0xb5   : > { %774 = vmatpush1.bf16.msra.mxu0 %v2757_v10 }
  0xb6   : > { %775 = vmatprep.subr.bf16.mxu0 %v2766_v14 }
  0xb9   : > { %776 = vmatpush1.bf16.msra.mxu0 %v2773_v15 }
  0xba   : > { %777 = vmatprep.subr.bf16.mxu0 %v2777_v16 }
  0xbd   : > { %778 = vmatpush1.bf16.msra.mxu0 %v2781_v17 }
  0xbe   : > { %779 = vmatprep.subr.bf16.mxu0 %v2785_v18 }
  0xc1   : > { %780 = vmatpush1.bf16.msra.mxu0 %v2789_v19 }
  0xc2   : > { %781 = vmatprep.subr.bf16.mxu0 %v2793_v20 }
  0xc5   : > { %782 = vmatpush1.bf16.msra.mxu0 %v2797_v21 }
  0xc8   : > { %798 = vmatmul.mubr.bf16.vlgmr.msra.gmra.mrb[0].mxu0 %v2151_v22  ;;  %v2933_v22 = vld [vmem:[%s3814_s2] sm:$0xff] }
 0x127   : > { %v655_v23 = vpop.permute.xlu0 %654 }
 0x12b   : > { %v660_v27 = vpop.permute.xlu0 %659 }
 0x19b   : > { %v799_v24 = vpop.f32.mrb[0].mxu0 }
 0x19c   : > { %v800_v25 = vadd.f32 %v799_v24, %v655_v23  ;;  %v801_v26 = vpop.f32.mrb[1].mxu0 }
 0x19d   : > { %v802_v28 = vadd.f32 %v801_v26, %v655_v23  ;;  %v803_v29 = vpop.f32.mrb[2].mxu0  ;;  %v2938_v23 = vld [vmem:[%s3814_s2 + $0x8] sm:$0xff]  ;;  %v860_v26 = vsub.s32 1, %v2923_v62 }
 0x19e   : > { %v2801_v30 = vmax.f32 %v800_v25, 0.0  ;;  %v804_v31 = vadd.f32 %v803_v29, %v660_v27  ;;  %v805_v32 = vpop.f32.mrb[3].mxu0  ;;  %v1383_v29 = vld [vmem:[%s3816_s30 + $0x8] sm:$0xff] }
 0x19f   : > { %v806_v33 = vadd.f32 %v805_v32, %v660_v27  ;;  %v2809_v35 = vmax.f32 %v802_v28, 0.0  ;;  %v2945_v27 = vrot.slane %v2933_v22, %v833_v13  ;;  %v2948_v28 = vrot.slane %v2938_v23, %v833_v13 }
 0x1a0   : > { %v2803_v34 = vmax.f32 %v804_v31, 0.0  ;;  %845 = vrot.lane.b32.xlu0 %v2801_v30, %s3778_s8  ;;  %816 = vrot.lane.b32.xlu1 %v2801_v30, %s2407_s29 }
 0x1a1   : > { %v2811_v36 = vmax.f32 %v806_v33, 0.0  ;;  %3815 = vst [vmem:[#allocation20_spill] sm:$0xff] %v2948_v28  ;;  %v887_v33 = vsub.s32 2, %v2923_v62 }
 0x1a3   : > { %v2979_v0 = vrot.slane %v2933_v22, %v887_v33 }
 0x1a4   : > { %872 = vrot.lane.b32.xlu0 %v2801_v30, %s2408_s23  ;;  %818 = vrot.lane.b32.xlu1 %v2803_v34, %s2407_s29 }
 0x1a8   : > { %899 = vrot.lane.b32.xlu0 %v2801_v30, %s2409_s16  ;;  %847 = vrot.lane.b32.xlu1 %v2803_v34, %s3778_s8 }
 0x1ac   : > { %928 = vrot.lane.b32.xlu0 %v2801_v30, %s3770_s15  ;;  %874 = vrot.lane.b32.xlu1 %v2803_v34, %s2408_s23 }
 0x1b0   : > { %955 = vrot.lane.b32.xlu0 %v2801_v30, %s2411_s18  ;;  %901 = vrot.lane.b32.xlu1 %v2803_v34, %s2409_s16 }
 0x1b4   : > { %982 = vrot.lane.b32.xlu0 %v2801_v30, %s2412_s9  ;;  %930 = vrot.lane.b32.xlu1 %v2803_v34, %s3770_s15 }
 0x1b8   : > { %820 = vrot.lane.b32.xlu0 %v2809_v35, %s2407_s29  ;;  %957 = vrot.lane.b32.xlu1 %v2803_v34, %s2411_s18 }
 0x1bc   : > { %849 = vrot.lane.b32.xlu0 %v2809_v35, %s3778_s8  ;;  %984 = vrot.lane.b32.xlu1 %v2803_v34, %s2412_s9 }
 0x1c0   : > { %876 = vrot.lane.b32.xlu0 %v2809_v35, %s2408_s23  ;;  %822 = vrot.lane.b32.xlu1 %v2811_v36, %s2407_s29 }
 0x1c4   : > { %903 = vrot.lane.b32.xlu0 %v2809_v35, %s2409_s16  ;;  %851 = vrot.lane.b32.xlu1 %v2811_v36, %s3778_s8 }
 0x1c8   : > { %1009 = vrot.lane.b32.xlu0 %v2801_v30, %s3775_s17  ;;  %878 = vrot.lane.b32.xlu1 %v2811_v36, %s2408_s23 }
 0x1cc   : > { %932 = vrot.lane.b32.xlu0 %v2809_v35, %s3770_s15  ;;  %905 = vrot.lane.b32.xlu1 %v2811_v36, %s2409_s16 }
 0x1d0   : > { %959 = vrot.lane.b32.xlu0 %v2809_v35, %s2411_s18  ;;  %1011 = vrot.lane.b32.xlu1 %v2803_v34, %s3775_s17 }
 0x1d4   : > { %986 = vrot.lane.b32.xlu0 %v2809_v35, %s2412_s9  ;;  %934 = vrot.lane.b32.xlu1 %v2811_v36, %s3770_s15  ;;  %s587_s15 = scalar_lea.vmem %s3813_s0, %s2022_s26  ;;  %s3826_s26 = sld [smem:[#allocation29_spill]] }
 0x1d5   : > { %v2886_v40 = vld [vmem:[%s587_s15] sm:$0xff]  ;;  %v2888_v41 = vld [vmem:[%s587_s15 + $0x8] sm:$0xff]  ;;  %v2892_v43 = vld [vmem:[%s587_s15 + $0x10] sm:$0xff]  ;;  %s1776_s0 = scalar_lea.sflag [#allocation4], %s2702_s27 }
 0x1d6   : > { %v615_v42 = vadd.f32 %v2888_v41, %v2886_v40  ;;  %v2894_v44 = vld [vmem:[%s587_s15 + $0x18] sm:$0xff] }
 0x1d7   : > { %v618_v45 = vadd.f32 %v2894_v44, %v2892_v43 }
 0x1d8   : > { %1013 = vrot.lane.b32.xlu0 %v2809_v35, %s3775_s17  ;;  %961 = vrot.lane.b32.xlu1 %v2811_v36, %s2411_s18 }
 0x1dc   : > { %988 = vrot.lane.b32.xlu1 %v2811_v36, %s2412_s9 }
 0x1e0   : > { %1015 = vrot.lane.b32.xlu1 %v2811_v36, %s3775_s17  ;;  %s3819_s17 = sld [smem:[#allocation26_spill]] }
 0x1f7   : > { %616 = vadd.xlane.f32.xlu0 %v615_v42 }
 0x204   : > { %619 = vadd.xlane.f32.xlu1 %v618_v45  ;;  %v2960_v45 = vrot.slane %v2933_v22, %v860_v26 }
 0x212   : > { %v846_v46 = vpop.permute.xlu0 %845  ;;  %v817_v47 = vpop.permute.xlu1 %816 }
 0x215   : > { %1042 = vperm.xlu1 %2123, %v812_v52   ;;  %v2963_v52 = vrot.slane %v2938_v23, %v860_v26 }
 0x216   : > { %v2898_v48 = vpop.permute.xlu0 %872  ;;  %v819_v49 = vpop.permute.xlu1 %818 }
 0x219   : > { %1052 = vperm.xlu1 %2123, %v814_v53  }
 0x21a   : > { %v2900_v50 = vpop.permute.xlu0 %899  ;;  %v848_v51 = vpop.permute.xlu1 %847 }
 0x21d   : > { %1057 = vperm.xlu1 %2123, %v815_v56  }
 0x21e   : > { %v2908_v54 = vpop.permute.xlu0 %928  ;;  %v2910_v55 = vpop.permute.xlu1 %874 }
 0x221   : > { %1391 = vperm.xlu1 %2123, %v1383_v29  }
 0x222   : > { %v2915_v57 = vpop.permute.xlu0 %955  ;;  %v2917_v58 = vpop.permute.xlu1 %901 }
 0x226   : > { %v2919_v60 = vpop.permute.xlu0 %982  ;;  %v2921_v61 = vpop.permute.xlu1 %930 }
 0x22a   : > { %v821_v11 = vpop.permute.xlu0 %820  ;;  %v2927_v12 = vpop.permute.xlu1 %957 }
 0x22b   : > { %v827_v31 = vsel %vm826_vm1, %v817_v47, %v821_v11  ;;  %v829_v32 = vsel %vm826_vm1, %v821_v11, %v817_v47 }
 0x22c   : > { %v839_v47 = vmul.f32 %v2945_v27, %v829_v32  ;;  %v840_v11 = vmul.f32 %v2948_v28, %v827_v31  ;;  %v914_v31 = vsub.s32 3, %v2923_v62 }
 0x22e   : > { %v850_v24 = vpop.permute.xlu0 %849  ;;  %v2941_v25 = vpop.permute.xlu1 %984 }
 0x22f   : > { %v854_v29 = vsel %vm853_vm2, %v846_v46, %v850_v24  ;;  %v856_v26 = vsel %vm853_vm2, %v850_v24, %v846_v46 }
 0x230   : > { %v866_v24 = vmul.f32 %v2960_v45, %v856_v26  ;;  %v867_v38 = vmul.f32 %v2963_v52, %v854_v29  ;;  %v3003_v26 = vrot.slane %v2933_v22, %v914_v31 }
 0x232   : > { %v877_v39 = vpop.permute.xlu0 %876  ;;  %v823_v42 = vpop.permute.xlu1 %822 }
 0x233   : > { %v828_v53 = vsel %vm826_vm1, %v819_v49, %v823_v42  ;;  %v830_v56 = vsel %vm826_vm1, %v823_v42, %v819_v49 }
 0x234   : > { %v841_v59 = vmul.f32 %v2945_v27, %v830_v56  ;;  %v842_v13 = vmul.f32 %v2948_v28, %v828_v53  ;;  %v2982_v56 = vrot.slane %v2938_v23, %v887_v33  ;;  %v881_v33 = vsel %vm880_vm3, %v2898_v48, %v877_v39 }
 0x236   : > { %v904_v49 = vpop.permute.xlu0 %903  ;;  %v852_v42 = vpop.permute.xlu1 %851  ;;  %v844_v32 = vpack.c.bf16 %v842_v13, %v840_v11  ;;  %v843_v37 = vpack.c.bf16 %v841_v59, %v839_v47  ;;  %v883_v47 = vsel %vm880_vm3, %v877_v39, %v2898_v48  ;;  %v894_v39 = vmul.f32 %v2982_v56, %v881_v33 }
 0x237   : > { %v855_v53 = vsel %vm853_vm2, %v848_v51, %v852_v42  ;;  %v857_v46 = vsel %vm853_vm2, %v852_v42, %v848_v51  ;;  %v3006_v42 = vrot.slane %v2938_v23, %v914_v31  ;;  %v893_v48 = vmul.f32 %v2979_v0, %v883_v47 }
 0x238   : > { %v868_v28 = vmul.f32 %v2960_v45, %v857_v46  ;;  %v869_v11 = vmul.f32 %v2963_v52, %v855_v53  ;;  %1084 = vmatprep.subr.bf16.mxu1 %v844_v32  ;;  %v908_v31 = vsel %vm907_vm4, %v2900_v50, %v904_v49  ;;  %v910_v53 = vsel %vm907_vm4, %v904_v49, %v2900_v50 }
 0x239   : > { %1085 = vmatpush1.bf16.msra.mxu1 %v843_v37  ;;  %v943_v33 = vsub.s32 5, %v2923_v62 }
 0x23a   : > { %v3000_v51 = vpop.permute.xlu0 %1009  ;;  %v879_v59 = vpop.permute.xlu1 %878  ;;  %v871_v13 = vpack.c.bf16 %v869_v11, %v867_v38  ;;  %v870_v29 = vpack.c.bf16 %v868_v28, %v866_v24 }
 0x23b   : > { %v882_v32 = vsel %vm880_vm3, %v2910_v55, %v879_v59  ;;  %v884_v37 = vsel %vm880_vm3, %v879_v59, %v2910_v55 }
 0x23c   : > { %v895_v38 = vmul.f32 %v2979_v0, %v884_v37  ;;  %v896_v28 = vmul.f32 %v2982_v56, %v882_v32  ;;  %1086 = vmatprep.subr.bf16.mxu1 %v871_v13  ;;  %v920_v13 = vmul.f32 %v3003_v26, %v910_v53  ;;  %v921_v32 = vmul.f32 %v3006_v42, %v908_v31 }
 0x23d   : > { %1087 = vmatpush1.bf16.msra.mxu1 %v870_v29  ;;  %v970_v29 = vsub.s32 6, %v2923_v62 }
 0x23e   : > { %v933_v46 = vpop.permute.xlu0 %932  ;;  %v906_v55 = vpop.permute.xlu1 %905  ;;  %v898_v24 = vpack.c.bf16 %v896_v28, %v894_v39  ;;  %v897_v11 = vpack.c.bf16 %v895_v38, %v893_v48  ;;  %v3043_v28 = vrot.slane %v2938_v23, %v943_v33 }
 0x23f   : > { %v909_v47 = vsel %vm907_vm4, %v2917_v58, %v906_v55  ;;  %v911_v59 = vsel %vm907_vm4, %v906_v55, %v2917_v58  ;;  %v3040_v58 = vrot.slane %v2933_v22, %v943_v33  ;;  %v937_v31 = vsel %vm936_vm5, %v2908_v54, %v933_v46 }
 0x240   : > { %v922_v50 = vmul.f32 %v3003_v26, %v911_v59  ;;  %v923_v49 = vmul.f32 %v3006_v42, %v909_v47  ;;  %1088 = vmatprep.subr.bf16.mxu1 %v898_v24  ;;  %v939_v53 = vsel %vm936_vm5, %v933_v46, %v2908_v54  ;;  %v3053_v55 = vrot.slane %v2933_v22, %v970_v29 }
 0x241   : > { %1089 = vmatpush1.bf16.msra.mxu1 %v897_v11  ;;  %v3817_v24 = vpack.c.bf16 %v2811_v36, %v2809_v35  ;;  %v3059_v33 = vrot.slane %v2938_v23, %v970_v29  ;;  %v997_v47 = vsub.s32 7, %v2923_v62  ;;  %v949_v59 = vmul.f32 %v3040_v58, %v937_v31 }
 0x242   : > { %v960_v37 = vpop.permute.xlu0 %959  ;;  %v3037_v48 = vpop.permute.xlu1 %1011  ;;  %v925_v39 = vpack.c.bf16 %v923_v49, %v921_v32  ;;  %v924_v38 = vpack.c.bf16 %v922_v50, %v920_v13  ;;  %v950_v13 = vmul.f32 %v3043_v28, %v939_v53 }
 0x243   : > { %v964_v62 = vsel %vm963_vm6, %v2915_v57, %v960_v37  ;;  %v966_v50 = vsel %vm963_vm6, %v960_v37, %v2915_v57  ;;  %v3086_v31 = vrot.slane %v2938_v23, %v997_v47 }
 0x244   : > { %1090 = vmatprep.subr.bf16.mxu1 %v925_v39  ;;  %v977_v57 = vmul.f32 %v3059_v33, %v966_v50 }
 0x245   : > { %1091 = vmatpush1.bf16.msra.mxu1 %v924_v38  ;;  %v3083_v38 = vrot.slane %v2933_v22, %v997_v47 }
 0x246   : > { %1092 = vmatprep.subr.bf16.mxu1 %v3817_v24  ;;  %v935_v11 = vpop.permute.xlu1 %934  ;;  %v987_v35 = vpop.permute.xlu0 %986 }
 0x247   : > { %v938_v54 = vsel %vm936_vm5, %v2921_v61, %v935_v11  ;;  %v940_v46 = vsel %vm936_vm5, %v935_v11, %v2921_v61  ;;  %v3818_v61 = vpack.c.bf16 %v2803_v34, %v2801_v30  ;;  %v976_v34 = vmul.f32 %v3053_v55, %v964_v62  ;;  %v3123_v62 = vld [vmem:[%s3814_s2 + $0x18] ss:$0 sm:$0xff] }
 0x248   : > { %v951_v36 = vmul.f32 %v3040_v58, %v938_v54  ;;  %v952_v32 = vmul.f32 %v3043_v28, %v940_v46  ;;  %v991_v23 = vsel %vm990_vm7, %v2919_v60, %v987_v35  ;;  %v993_v24 = vsel %vm990_vm7, %v987_v35, %v2919_v60 }
 0x249   : > { %1093 = vmatpush1.bf16.msra.mxu1 %v3818_v61 }
 0x24a   : > { %v962_v49 = vpop.permute.xlu1 %961  ;;  %v954_v29 = vpack.c.bf16 %v952_v32, %v950_v13  ;;  %v953_v39 = vpack.c.bf16 %v951_v36, %v949_v59  ;;  %v1003_v13 = vmul.f32 %v3083_v38, %v991_v23  ;;  %v1004_v36 = vmul.f32 %v3086_v31, %v993_v24  ;;  %v3118_v32 = vld [vmem:[%s3814_s2 + $0x10] ss:$0 sm:$0xff]  ;;  %v2154_v23 = vld [vmem:[%s3746_s5] ss:$8 sps:$4 sm:$0xff]  }
 0x24b   : > { %v965_v53 = vsel %vm963_vm6, %v2927_v12, %v962_v49  ;;  %v967_v30 = vsel %vm963_vm6, %v962_v49, %v2927_v12  ;;  %v1014_v12 = vpop.permute.xlu0 %1013  ;;  %v2159_v24 = vld [vmem:[%s3746_s5 + $0x10] ss:$8 sps:$4 sm:$0xff]  }
 0x24c   : > { %v978_v37 = vmul.f32 %v3053_v55, %v965_v53  ;;  %v979_v22 = vmul.f32 %v3059_v33, %v967_v30  ;;  %1094 = vmatprep.subr.bf16.mxu1 %v954_v29  ;;  %v1020_v50 = vsel %vm1017_vm8, %v1014_v12, %v3000_v51 }
 0x24d   : > { %1095 = vmatpush1.bf16.msra.mxu1 %v953_v39 }
 0x24e   : > { %v989_v11 = vpop.permute.xlu1 %988  ;;  %v981_v47 = vpack.c.bf16 %v979_v22, %v977_v57  ;;  %v980_v54 = vpack.c.bf16 %v978_v37, %v976_v34  ;;  %v1031_v34 = vmul.f32 %v3123_v62, %v1020_v50 }
 0x24f   : > { %v992_v46 = vsel %vm990_vm7, %v2941_v25, %v989_v11  ;;  %v994_v59 = vsel %vm990_vm7, %v989_v11, %v2941_v25  ;;  %v1018_v25 = vsel %vm1017_vm8, %v3000_v51, %v1014_v12  ;;  %v2162_v12 = vld [vmem:[%s3819_s17 + $0x4] ss:$8 sps:$4 sm:$0xff]  }
 0x250   : > { %v1005_v60 = vmul.f32 %v3083_v38, %v992_v46  ;;  %v1006_v35 = vmul.f32 %v3086_v31, %v994_v59  ;;  %1096 = vmatprep.subr.bf16.mxu1 %v981_v47  ;;  %v1030_v30 = vmul.f32 %v3118_v32, %v1018_v25 }
 0x251   : > { %1097 = vmatpush1.bf16.msra.mxu1 %v980_v54 }
 0x252   : > { %v1016_v61 = vpop.permute.xlu1 %1015  ;;  %v1008_v49 = vpack.c.bf16 %v1006_v35, %v1004_v36  ;;  %v1007_v29 = vpack.c.bf16 %v1005_v60, %v1003_v13 }
 0x253   : > { %v1019_v39 = vsel %vm1017_vm8, %v3037_v48, %v1016_v61  ;;  %v1021_v53 = vsel %vm1017_vm8, %v1016_v61, %v3037_v48  ;;  %v2157_v48 = vld [vmem:[%s3746_s5 + $0x14] ss:$8 sps:$4 sm:$0xff]  }
 0x254   : > { %v1032_v57 = vmul.f32 %v3118_v32, %v1019_v39  ;;  %v1033_v51 = vmul.f32 %v3123_v62, %v1021_v53  ;;  %1098 = vmatprep.subr.bf16.mxu1 %v1008_v49 }
 0x255   : > { %1099 = vmatpush1.bf16.msra.mxu1 %v1007_v29 }
 0x256   : > { %v1035_v37 = vpack.c.bf16 %v1033_v51, %v1031_v34  ;;  %v1034_v22 = vpack.c.bf16 %v1032_v57, %v1030_v30 }
 0x258   : > { %1100 = vmatprep.subr.bf16.mxu1 %v1035_v37 }
 0x259   : > { %1101 = vmatpush1.bf16.msra.mxu1 %v1034_v22 }
 0x25a   : > { %1406 = vmatprep.subr.bf16.mxu1 %v2723_v1  ;;  %v2160_v1 = vld [vmem:[%s3819_s17] ss:$8 sps:$4 sm:$0xff]  }
 0x25c   : > { %1117 = vmatmul.mubr.bf16.vlgmr.msra.gmra.mrb[0].mxu1 %v2154_v23 }
 0x25d   : > { %1407 = vmatpush1.bf16.msra.mxu1 %v2726_v2  ;;  %1999 = vmatprep.mubr.msk.bf16.mxu1 %vm761_vm0, %v2157_v48  ;;  %v3820_v2 = vmov 0  }
 0x25e   : > { %1408 = vmatprep.subr.bf16.mxu1 %v2730_v3 }
 0x261   : > { %1409 = vmatpush1.bf16.msra.mxu1 %v2734_v4 }
 0x262   : > { %1410 = vmatprep.subr.bf16.mxu1 %v2738_v5 }
 0x264   : > { %1127 = vmatmul.mubr.bf16.gmra.mrb[4].mxu1 %v2159_v24 }
 0x265   : > { %1411 = vmatpush1.bf16.msra.mxu1 %v2742_v6  ;;  %2005 = vmatprep.mubr.msk.bf16.mxu1 %vm761_vm0, %v2162_v12 }
 0x266   : > { %1412 = vmatprep.subr.bf16.mxu1 %v2746_v7 }
 0x269   : > { %1413 = vmatpush1.bf16.msra.mxu1 %v2750_v8 }
 0x26a   : > { %1414 = vmatprep.subr.bf16.mxu1 %v2754_v9 }
 0x26d   : > { %1415 = vmatpush1.bf16.msra.mxu1 %v2757_v10 }
 0x26e   : > { %1416 = vmatprep.subr.bf16.mxu1 %v2766_v14 }
 0x271   : > { %1417 = vmatpush1.bf16.msra.mxu1 %v2773_v15 }
 0x272   : > { %1418 = vmatprep.subr.bf16.mxu1 %v2777_v16 }
 0x275   : > { %1419 = vmatpush1.bf16.msra.mxu1 %v2781_v17 }
 0x276   : > { %1420 = vmatprep.subr.bf16.mxu1 %v2785_v18 }
 0x279   : > { %1421 = vmatpush1.bf16.msra.mxu1 %v2789_v19 }
 0x27a   : > { %1422 = vmatprep.subr.bf16.mxu1 %v2793_v20  ;;  %v813_v20 = vld [vmem:[%s3747_s6 + $0x8] sm:$0xff] }
 0x27d   : > { %1423 = vmatpush1.bf16.msra.mxu1 %v2797_v21  ;;  %v1382_v21 = vld [vmem:[%s3816_s30] sm:$0xff] }
 0x280   : > { %1439 = vmatmul.mubr.bf16.vlgmr.msra.gmra.mrb[8].mxu1 %v2160_v1 }
 0x281   : > { %1760 = vmatprep.mubr.bf16.mxu1 %v3820_v2 }
 0x284   : > { %v617_v3 = vpop.xlane.xlu0 %616 }
 0x285   : > { %v622_v4 = vmul.f32 0.00390625, %v617_v3 }
 0x287   : > { %v624_v5 = vsub.f32 %v2886_v40, %v622_v4  ;;  %v625_v6 = vsub.f32 %v2888_v41, %v622_v4 }
 0x289   : > { %v628_v7 = vmul.f32 %v624_v5, %v624_v5  ;;  %v629_v8 = vmul.f32 %v625_v6, %v625_v6 }
 0x28b   : > { %v632_v9 = vadd.f32 %v629_v8, %v628_v7 }
 0x28d   : > { %633 = vadd.xlane.f32.xlu0 %v632_v9 }
 0x291   : > { %v620_v10 = vpop.xlane.xlu1 %619 }
 0x292   : > { %v623_v14 = vmul.f32 0.00390625, %v620_v10 }
 0x294   : > { %v626_v15 = vsub.f32 %v2892_v43, %v623_v14  ;;  %v627_v16 = vsub.f32 %v2894_v44, %v623_v14 }
 0x295   : > { %v1043_v54 = vpop.permute.xlu1 %1042 }
 0x296   : > { %v630_v17 = vmul.f32 %v626_v15, %v626_v15  ;;  %v631_v18 = vmul.f32 %v627_v16, %v627_v16 }
 0x298   : > { %v635_v19 = vadd.f32 %v631_v18, %v630_v17 }
 0x299   : > { %v1053_v61 = vpop.permute.xlu1 %1052 }
 0x29a   : > { %636 = vadd.xlane.f32.xlu0 %v635_v19 }
 0x29d   : > { %v1058_v1 = vpop.permute.xlu1 %1057 }
 0x2b0   : > { %1047 = vperm.xlu0 %2122, %v813_v20  }
 0x2b4   : > { %1386 = vperm.xlu0 %2122, %v1382_v21  }
 0x31a   : > { %v634_v40 = vpop.xlane.xlu0 %633 }
 0x31b   : > { %v638_v41 = vmul.f32 0.00390625, %v634_v40 }
 0x31d   : > { %v640_v11 = vadd.f32 1e-05, %v638_v41 }
 0x31f   : > { %2173 = vrsqrt.f32 %v640_v11 }
 0x327   : > { %v637_v43 = vpop.xlane.xlu0 %636 }
 0x328   : > { %v639_v47 = vmul.f32 0.00390625, %v637_v43 }
 0x329   : > { %v2174_v50 = vpop.eup %2173 }
 0x32a   : > { %v641_v44 = vadd.f32 1e-05, %v639_v47  ;;  %v3187_v34 = vmul.f32 %v2174_v50, %v624_v5  ;;  %v3189_v57 = vmul.f32 %v2174_v50, %v625_v6 }
 0x32c   : > { %2175 = vrsqrt.f32 %v641_v44 }
 0x32f   : > { %v1118_v46 = vpop.f32.mrb[0].mxu1  ;;  %v1048_v35 = vpop.permute.xlu0 %1047 }
 0x330   : > { %v1119_v59 = vadd.f32 %v1118_v46, %v1043_v54  ;;  %v1120_v13 = vpop.f32.mrb[1].mxu1 }
 0x331   : > { %v1121_v36 = vadd.f32 %v1120_v13, %v1043_v54  ;;  %v1122_v60 = vpop.f32.mrb[2].mxu1 }
 0x332   : > { %v1124_v25 = vpop.f32.mrb[3].mxu1  ;;  %v1123_v49 = vadd.f32 %v1122_v60, %v1048_v35  ;;  %v1137_v29 = vadd.f32 1.0, %v1119_v59 }
 0x333   : > { %v1138_v39 = vadd.f32 1.0, %v1121_v36  ;;  %v1125_v53 = vadd.f32 %v1124_v25, %v1048_v35  ;;  %v1387_v36 = vpop.permute.xlu0 %1386  ;;  %v1392_v35 = vpop.permute.xlu1 %1391  ;;  %v2163_v25 = vld [vmem:[#allocation7 + $0x4] ss:$8 sps:$4 sm:$0xff]  }
 0x334   : > { %v1139_v37 = vadd.f32 1.0, %v1123_v49  ;;  %v1141_v48 = vmul.f32 %v1137_v29, %v3187_v34  ;;  %2002 = vmatprep.mubr.msk.bf16.mxu0 %vm761_vm0, %v2163_v25 }
 0x335   : > { %v1142_v2 = vmul.f32 %v1138_v39, %v3189_v57  ;;  %v1140_v4 = vadd.f32 1.0, %v1125_v53 }
 0x336   : > { %v2176_v30 = vpop.eup %2175 }
 0x337   : > { %v3191_v51 = vmul.f32 %v2176_v30, %v626_v15  ;;  %v3193_v22 = vmul.f32 %v2176_v30, %v627_v16  ;;  %v1128_v23 = vpop.f32.mrb[4].mxu1 }
 0x338   : > { %v1129_v24 = vadd.f32 %v1128_v23, %v1053_v61  ;;  %v1130_v12 = vpop.f32.mrb[5].mxu1 }
 0x339   : > { %v1143_v3 = vmul.f32 %v1139_v37, %v3191_v51  ;;  %v1131_v5 = vadd.f32 %v1130_v12, %v1053_v61  ;;  %v1132_v7 = vpop.f32.mrb[6].mxu1  ;;  %v1144_v10 = vmul.f32 %v1140_v4, %v3193_v22 }
 0x33a   : > { %v1145_v6 = vadd.f32 %v1141_v48, %v1129_v24  ;;  %v1133_v8 = vadd.f32 %v1132_v7, %v1058_v1  ;;  %v1134_v9 = vpop.f32.mrb[7].mxu1 }
 0x33b   : > { %v1146_v14 = vadd.f32 %v1142_v2, %v1131_v5  ;;  %v1135_v15 = vadd.f32 %v1134_v9, %v1058_v1 }
 0x33c   : > { %vm1149_vm9 = vcmp.gt.f32.partialorder %v1145_v6, 0.0  ;;  %v1153_v16 = vmul.f32 0.2, %v1145_v6  ;;  %v1147_v17 = vadd.f32 %v1143_v3, %v1133_v8 }
 0x33d   : > { %v1154_v18 = vmul.f32 0.2, %v1146_v14  ;;  %v1148_v19 = vadd.f32 %v1144_v10, %v1135_v15  ;;  %vm1150_vm10 = vcmp.gt.f32.partialorder %v1146_v14, 0.0 }
 0x33e   : > { %v3199_v20 = vsel %vm1149_vm9, %v1145_v6, %v1153_v16  ;;  %vm1151_vm11 = vcmp.gt.f32.partialorder %v1147_v17, 0.0  ;;  %v1155_v21 = vmul.f32 0.2, %v1147_v17 }
 0x33f   : > { %vm1152_vm12 = vcmp.gt.f32.partialorder %v1148_v19, 0.0  ;;  %v1156_v40 = vmul.f32 0.2, %v1148_v19  ;;  %1163 = vrot.lane.b32.xlu0 %v3199_v20, %s2407_s29  ;;  %v3205_v11 = vsel %vm1150_vm10, %v1146_v14, %v1154_v18 }
 0x340   : > { %v3203_v41 = vsel %vm1151_vm11, %v1147_v17, %v1155_v21 }
 0x341   : > { %v3207_v43 = vsel %vm1152_vm12, %v1148_v19, %v1156_v40  ;;  %1165 = vrot.lane.b32.xlu1 %v3203_v41, %s2407_s29  ;;  %v1235_v47 = vpack.c.bf16 %v3203_v41, %v3199_v20 }
 0x342   : > { %v1236_v44 = vpack.c.bf16 %v3207_v43, %v3205_v11 }
 0x343   : > { %1181 = vrot.lane.b32.xlu0 %v3199_v20, %s3778_s8 }
 0x345   : > { %1183 = vrot.lane.b32.xlu1 %v3203_v41, %s3778_s8 }
 0x347   : > { %1199 = vrot.lane.b32.xlu0 %v3199_v20, %s2408_s23 }
 0x349   : > { %1201 = vrot.lane.b32.xlu1 %v3203_v41, %s2408_s23 }
 0x34b   : > { %1217 = vrot.lane.b32.xlu0 %v3199_v20, %s2409_s16 }
 0x34d   : > { %1219 = vrot.lane.b32.xlu1 %v3203_v41, %s2409_s16 }
 0x34f   : > { %1237 = vrot.lane.b32.xlu0 %v3199_v20, %s3821_s28 }
 0x351   : > { %1239 = vrot.lane.b32.xlu1 %v3203_v41, %s3821_s28 }
 0x353   : > { %v1440_v54 = vpop.f32.mrb[8].mxu1  ;;  %1255 = vrot.lane.b32.xlu0 %v3199_v20, %s2411_s18 }
 0x354   : > { %v1442_v46 = vpop.f32.mrb[9].mxu1  ;;  %v1441_v60 = vadd.f32 %v1440_v54, %v1387_v36 }
 0x355   : > { %v1444_v59 = vpop.f32.mrb[10].mxu1  ;;  %1257 = vrot.lane.b32.xlu1 %v3203_v41, %s2411_s18  ;;  %v1443_v29 = vadd.f32 %v1442_v46, %v1387_v36 }
 0x356   : > { %v1446_v13 = vpop.f32.mrb[11].mxu1  ;;  %v1445_v50 = vadd.f32 %v1444_v59, %v1392_v35  ;;  %v3274_v61 = vmax.f32 %v1441_v60, 0.0 }
 0x357   : > { %1273 = vrot.lane.b32.xlu0 %v3199_v20, %s2412_s9  ;;  %v1447_v39 = vadd.f32 %v1446_v13, %v1392_v35  ;;  %v3306_v53 = vmax.f32 %v1443_v29, 0.0  ;;  %v3825_v35 = vld [vmem:[#allocation20_spill] sm:$0xff] }
 0x358   : > { %v3278_v49 = vmax.f32 %v1445_v50, 0.0 }
 0x359   : > { %1275 = vrot.lane.b32.xlu1 %v3203_v41, %s2412_s9  ;;  %v3310_v30 = vmax.f32 %v1447_v39, 0.0 }
 0x35b   : > { %1291 = vrot.lane.b32.xlu0 %v3199_v20, %s3822_s14 }
 0x35d   : > { %1293 = vrot.lane.b32.xlu1 %v3203_v41, %s3822_s14 }
 0x35f   : > { %1167 = vrot.lane.b32.xlu0 %v3205_v11, %s2407_s29 }
 0x361   : > { %1169 = vrot.lane.b32.xlu1 %v3207_v43, %s2407_s29 }
 0x363   : > { %1185 = vrot.lane.b32.xlu0 %v3205_v11, %s3778_s8 }
 0x365   : > { %1187 = vrot.lane.b32.xlu1 %v3207_v43, %s3778_s8 }
 0x367   : > { %1203 = vrot.lane.b32.xlu0 %v3205_v11, %s2408_s23 }
 0x369   : > { %1205 = vrot.lane.b32.xlu1 %v3207_v43, %s2408_s23 }
 0x36b   : > { %1221 = vrot.lane.b32.xlu0 %v3205_v11, %s2409_s16 }
 0x36d   : > { %1223 = vrot.lane.b32.xlu1 %v3207_v43, %s2409_s16 }
 0x36f   : > { %1241 = vrot.lane.b32.xlu0 %v3205_v11, %s3821_s28 }
 0x371   : > { %1243 = vrot.lane.b32.xlu1 %v3207_v43, %s3821_s28 }
 0x373   : > { %1259 = vrot.lane.b32.xlu0 %v3205_v11, %s2411_s18 }
 0x375   : > { %1261 = vrot.lane.b32.xlu1 %v3207_v43, %s2411_s18 }
 0x377   : > { %1277 = vrot.lane.b32.xlu0 %v3205_v11, %s2412_s9 }
 0x379   : > { %1279 = vrot.lane.b32.xlu1 %v3207_v43, %s2412_s9 }
 0x37b   : > { %1295 = vrot.lane.b32.xlu0 %v3205_v11, %s3822_s14 }
 0x37d   : > { %1297 = vrot.lane.b32.xlu1 %v3207_v43, %s3822_s14 }
 0x37f   : > { %1457 = vrot.lane.b32.xlu0 %v3274_v61, %s2407_s29 }
 0x381   : > { %1459 = vrot.lane.b32.xlu1 %v3278_v49, %s2407_s29 }
 0x383   : > { %1475 = vrot.lane.b32.xlu0 %v3274_v61, %s3778_s8 }
 0x385   : > { %1477 = vrot.lane.b32.xlu1 %v3278_v49, %s3778_s8 }
 0x387   : > { %1493 = vrot.lane.b32.xlu0 %v3274_v61, %s2408_s23 }
 0x389   : > { %1495 = vrot.lane.b32.xlu1 %v3278_v49, %s2408_s23 }
 0x38b   : > { %1511 = vrot.lane.b32.xlu0 %v3274_v61, %s2409_s16 }
 0x38d   : > { %1513 = vrot.lane.b32.xlu1 %v3278_v49, %s2409_s16 }
 0x38f   : > { %1531 = vrot.lane.b32.xlu0 %v3274_v61, %s3821_s28 }
 0x391   : > { %1533 = vrot.lane.b32.xlu1 %v3278_v49, %s3821_s28 }
 0x393   : > { %1549 = vrot.lane.b32.xlu0 %v3274_v61, %s2411_s18 }
 0x395   : > { %1551 = vrot.lane.b32.xlu1 %v3278_v49, %s2411_s18 }
 0x397   : > { %1567 = vrot.lane.b32.xlu0 %v3274_v61, %s2412_s9 }
 0x399   : > { %1569 = vrot.lane.b32.xlu1 %v3278_v49, %s2412_s9 }
 0x39b   : > { %1461 = vrot.lane.b32.xlu0 %v3306_v53, %s2407_s29 }
 0x39d   : > { %1463 = vrot.lane.b32.xlu1 %v3310_v30, %s2407_s29  ;;  %s3824_s29 = sld [smem:[#allocation25_spill]] }
 0x39f   : > { %1479 = vrot.lane.b32.xlu0 %v3306_v53, %s3778_s8 }
 0x3a1   : > { %1481 = vrot.lane.b32.xlu1 %v3310_v30, %s3778_s8 }
 0x3a3   : > { %1497 = vrot.lane.b32.xlu0 %v3306_v53, %s2408_s23  ;;  %v1161_v10 = vld [vmem:[%s3824_s29] sm:$0xff]  ;;  %v1162_v15 = vld [vmem:[%s3824_s29 + $0x8] sm:$0xff] }
 0x3a5   : > { %1499 = vrot.lane.b32.xlu1 %v3310_v30, %s2408_s23 }
 0x3a7   : > { %1515 = vrot.lane.b32.xlu0 %v3306_v53, %s2409_s16 }
 0x3a9   : > { %1517 = vrot.lane.b32.xlu1 %v3310_v30, %s2409_s16  ;;  %s3823_s16 = sld [smem:[#allocation28_spill]] }
 0x3ab   : > { %1585 = vrot.lane.b32.xlu0 %v3274_v61, %s3822_s14 }
 0x3ad   : > { %1587 = vrot.lane.b32.xlu1 %v3278_v49, %s3822_s14 }
 0x3af   : > { %1535 = vrot.lane.b32.xlu0 %v3306_v53, %s3821_s28  ;;  %v1453_v2 = vld [vmem:[%s3823_s16] sm:$0xff]  ;;  %v1454_v4 = vld [vmem:[%s3823_s16 + $0x8] sm:$0xff]  ;;  %v1455_v7 = vld [vmem:[%s3823_s16 + $0x10] sm:$0xff] }
 0x3b0   : > { %v1456_v8 = vld [vmem:[%s3823_s16 + $0x18] sm:$0xff] }
 0x3b1   : > { %1537 = vrot.lane.b32.xlu1 %v3310_v30, %s3821_s28  ;;  %v1164_v37 = vpop.permute.xlu0 %1163 }
 0x3b3   : > { %v1166_v23 = vpop.permute.xlu1 %1165  ;;  %1553 = vrot.lane.b32.xlu0 %v3306_v53, %s2411_s18 }
 0x3b5   : > { %1555 = vrot.lane.b32.xlu1 %v3310_v30, %s2411_s18  ;;  %v1182_v48 = vpop.permute.xlu0 %1181 }
 0x3b7   : > { %v1184_v24 = vpop.permute.xlu1 %1183  ;;  %1571 = vrot.lane.b32.xlu0 %v3306_v53, %s2412_s9 }
 0x3b9   : > { %1573 = vrot.lane.b32.xlu1 %v3310_v30, %s2412_s9  ;;  %v1200_v12 = vpop.permute.xlu0 %1199  ;;  %s3633_s9 = scalar_lea.vmem [#allocation10], %s3777_s25  ;;  %s3827_s25 = sld [smem:[#allocation30_spill]] }
 0x3ba   : > { %s1794_s28 = sshll.u32 %s3633_s9, 4  ;;  %s3648_s28 = int_to_ptr.vmem [resolvable:$true] %s1794_s28 }
 0x3bb   : > { %v1202_v1 = vpop.permute.xlu1 %1201  ;;  %1589 = vrot.lane.b32.xlu0 %v3306_v53, %s3822_s14  ;;  %s2291_s1 = scalar_lea.vmem %s3648_s28, 512 }
 0x3bc   : > { %p2292_p3 = scmp.ne.s32.totalorder %s3648_s28, %s2291_s1 }
 0x3bd   : > { %1591 = vrot.lane.b32.xlu1 %v3310_v30, %s3822_s14  ;;  %v1218_v3 = vpop.permute.xlu0 %1217  ;;  %s3780_s14 = sshll.u32 %s2518_s22, 9 }
 0x3be   : > { %p2293_p7 = pnand %p2292_p3, %p2651_p5 }
 0x3bf   : > { %v3354_v5 = vpop.permute.xlu1 %1219  ;;  %1609 = vperm.xlu0 %2122, %v1453_v2   ;;  %s3656_s8 = scalar_lea.hbm %s3827_s25, %s3780_s14 }
 0x3c0   : > { %p2294_p12 = pneg %p2293_p7 }
 0x3c1   : > { %1614 = vperm.xlu1 %2123, %v1454_v4   ;;  %v3359_v6 = vpop.permute.xlu0 %1237 }
 0x3c3   : > { %v3364_v9 = vpop.permute.xlu1 %1239  ;;  %1619 = vperm.xlu0 %2122, %v1455_v7  }
 0x3c5   : > { %1624 = vperm.xlu1 %2123, %v1456_v8   ;;  %v3369_v14 = vpop.permute.xlu0 %1255 }
 0x3c7   : > { %v3374_v16 = vpop.permute.xlu1 %1257  ;;  %1313 = vperm.xlu0 %2122, %v1161_v10  }
 0x3c9   : > { %1318 = vperm.xlu1 %2123, %v1162_v15   ;;  %v3376_v17 = vpop.permute.xlu0 %1273 }
 0x3cb   : > { %v3378_v18 = vpop.permute.xlu1 %1275 }
 0x3cd   : > { %v3380_v19 = vpop.permute.xlu0 %1291 }
 0x3cf   : > { %v3382_v21 = vpop.permute.xlu1 %1293 }
 0x3d1   : > { %v1168_v40 = vpop.permute.xlu0 %1167 }
 0x3d2   : > { %v1171_v54 = vsel %vm826_vm1, %v1164_v37, %v1168_v40  ;;  %v1173_v46 = vsel %vm826_vm1, %v1168_v40, %v1164_v37 }
 0x3d3   : > { %v1170_v59 = vpop.permute.xlu1 %1169  ;;  %v1175_v60 = vmul.f32 %v1173_v46, %v2945_v27  ;;  %v1176_v25 = vmul.f32 %v1171_v54, %v3825_v35 }
 0x3d4   : > { %v1172_v13 = vsel %vm826_vm1, %v1166_v23, %v1170_v59  ;;  %v1174_v36 = vsel %vm826_vm1, %v1170_v59, %v1166_v23 }
 0x3d5   : > { %v1177_v50 = vmul.f32 %v1174_v36, %v2945_v27  ;;  %v1178_v29 = vmul.f32 %v1172_v13, %v3825_v35  ;;  %v1186_v39 = vpop.permute.xlu0 %1185 }
 0x3d6   : > { %v1189_v2 = vsel %vm853_vm2, %v1182_v48, %v1186_v39  ;;  %v1191_v37 = vsel %vm853_vm2, %v1186_v39, %v1182_v48 }
 0x3d7   : > { %v1179_v4 = vpack.c.bf16 %v1177_v50, %v1175_v60  ;;  %v1188_v7 = vpop.permute.xlu1 %1187  ;;  %v1180_v8 = vpack.c.bf16 %v1178_v29, %v1176_v25  ;;  %v1193_v15 = vmul.f32 %v1191_v37, %v2960_v45  ;;  %v1194_v40 = vmul.f32 %v1189_v2, %v2963_v52 }
 0x3d8   : > { %v1190_v23 = vsel %vm853_vm2, %v1184_v24, %v1188_v7  ;;  %v1192_v10 = vsel %vm853_vm2, %v1188_v7, %v1184_v24 }
 0x3d9   : > { %v1195_v54 = vmul.f32 %v1192_v10, %v2960_v45  ;;  %v1196_v46 = vmul.f32 %v1190_v23, %v2963_v52  ;;  %1333 = vmatprep.subr.bf16.mxu0 %v1180_v8  ;;  %v1204_v59 = vpop.permute.xlu0 %1203 }
 0x3da   : > { %v1207_v48 = vsel %vm880_vm3, %v1200_v12, %v1204_v59  ;;  %v1209_v13 = vsel %vm880_vm3, %v1204_v59, %v1200_v12  ;;  %1334 = vmatpush1.bf16.msra.mxu0 %v1179_v4 }
 0x3db   : > { %v1197_v36 = vpack.c.bf16 %v1195_v54, %v1193_v15  ;;  %v1206_v60 = vpop.permute.xlu1 %1205  ;;  %v1198_v24 = vpack.c.bf16 %v1196_v46, %v1194_v40  ;;  %v1211_v29 = vmul.f32 %v1209_v13, %v2979_v0  ;;  %v1212_v39 = vmul.f32 %v1207_v48, %v2982_v56 }
 0x3dc   : > { %v1208_v25 = vsel %vm880_vm3, %v1202_v1, %v1206_v60  ;;  %v1210_v50 = vsel %vm880_vm3, %v1206_v60, %v1202_v1 }
 0x3dd   : > { %v1213_v2 = vmul.f32 %v1210_v50, %v2979_v0  ;;  %v1214_v37 = vmul.f32 %v1208_v25, %v2982_v56  ;;  %1335 = vmatprep.subr.bf16.mxu0 %v1198_v24  ;;  %v1222_v12 = vpop.permute.xlu0 %1221 }
 0x3de   : > { %v1225_v4 = vsel %vm907_vm4, %v1218_v3, %v1222_v12  ;;  %v1227_v7 = vsel %vm907_vm4, %v1222_v12, %v1218_v3  ;;  %1336 = vmatpush1.bf16.msra.mxu0 %v1197_v36 }
 0x3df   : > { %v1215_v8 = vpack.c.bf16 %v1213_v2, %v1211_v29  ;;  %v1224_v23 = vpop.permute.xlu1 %1223  ;;  %v1216_v1 = vpack.c.bf16 %v1214_v37, %v1212_v39  ;;  %v1229_v40 = vmul.f32 %v1227_v7, %v3003_v26  ;;  %v1230_v54 = vmul.f32 %v1225_v4, %v3006_v42 }
 0x3e0   : > { %v1226_v10 = vsel %vm907_vm4, %v3354_v5, %v1224_v23  ;;  %v1228_v15 = vsel %vm907_vm4, %v1224_v23, %v3354_v5 }
 0x3e1   : > { %v1231_v46 = vmul.f32 %v1228_v15, %v3003_v26  ;;  %v1232_v3 = vmul.f32 %v1226_v10, %v3006_v42  ;;  %1337 = vmatprep.subr.bf16.mxu0 %v1216_v1  ;;  %v1242_v59 = vpop.permute.xlu0 %1241 }
 0x3e2   : > { %1338 = vmatpush1.bf16.msra.mxu0 %v1215_v8  ;;  %v1247_v60 = vsel %vm936_vm5, %v1242_v59, %v3359_v6  ;;  %v1245_v29 = vsel %vm936_vm5, %v3359_v6, %v1242_v59 }
 0x3e3   : > { %v1233_v48 = vpack.c.bf16 %v1231_v46, %v1229_v40  ;;  %v1244_v13 = vpop.permute.xlu1 %1243  ;;  %v1234_v36 = vpack.c.bf16 %v1232_v3, %v1230_v54  ;;  %v1250_v39 = vmul.f32 %v1247_v60, %v3043_v28  ;;  %v1249_v11 = vmul.f32 %v1245_v29, %v3040_v58 }
 0x3e4   : > { %v1248_v5 = vsel %vm936_vm5, %v1244_v13, %v3364_v9  ;;  %v1246_v24 = vsel %vm936_vm5, %v3364_v9, %v1244_v13 }
 0x3e5   : > { %v1252_v25 = vmul.f32 %v1248_v5, %v3043_v28  ;;  %1339 = vmatprep.subr.bf16.mxu0 %v1234_v36  ;;  %v1260_v50 = vpop.permute.xlu0 %1259  ;;  %v1251_v37 = vmul.f32 %v1246_v24, %v3040_v58 }
 0x3e6   : > { %1340 = vmatpush1.bf16.msra.mxu0 %v1233_v48  ;;  %v1265_v9 = vsel %vm963_vm6, %v1260_v50, %v3369_v14  ;;  %v1263_v43 = vsel %vm963_vm6, %v3369_v14, %v1260_v50 }
 0x3e7   : > { %v1262_v2 = vpop.permute.xlu1 %1261  ;;  %1341 = vmatprep.subr.bf16.mxu0 %v1236_v44  ;;  %v1254_v8 = vpack.c.bf16 %v1252_v25, %v1250_v39  ;;  %v1268_v44 = vmul.f32 %v1265_v9, %v3059_v33  ;;  %v1253_v1 = vpack.c.bf16 %v1251_v37, %v1249_v11  ;;  %v1267_v40 = vmul.f32 %v1263_v43, %v3053_v55 }
 0x3e8   : > { %v1266_v12 = vsel %vm963_vm6, %v1262_v2, %v3374_v16  ;;  %v1264_v6 = vsel %vm963_vm6, %v3374_v16, %v1262_v2 }
 0x3e9   : > { %v1270_v4 = vmul.f32 %v1266_v12, %v3059_v33  ;;  %v1278_v7 = vpop.permute.xlu0 %1277  ;;  %v1269_v16 = vmul.f32 %v1264_v6, %v3053_v55 }
 0x3ea   : > { %1342 = vmatpush1.bf16.msra.mxu0 %v1235_v47  ;;  %v1283_v10 = vsel %vm990_vm7, %v1278_v7, %v3376_v17  ;;  %v1281_v54 = vsel %vm990_vm7, %v3376_v17, %v1278_v7  ;;  %v2165_v7 = vld [vmem:[#allocation7] ss:$8 sps:$4 sm:$0xff]  }
 0x3eb   : > { %v1280_v23 = vpop.permute.xlu1 %1279  ;;  %1343 = vmatprep.subr.bf16.mxu0 %v1254_v8  ;;  %v1272_v15 = vpack.c.bf16 %v1270_v4, %v1268_v44  ;;  %v1286_v46 = vmul.f32 %v1283_v10, %v3086_v31  ;;  %v1271_v59 = vpack.c.bf16 %v1269_v16, %v1267_v40  ;;  %v1285_v24 = vmul.f32 %v1281_v54, %v3083_v38  ;;  %v2166_v8 = vld [vmem:[#allocation8 + $0x4] ss:$8 sps:$4 sm:$0xff]  }
 0x3ec   : > { %v1284_v20 = vsel %vm990_vm7, %v1280_v23, %v3378_v18  ;;  %v1282_v41 = vsel %vm990_vm7, %v3378_v18, %v1280_v23 }
 0x3ed   : > { %v1288_v47 = vmul.f32 %v1284_v20, %v3086_v31  ;;  %v1296_v14 = vpop.permute.xlu0 %1295  ;;  %v1287_v48 = vmul.f32 %v1282_v41, %v3083_v38 }
 0x3ee   : > { %1344 = vmatpush1.bf16.msra.mxu0 %v1253_v1  ;;  %v1301_v18 = vsel %vm1017_vm8, %v1296_v14, %v3380_v19  ;;  %v1299_v25 = vsel %vm1017_vm8, %v3380_v19, %v1296_v14 }
 0x3ef   : > { %v1298_v3 = vpop.permute.xlu1 %1297  ;;  %1345 = vmatprep.subr.bf16.mxu0 %v1272_v15  ;;  %v1290_v5 = vpack.c.bf16 %v1288_v47, %v1286_v46  ;;  %v1304_v50 = vmul.f32 %v3123_v62, %v1301_v18  ;;  %v1289_v39 = vpack.c.bf16 %v1287_v48, %v1285_v24  ;;  %v1303_v9 = vmul.f32 %v3118_v32, %v1299_v25 }
 0x3f0   : > { %v1302_v13 = vsel %vm1017_vm8, %v1298_v3, %v3382_v21  ;;  %v1300_v36 = vsel %vm1017_vm8, %v3382_v21, %v1298_v3 }
 0x3f1   : > { %v1306_v17 = vmul.f32 %v3123_v62, %v1302_v13  ;;  %v1458_v60 = vpop.permute.xlu0 %1457  ;;  %v1305_v2 = vmul.f32 %v3118_v32, %v1300_v36 }
 0x3f2   : > { %1346 = vmatpush1.bf16.msra.mxu0 %v1271_v59 }
 0x3f3   : > { %v1460_v29 = vpop.permute.xlu1 %1459  ;;  %1347 = vmatprep.subr.bf16.mxu0 %v1290_v5  ;;  %v1308_v21 = vpack.c.bf16 %v1306_v17, %v1304_v50  ;;  %v1307_v6 = vpack.c.bf16 %v1305_v2, %v1303_v9 }
 0x3f5   : > { %v1476_v37 = vpop.permute.xlu0 %1475 }
 0x3f6   : > { %1348 = vmatpush1.bf16.msra.mxu0 %v1289_v39 }
 0x3f7   : > { %v1478_v12 = vpop.permute.xlu1 %1477  ;;  %1349 = vmatprep.subr.bf16.mxu0 %v1308_v21 }
 0x3f9   : > { %v1494_v4 = vpop.permute.xlu0 %1493 }
 0x3fa   : > { %1350 = vmatpush1.bf16.msra.mxu0 %v1307_v6 }
 0x3fb   : > { %v1496_v19 = vpop.permute.xlu1 %1495 }
 0x3fd   : > { %1366 = vmatmul.mubr.bf16.vlgmr.msra.gmra.mrb[4].mxu0 %v2165_v7  ;;  %v1512_v11 = vpop.permute.xlu0 %1511 }
 0x3fe   : > { %2010 = vmatprep.mubr.msk.bf16.mxu0 %vm761_vm0, %v2166_v8 }
 0x3ff   : > { %v1514_v43 = vpop.permute.xlu1 %1513 }
 0x401   : > { %v3505_v44 = vpop.permute.xlu0 %1531 }
 0x403   : > { %v3507_v23 = vpop.permute.xlu1 %1533 }
 0x405   : > { %v3509_v1 = vpop.permute.xlu0 %1549 }
 0x407   : > { %v3511_v16 = vpop.permute.xlu1 %1551 }
 0x409   : > { %v3513_v10 = vpop.permute.xlu0 %1567 }
 0x40b   : > { %v3515_v20 = vpop.permute.xlu1 %1569 }
 0x40d   : > { %v1462_v41 = vpop.permute.xlu0 %1461 }
 0x40e   : > { %v1465_v47 = vsel %vm826_vm1, %v1458_v60, %v1462_v41  ;;  %v1467_v14 = vsel %vm826_vm1, %v1462_v41, %v1458_v60 }
 0x40f   : > { %v1464_v15 = vpop.permute.xlu1 %1463  ;;  %v1469_v46 = vmul.f32 %v1467_v14, %v2945_v27  ;;  %v1470_v3 = vmul.f32 %v1465_v47, %v3825_v35 }
 0x410   : > { %v1466_v40 = vsel %vm826_vm1, %v1460_v29, %v1464_v15  ;;  %v1468_v54 = vsel %vm826_vm1, %v1464_v15, %v1460_v29 }
 0x411   : > { %v1471_v59 = vmul.f32 %v1468_v54, %v2945_v27  ;;  %v1472_v48 = vmul.f32 %v1466_v40, %v3825_v35  ;;  %v1480_v18 = vpop.permute.xlu0 %1479 }
 0x412   : > { %v1483_v13 = vsel %vm853_vm2, %v1476_v37, %v1480_v18  ;;  %v1485_v36 = vsel %vm853_vm2, %v1480_v18, %v1476_v37 }
 0x413   : > { %v1473_v17 = vpack.c.bf16 %v1471_v59, %v1469_v46  ;;  %v1482_v60 = vpop.permute.xlu1 %1481  ;;  %v1474_v5 = vpack.c.bf16 %v1472_v48, %v1470_v3  ;;  %v1487_v27 = vmul.f32 %v1485_v36, %v2960_v45  ;;  %v1488_v35 = vmul.f32 %v1483_v13, %v2963_v52 }
 0x414   : > { %v1484_v24 = vsel %vm853_vm2, %v1478_v12, %v1482_v60  ;;  %v1486_v25 = vsel %vm853_vm2, %v1482_v60, %v1478_v12 }
 0x415   : > { %v1489_v50 = vmul.f32 %v1486_v25, %v2960_v45  ;;  %v1490_v29 = vmul.f32 %v1484_v24, %v2963_v52  ;;  %1651 = vmatprep.subr.bf16.mxu0 %v1474_v5  ;;  %v1498_v39 = vpop.permute.xlu0 %1497 }
 0x416   : > { %v1501_v2 = vsel %vm880_vm3, %v1494_v4, %v1498_v39  ;;  %v1503_v37 = vsel %vm880_vm3, %v1498_v39, %v1494_v4  ;;  %1652 = vmatpush1.bf16.msra.mxu0 %v1473_v17  ;;  %v1530_v17 = vpack.c.bf16 %v3310_v30, %v3306_v53  ;;  %v1529_v53 = vpack.c.bf16 %v3278_v49, %v3274_v61 }
 0x417   : > { %v1491_v21 = vpack.c.bf16 %v1489_v50, %v1487_v27  ;;  %v1500_v9 = vpop.permute.xlu1 %1499  ;;  %v1492_v12 = vpack.c.bf16 %v1490_v29, %v1488_v35  ;;  %v1505_v52 = vmul.f32 %v1503_v37, %v2979_v0  ;;  %v1506_v7 = vmul.f32 %v1501_v2, %v2982_v56 }
 0x418   : > { %v1502_v6 = vsel %vm880_vm3, %v1496_v19, %v1500_v9  ;;  %v1504_v45 = vsel %vm880_vm3, %v1500_v9, %v1496_v19 }
 0x419   : > { %v1507_v8 = vmul.f32 %v1504_v45, %v2979_v0  ;;  %v1508_v41 = vmul.f32 %v1502_v6, %v2982_v56  ;;  %1653 = vmatprep.subr.bf16.mxu0 %v1492_v12  ;;  %v1516_v4 = vpop.permute.xlu0 %1515 }
 0x41a   : > { %v1519_v47 = vsel %vm907_vm4, %v1512_v11, %v1516_v4  ;;  %v1521_v14 = vsel %vm907_vm4, %v1516_v4, %v1512_v11  ;;  %1654 = vmatpush1.bf16.msra.mxu0 %v1491_v21 }
 0x41b   : > { %v1509_v15 = vpack.c.bf16 %v1507_v8, %v1505_v52  ;;  %v1518_v40 = vpop.permute.xlu1 %1517  ;;  %v1510_v19 = vpack.c.bf16 %v1508_v41, %v1506_v7  ;;  %v1523_v56 = vmul.f32 %v1521_v14, %v3003_v26  ;;  %v1524_v46 = vmul.f32 %v1519_v47, %v3006_v42 }
 0x41c   : > { %v1520_v54 = vsel %vm907_vm4, %v1514_v43, %v1518_v40  ;;  %v1522_v0 = vsel %vm907_vm4, %v1518_v40, %v1514_v43 }
 0x41d   : > { %v1525_v3 = vmul.f32 %v1522_v0, %v3003_v26  ;;  %v1526_v59 = vmul.f32 %v1520_v54, %v3006_v42  ;;  %1655 = vmatprep.subr.bf16.mxu0 %v1510_v19  ;;  %v1586_v11 = vpop.permute.xlu0 %1585 }
 0x41e   : > { %1656 = vmatpush1.bf16.msra.mxu0 %v1509_v15 }
 0x41f   : > { %v1527_v48 = vpack.c.bf16 %v1525_v3, %v1523_v56  ;;  %v1588_v18 = vpop.permute.xlu1 %1587  ;;  %v1528_v13 = vpack.c.bf16 %v1526_v59, %v1524_v46  ;;  %v2168_v46 = vld [vmem:[#allocation8] ss:$8 sps:$4 sm:$0xff]   ;;  %v2169_v3 = vld [vmem:[#allocation8 + $0x14] ss:$8 sps:$4 sm:$0xff]  }
 0x421   : > { %1657 = vmatprep.subr.bf16.mxu0 %v1528_v13  ;;  %v1536_v36 = vpop.permute.xlu0 %1535 }
 0x422   : > { %v1539_v43 = vsel %vm936_vm5, %v3505_v44, %v1536_v36  ;;  %v1541_v26 = vsel %vm936_vm5, %v1536_v36, %v3505_v44  ;;  %1658 = vmatpush1.bf16.msra.mxu0 %v1527_v48 }
 0x423   : > { %v1538_v42 = vpop.permute.xlu1 %1537  ;;  %1659 = vmatprep.subr.bf16.mxu0 %v1530_v17  ;;  %v1543_v30 = vmul.f32 %v1539_v43, %v3040_v58  ;;  %v1544_v24 = vmul.f32 %v1541_v26, %v3043_v28 }
 0x424   : > { %v1540_v60 = vsel %vm936_vm5, %v3507_v23, %v1538_v42  ;;  %v1542_v5 = vsel %vm936_vm5, %v1538_v42, %v3507_v23 }
 0x425   : > { %v1545_v44 = vmul.f32 %v1540_v60, %v3040_v58  ;;  %v1546_v25 = vmul.f32 %v1542_v5, %v3043_v28  ;;  %v1554_v27 = vpop.permute.xlu0 %1553 }
 0x426   : > { %v1557_v35 = vsel %vm963_vm6, %v3509_v1, %v1554_v27  ;;  %v1559_v23 = vsel %vm963_vm6, %v1554_v27, %v3509_v1  ;;  %1660 = vmatpush1.bf16.msra.mxu0 %v1529_v53 }
 0x427   : > { %v1547_v50 = vpack.c.bf16 %v1545_v44, %v1543_v30  ;;  %v1556_v61 = vpop.permute.xlu1 %1555  ;;  %v1548_v49 = vpack.c.bf16 %v1546_v25, %v1544_v24  ;;  %v1561_v28 = vmul.f32 %v1557_v35, %v3053_v55  ;;  %v1562_v39 = vmul.f32 %v1559_v23, %v3059_v33 }
 0x428   : > { %v1558_v29 = vsel %vm963_vm6, %v3511_v16, %v1556_v61  ;;  %v1560_v58 = vsel %vm963_vm6, %v1556_v61, %v3511_v16 }
 0x429   : > { %v1563_v2 = vmul.f32 %v1558_v29, %v3053_v55  ;;  %v1564_v1 = vmul.f32 %v1560_v58, %v3059_v33  ;;  %1661 = vmatprep.subr.bf16.mxu0 %v1548_v49  ;;  %v1572_v37 = vpop.permute.xlu0 %1571 }
 0x42a   : > { %v1575_v21 = vsel %vm990_vm7, %v3513_v10, %v1572_v37  ;;  %v1577_v9 = vsel %vm990_vm7, %v1572_v37, %v3513_v10  ;;  %1662 = vmatpush1.bf16.msra.mxu0 %v1547_v50 }
 0x42b   : > { %v1565_v16 = vpack.c.bf16 %v1563_v2, %v1561_v28  ;;  %v1574_v12 = vpop.permute.xlu1 %1573  ;;  %v1566_v6 = vpack.c.bf16 %v1564_v1, %v1562_v39  ;;  %v1579_v45 = vmul.f32 %v1575_v21, %v3083_v38  ;;  %v1580_v52 = vmul.f32 %v1577_v9, %v3086_v31 }
 0x42c   : > { %v1576_v55 = vsel %vm990_vm7, %v3515_v20, %v1574_v12  ;;  %v1578_v33 = vsel %vm990_vm7, %v1574_v12, %v3515_v20 }
 0x42d   : > { %v1581_v7 = vmul.f32 %v1576_v55, %v3083_v38  ;;  %v1582_v10 = vmul.f32 %v1578_v33, %v3086_v31  ;;  %1663 = vmatprep.subr.bf16.mxu0 %v1566_v6  ;;  %v1590_v8 = vpop.permute.xlu0 %1589 }
 0x42e   : > { %v1593_v41 = vsel %vm1017_vm8, %v1586_v11, %v1590_v8  ;;  %v1595_v4 = vsel %vm1017_vm8, %v1590_v8, %v1586_v11  ;;  %1664 = vmatpush1.bf16.msra.mxu0 %v1565_v16 }
 0x42f   : > { %v1583_v47 = vpack.c.bf16 %v1581_v7, %v1579_v45  ;;  %v1592_v14 = vpop.permute.xlu1 %1591  ;;  %v1584_v20 = vpack.c.bf16 %v1582_v10, %v1580_v52  ;;  %v1597_v31 = vmul.f32 %v3118_v32, %v1593_v41  ;;  %v1598_v40 = vmul.f32 %v3123_v62, %v1595_v4 }
 0x430   : > { %v1594_v15 = vsel %vm1017_vm8, %v1588_v18, %v1592_v14  ;;  %v1596_v38 = vsel %vm1017_vm8, %v1592_v14, %v1588_v18 }
 0x431   : > { %v1599_v19 = vmul.f32 %v3118_v32, %v1594_v15  ;;  %v1600_v54 = vmul.f32 %v3123_v62, %v1596_v38  ;;  %1665 = vmatprep.subr.bf16.mxu0 %v1584_v20 }
 0x432   : > { %1666 = vmatpush1.bf16.msra.mxu0 %v1583_v47 }
 0x433   : > { %v1601_v0 = vpack.c.bf16 %v1599_v19, %v1597_v31  ;;  %v1602_v56 = vpack.c.bf16 %v1600_v54, %v1598_v40 }
 0x435   : > { %1667 = vmatprep.subr.bf16.mxu0 %v1602_v56 }
 0x436   : > { %1668 = vmatpush1.bf16.msra.mxu0 %v1601_v0 }
 0x439   : > { %1684 = vmatmul.mubr.bf16.vlgmr.msra.gmra.mrb[8].mxu0 %v2168_v46 }
 0x43a   : > { %2011 = vmatprep.mubr.msk.bf16.mxu0 %vm761_vm0, %v2169_v3 }
 0x43e   : > { %v1610_v59 = vpop.permute.xlu0 %1609 }
 0x440   : > { %v1615_v11 = vpop.permute.xlu1 %1614 }
 0x441   : > { %1694 = vmatmul.mubr.bf16.gmra.mrb[12].mxu0 %v2171_v63 }
 0x442   : > { %v1620_v32 = vpop.permute.xlu0 %1619 }
 0x444   : > { %v1625_v48 = vpop.permute.xlu1 %1624 }
 0x446   : > { %v1314_v62 = vpop.permute.xlu0 %1313 }
 0x448   : > { %v1319_v17 = vpop.permute.xlu1 %1318 }
 0x4d0   : > { %v1367_v18 = vpop.f32.mrb[4].mxu0 }
 0x4d1   : > { %v1368_v13 = vadd.f32 %v1367_v18, %v1314_v62  ;;  %v1369_v36 = vpop.f32.mrb[5].mxu0 }
 0x4d2   : > { %v1370_v43 = vadd.f32 %v1369_v36, %v1314_v62  ;;  %v1371_v26 = vpop.f32.mrb[6].mxu0 }
 0x4d3   : > { %1376 = vst [vmem:[%s3633_s9] sm:$0xff] %v1368_v13  ;;  %v1372_v42 = vadd.f32 %v1371_v26, %v1319_v17  ;;  %v1373_v60 = vpop.f32.mrb[7].mxu0 }
 0x4d4   : > { %1377 = vst [vmem:[%s3633_s9 + $0x8] sm:$0xff] %v1370_v43  ;;  %v1374_v5 = vadd.f32 %v1373_v60, %v1319_v17 }
 0x4d5   : > { %1378 = vst [vmem:[%s3633_s9 + $0x10] sm:$0xff] %v1372_v42 }
 0x4d6   : > { %1379 = vst [vmem:[%s3633_s9 + $0x18] sm:$0xff] %v1374_v5  ;;  %s2295_s9 = sshll.u32 %s2414_s24, 4  ;;  %s2296_s9 = int_to_ptr.vmem [resolvable:$false] %s2295_s9 }
 0x4d7   : > { %s2297_s15 = scalar_lea.vmem %s2296_s9, 1024  ;;  %p2298_p1 = scmp.lt.s32.totalorder %s3648_s28, %s2296_s9 }
 0x4d8   : > { %p2299_p2 = scmp.lt.s32.totalorder %s2297_s15, %s2291_s1 }
 0x4da   : > { %p2300_p4 = por %p2299_p2, %p2298_p1 }
 0x4dc   : > { %p2301_p9 = pnand %p2300_p4, %p2294_p12 }
 0x50c   : > { %v1685_v53 = vpop.f32.mrb[8].mxu0 }
 0x50d   : > { %v1686_v30 = vadd.f32 %v1685_v53, %v1610_v59  ;;  %v1687_v24 = vpop.f32.mrb[9].mxu0 }
 0x50e   : > { %v1688_v44 = vadd.f32 %v1687_v24, %v1610_v59  ;;  %v1689_v25 = vpop.f32.mrb[10].mxu0 }
 0x50f   : > { %v1690_v27 = vadd.f32 %v1689_v25, %v1615_v11  ;;  %v1691_v35 = vpop.f32.mrb[11].mxu0  ;;  %v1704_v50 = vadd.f32 1.0, %v1686_v30 }
 0x510   : > { %v1692_v23 = vadd.f32 %v1691_v35, %v1615_v11  ;;  %v1705_v61 = vadd.f32 1.0, %v1688_v44 }
 0x511   : > { %v1706_v49 = vadd.f32 1.0, %v1690_v27  ;;  %v1708_v28 = vmul.f32 %v1704_v50, %v3187_v34 }
 0x512   : > { %v1707_v29 = vadd.f32 1.0, %v1692_v23  ;;  %v1709_v1 = vmul.f32 %v1705_v61, %v3189_v57 }
 0x513   : > { %v1710_v9 = vmul.f32 %v1706_v49, %v3191_v51  ;;  %v2172_v51 = vld [vmem:[%s3826_s26] sm:$0xff]  }
 0x514   : > { %v1695_v58 = vpop.f32.mrb[12].mxu0  ;;  %v1711_v55 = vmul.f32 %v1707_v29, %v3193_v22 }
 0x515   : > { %v1696_v39 = vadd.f32 %v1695_v58, %v1620_v32  ;;  %v1697_v2 = vpop.f32.mrb[13].mxu0 }
 0x516   : > { %v1698_v37 = vadd.f32 %v1697_v2, %v1620_v32  ;;  %v1699_v21 = vpop.f32.mrb[14].mxu0 }
 0x517   : > { %v1712_v16 = vadd.f32 %v1708_v28, %v1696_v39  ;;  %v1700_v12 = vadd.f32 %v1699_v21, %v1625_v48  ;;  %v1701_v6 = vpop.f32.mrb[15].mxu0 }
 0x518   : > { %v1713_v33 = vadd.f32 %v1709_v1, %v1698_v37  ;;  %v1702_v45 = vadd.f32 %v1701_v6, %v1625_v48 }
 0x519   : > { %v1714_v34 = vadd.f32 %v1710_v9, %v1700_v12 }
 0x51a   : > { %v1715_v52 = vadd.f32 %v1711_v55, %v1702_v45 }
 0x51b   : > { %v1718_v7 = vpack.c.bf16 %v1714_v34, %v1712_v16 }
 0x51c   : > { %v1719_v57 = vpack.c.bf16 %v1715_v52, %v1713_v33 }
 0x51e   : > { %1728 = vmatprep.subr.bf16.mxu1 %v1719_v57 }
 0x51f   : > { %1729 = vmatpush1.bf16.msra.mxu1 %v1718_v7 }
 0x522   : > { %2013 = vmatmul.mubr.msk.bf16.vlgmr.msra.gmra.mrb[12].mxu1 %vm761_vm0, %v2172_v51 }
 0x523   : > { %2304 = shalt.err (!%p2301_p9)
}
 0x524   : > { %s2305_s26 = scalar_lea.hbm %s3656_s8, 512  ;;  %s2309_s24 = scalar_lea.hbm %s3827_s25, 1024 }
 0x525   : > { %p2306_p0 = scmp.ne.s32.totalorder %s3656_s8, %s2305_s26  ;;  %p2310_p13 = scmp.lt.u32.totalorder %s3656_s8, %s3827_s25 }
 0x526   : > { %p2311_p6 = scmp.lt.u32.totalorder %s2309_s24, %s2305_s26  ;;  %p2313_p3 = scmp.lt.u32.totalorder %s2305_s26, %s3656_s8 }
 0x527   : > { %p2307_p11 = pnand %p2306_p0, %p2651_p5 }
 0x528   : > { %p2312_p10 = por %p2311_p6, %p2310_p13 }
 0x529   : > { %p2308_p8 = pneg %p2307_p11 }
 0x52a   : > { %p2314_p7 = por %p2313_p3, %p2312_p10 }
 0x52c   : > { %p2315_p12 = pnand %p2314_p7, %p2308_p8 }
 0x52e   : > { %2318 = shalt.err (!%p2315_p12)
}
 0x52f   : > { %s3781_s1 = smov 256   ;;  %s3828_s15 = smov 16  }
 0x530   : > { %2042 = dma.vmem_to_hbm [thread:$0]  (%p2651_p5), %s3648_s28, 512, %s3656_s8, %s1776_s0, %s3781_s1, %s3781_s1, %s3828_s15  }
 0x531   : > { %s3829_s14 = sshll.u32 %s2702_s27, 5  ;;  %s3830_s18 = sshll.u32 %s2518_s22, 9 }
 0x532   : > { %s582_s26 = scalar_lea.vmem [#allocation11], %s3829_s14  ;;  %s3831_s2 = sld [smem:[#allocation31_spill]] }
 0x533   : > { %s1810_s23 = sshll.u32 %s582_s26, 4  ;;  %s1781_s0 = scalar_lea.sflag [#allocation12], %s2702_s27  ;;  %s3687_s23 = int_to_ptr.vmem [resolvable:$true] %s1810_s23 }
 0x534   : > { %s2319_s8 = scalar_lea.vmem %s3687_s23, 512  ;;  %s2416_s28 = smov [#allocation11]  }
 0x535   : > { %p2320_p1 = scmp.ne.s32.totalorder %s3687_s23, %s2319_s8  ;;  %s2323_s14 = sshll.u32 %s2416_s28, 4  ;;  %s2324_s14 = int_to_ptr.vmem [resolvable:$false] %s2323_s14 }
 0x536   : > { %s2325_s1 = scalar_lea.vmem %s2324_s14, 1024  ;;  %p2326_p9 = scmp.lt.s32.totalorder %s3687_s23, %s2324_s14 }
 0x537   : > { %p2321_p2 = pnand %p2320_p1, %p2651_p5  ;;  %p2327_p0 = scmp.lt.s32.totalorder %s2325_s1, %s2319_s8 }
 0x538   : > { %s3694_s3 = scalar_lea.hbm %s3831_s2, %s3830_s18 }
 0x539   : > { %p2322_p4 = pneg %p2321_p2  ;;  %p2328_p11 = por %p2327_p0, %p2326_p9 }
 0x53b   : > { %p2329_p8 = pnand %p2328_p11, %p2322_p4 }
 0x5f5   : > { %v1762_v22 = vpop.f32.mrb[12].mxu1 }
 0x5f6   : > { %1771 = vst [vmem:[%s582_s26] sm:$0xff] %v1762_v22  ;;  %v1764_v10 = vpop.f32.mrb[13].mxu1 }
 0x5f7   : > { %1772 = vst [vmem:[%s582_s26 + $0x8] sm:$0xff] %v1764_v10  ;;  %v1766_v8 = vpop.f32.mrb[14].mxu1 }
 0x5f8   : > { %1773 = vst [vmem:[%s582_s26 + $0x10] sm:$0xff] %v1766_v8  ;;  %v1768_v41 = vpop.f32.mrb[15].mxu1 }
 0x5f9   : > { %1774 = vst [vmem:[%s582_s26 + $0x18] sm:$0xff] %v1768_v41 }
 0x5fa   : > { %2332 = shalt.err (!%p2329_p8)
}
 0x5fb   : > { %s2333_s22 = scalar_lea.hbm %s3694_s3, 512  ;;  %s2337_s24 = scalar_lea.hbm %s3831_s2, 1024 }
 0x5fc   : > { %p2334_p13 = scmp.ne.s32.totalorder %s3694_s3, %s2333_s22  ;;  %p2338_p3 = scmp.lt.u32.totalorder %s3694_s3, %s3831_s2 }
 0x5fd   : > { %p2339_p7 = scmp.lt.u32.totalorder %s2337_s24, %s2333_s22  ;;  %p2341_p1 = scmp.lt.u32.totalorder %s2333_s22, %s3694_s3 }
 0x5fe   : > { %p2335_p6 = pnand %p2334_p13, %p2651_p5 }
 0x5ff   : > { %p2340_p12 = por %p2339_p7, %p2338_p3 }
 0x600   : > { %p2336_p10 = pneg %p2335_p6 }
 0x601   : > { %p2342_p2 = por %p2341_p1, %p2340_p12 }
 0x603   : > { %p2343_p4 = pnand %p2342_p2, %p2336_p10 }
 0x605   : > { %2346 = shalt.err (!%p2343_p4)
}
 0x606   : > { %s3832_s1 = smov 256  }
 0x607   : > { %2043 = dma.vmem_to_hbm [thread:$0]  (%p2651_p5), %s3687_s23, 512, %s3694_s3, %s1781_s0, %s3832_s1, %s3832_s1, %s3828_s15  }
 0x608 PF: > { %s3833_s8 = sld [smem:[#allocation18_spill]]  ;;  %s3834_s14 = sld [smem:[#allocation19_spill]] }
 0x609   : > { %p3836_p0 = scmp.ge.s32.totalorder %s2397_s21, 2 }
 0x60e   : > { %s1825_s26 = sand.u32 1, %s3833_s8   ;;  %p3835_p9 = scmp.ne.s32.totalorder %s3834_s14, 0 }
 0x60f   : > { %s1826_s22 = scalar_lea.sflag [#allocation4], %s1825_s26 }
 0x610   : > { %p2061_p11 = pnand %p3836_p0, %p3835_p9 }
 0x612   : > { %2376 = dma.done.wait (!%p2061_p11), %s1826_s22, 512  }
 0x613   : > { %2378 = vsyncadd (!%p2061_p11), %s1826_s22, 4294966784  ;;  %s1835_s12 = scalar_lea.sflag [#allocation12], %s1825_s26 }
 0x614   : > { %2380 = dma.done.wait (!%p2061_p11), %s1835_s12, 512  }
 0x615   : > { %2382 = vsyncadd (!%p2061_p11), %s1835_s12, 4294966784  ;;  %p34_p5 = scmp.ge.s32.totalorder %s2637_s13, 4   ;;  %s3837_s18 = smov %s2389_s19 }
 0x616   : > { %s3838_s19 = smov %s2393_s20  ;;  %s3839_s20 = smov %s2647_s10 }
 0x617   : > { %s3840_s21 = smov %s2637_s13  ;;  %36 = sbr.rel (!%p34_p5) target bundleno = 21 (0x15), region = 153 }
 0x61e   :  { %1840 = vsyncpa [#allocation3], 1 }
 0x61f   :  { %1842 = vsyncpa [#allocation3 + $0x1], 1 }
 0x620   :  { %1843 = vsyncpa [#allocation6], 1 }
 0x621   :  { %1844 = vsyncpa [#allocation9], 1 }
 0x622   :  { %1845 = vsyncpa [#allocation4], 1 }
 0x623   :  { %1847 = vsyncpa [#allocation4 + $0x1], 1 }
 0x624   :  { %1848 = vsyncpa [#allocation12], 1 }
 0x625   :  { %1850 = vsyncpa [#allocation12 + $0x1], 1 }

</bundles_post_ra>
